<compile_context>
chip_gen: v7x
topology: tpu7x:2x2x1
jax: 0.10.0
libtpu: 0.0.40
codegen_flags: <defaults>
</compile_context>

<pallas_src>
import math

import jax
import jax.numpy as jnp
from jax import lax
from jax.experimental import pallas as pl
from jax.experimental.pallas import tpu as pltpu

LSTM_IN = 162
HID = 128
X_FEAT = 484
X_FEAT_PAD = 512         # x padded to 512 cols so the dense1b slab slice is tile-aligned
DENSE = 512
OUT_LANES = 128          # lane-dense head output (column 0 is the real value)
W_DTYPE = jnp.bfloat16   # MXU operand dtype; accumulation is f32

# Row layout of the packed post-recurrence weight slab (bf16, DENSE cols wide).
# All section boundaries are multiples of 16 (bf16 sublane tile) -> static row
# slices inside the kernel are pure views, no VMEM copies.
R_W1A = (0, HID)                         # dense1, lstm half       (128, 512)
R_W1B = (HID, HID + X_FEAT_PAD)          # dense1, x half          (512, 512), 484 real rows
R_W2 = (R_W1B[1], R_W1B[1] + DENSE)
R_W3 = (R_W2[1], R_W2[1] + DENSE)
R_W4 = (R_W3[1], R_W3[1] + DENSE)
R_W5 = (R_W4[1], R_W4[1] + DENSE)
R_W6 = (R_W5[1], R_W5[1] + DENSE)        # dense6, replicated over cols 0:128
MLP_ROWS = R_W6[1]                        # 3200


# --------------------------- fused LSTM + MLP kernel -------------------------
def _make_fused_kernel(T, b_pad):
    def kernel(z_ref, x_ref, wih_ref, whh_ref, bias_ref, mlp_hbm_ref,
               vals_ref,
               gx_sc, mlp_sc, dma_sem):
        # Kick off the MLP-weight DMA immediately; it overlaps with the input
        # projection and the serial LSTM recurrence below.
        mlp_cp = pltpu.make_async_copy(mlp_hbm_ref, mlp_sc, dma_sem)
        mlp_cp.start()

        # Input projection for ALL timesteps in one MXU call; LSTM bias hoisted
        # out of the recurrence.  z_ref is (T*b_pad, 162) time-major, bf16.
        gx_sc[...] = (
            jnp.dot(z_ref[...], wih_ref[...], preferred_element_type=jnp.float32)
            + bias_ref[0:1, :]
        )

        whh = whh_ref[...]  # (HID, 4*HID), resident for the whole recurrence

        def step(t, carry):
            h, c = carry
            row0 = pl.multiple_of(t * b_pad, b_pad)
            gates = gx_sc[pl.ds(row0, b_pad), :] + jnp.dot(
                h.astype(W_DTYPE), whh, preferred_element_type=jnp.float32)
            # Gate order (i, f, o, g): one sigmoid over the contiguous 3*HID,
            # one tanh over the last HID.
            sig = jax.nn.sigmoid(gates[:, :3 * HID])
            i_g = sig[:, 0 * HID:1 * HID]
            f_g = sig[:, 1 * HID:2 * HID]
            o_g = sig[:, 2 * HID:3 * HID]
            g_g = jnp.tanh(gates[:, 3 * HID:4 * HID])
            c_new = f_g * c + i_g * g_g
            h_new = o_g * jnp.tanh(c_new)
            return h_new, c_new

        h0 = jnp.zeros((b_pad, HID), jnp.float32)
        c0 = jnp.zeros((b_pad, HID), jnp.float32)
        # Full unroll for DouZero's short sequences, capped at 8 to avoid vreg
        # spills if T grows.
        h, _ = lax.fori_loop(0, T, step, (h0, c0), unroll=min(T, 8))

        # MLP weights should already have landed (~3 MB hidden behind the loop).
        mlp_cp.wait()

        # dense1 on the (virtual) concat([h, x]) input, split into two matmuls.
        a = (jnp.dot(h.astype(W_DTYPE), mlp_sc[R_W1A[0]:R_W1A[1], :],
                     preferred_element_type=jnp.float32)
             + jnp.dot(x_ref[...], mlp_sc[R_W1B[0]:R_W1B[1], :],
                       preferred_element_type=jnp.float32)
             + bias_ref[1:2, :])
        a = jnp.maximum(a, 0.0)
        for layer, (r0, r1) in enumerate((R_W2, R_W3, R_W4, R_W5)):
            a = (jnp.dot(a.astype(W_DTYPE), mlp_sc[r0:r1, :],
                         preferred_element_type=jnp.float32)
                 + bias_ref[2 + layer:3 + layer, :])
            a = jnp.maximum(a, 0.0)

        # dense6 head, weight replicated over 128 lanes -> single unmasked
        # vreg-aligned store; column 0 is the real value.
        vals_ref[...] = (
            jnp.dot(a.astype(W_DTYPE), mlp_sc[R_W6[0]:R_W6[1], :OUT_LANES],
                    preferred_element_type=jnp.float32)
            + bias_ref[6:7, :OUT_LANES])

    return kernel


def fused_forward_call(z_tm2d, x_pad, params, T, b_pad):
    kernel = _make_fused_kernel(T, b_pad)
    vmem = pl.BlockSpec(memory_space=pltpu.MemorySpace.VMEM)
    hbm = pl.BlockSpec(memory_space=pl.ANY)
    args = (z_tm2d, x_pad,
            params["w_ih_t"], params["w_hh_t"], params["bias_slab"],
            params["mlp_slab"])
    return pl.pallas_call(
        kernel,
        out_shape=jax.ShapeDtypeStruct((b_pad, OUT_LANES), jnp.float32),
        in_specs=[vmem, vmem, vmem, vmem, vmem, hbm],
        out_specs=vmem,
        scratch_shapes=[
            pltpu.VMEM((T * b_pad, 4 * HID), jnp.float32),   # precomputed gates
            pltpu.VMEM((MLP_ROWS, DENSE), W_DTYPE),          # MLP weight slab
            pltpu.SemaphoreType.DMA(()),                     # its DMA semaphore
        ],
    )(*args)


# -------------------------- parameter construction ---------------------------
def _uniform(key, shape, bound):
    return jax.random.uniform(key, shape, jnp.float32, -bound, bound)


def init_params(key):
    keys = jax.random.split(key, 20)
    p = {}

    k_lstm = 1.0 / math.sqrt(HID)
    # LSTM weights stored pre-transposed (in, 4*HID) with gate order (i, f, o, g).
    # TODO(synk): when importing real PyTorch weights, permute the gates from
    #             PyTorch's (i, f, g, o) order to this kernel's (i, f, o, g).
    p["w_ih_t"] = _uniform(keys[0], (LSTM_IN, 4 * HID), k_lstm).astype(W_DTYPE)
    p["w_hh_t"] = _uniform(keys[1], (HID, 4 * HID), k_lstm).astype(W_DTYPE)
    b_ih = _uniform(keys[2], (1, 4 * HID), k_lstm)
    b_hh = _uniform(keys[3], (1, 4 * HID), k_lstm)

    # dense1: in = 128 + 484 = 612, split into the lstm part and the x part.
    k1 = 1.0 / math.sqrt(HID + X_FEAT)
    w1a = _uniform(keys[4], (HID, DENSE), k1)
    w1b = _uniform(keys[5], (X_FEAT, DENSE), k1)
    b1 = _uniform(keys[6], (1, DENSE), k1)

    k2 = 1.0 / math.sqrt(DENSE)
    dense_w, dense_b = [], []
    for i in range(4):  # dense2..dense5
        dense_w.append(_uniform(keys[7 + 2 * i], (DENSE, DENSE), k2))
        dense_b.append(_uniform(keys[8 + 2 * i], (1, DENSE), k2))
    w6 = _uniform(keys[15], (DENSE, 1), k2)
    b6 = _uniform(keys[16], (1, 1), k2)

    # One f32 bias slab (8, 512): row 0 = LSTM bias (b_ih + b_hh), rows 1..5 =
    # dense1..5 biases, row 6 = dense6 bias replicated over the first 128 lanes.
    bias = jnp.zeros((8, 4 * HID), jnp.float32)
    bias = bias.at[0].set((b_ih + b_hh)[0])
    bias = bias.at[1].set(b1[0])
    for i in range(4):
        bias = bias.at[2 + i].set(dense_b[i][0])
    bias = bias.at[6, :OUT_LANES].set(jnp.tile(b6, (1, OUT_LANES))[0])
    p["bias_slab"] = bias

    # One bf16 weight slab for everything needed only after the recurrence.
    slab = jnp.zeros((MLP_ROWS, DENSE), jnp.float32)
    slab = slab.at[R_W1A[0]:R_W1A[1]].set(w1a)
    slab = slab.at[R_W1B[0]:R_W1B[0] + X_FEAT].set(w1b)   # rows 484..512 stay 0
    for i, (r0, r1) in enumerate((R_W2, R_W3, R_W4, R_W5)):
        slab = slab.at[r0:r1].set(dense_w[i])
    slab = slab.at[R_W6[0]:R_W6[1], :OUT_LANES].set(jnp.tile(w6, (1, OUT_LANES)))
    p["mlp_slab"] = slab.astype(W_DTYPE)
    return p


# ------------------------------- forward pass --------------------------------
@jax.jit
def forward(z, x, params):
    # z: (B, T, 162) batch-first, x: (B, 484).
    # For best MXU utilization, callers should batch all legal actions of a
    # hand into a single call; B is padded to the next multiple of 16.
    B, T, _ = z.shape
    b_pad = max(16, ((B + 15) // 16) * 16)   # bf16 sublane tile
    z_tm2d = jnp.transpose(
        jnp.pad(z.astype(W_DTYPE), ((0, b_pad - B), (0, 0), (0, 0))),
        (1, 0, 2)).reshape(T * b_pad, LSTM_IN)
    x_p = jnp.pad(x.astype(W_DTYPE),
                  ((0, b_pad - B), (0, X_FEAT_PAD - X_FEAT)))

    vals = fused_forward_call(z_tm2d, x_p, params, T, b_pad)  # (b_pad, 128)
    values = vals[:B, :1]                                     # (B, 1), PyTorch semantics
    # Action path (return_value=False, flags=None): greedy argmax over batch.
    # TODO(synk): epsilon-greedy branch (flags.exp_epsilon + np.random) is
    #             host-side Python randomness; only the greedy path is here.
    action = jnp.argmax(values, axis=0)[0]
    return values, action


if __name__ == "__main__":
    key = jax.random.PRNGKey(0)
    k_param, k_z, k_x = jax.random.split(key, 3)

    B, T = 2, 8
    params = init_params(k_param)
    z = jax.random.normal(k_z, (B, T, LSTM_IN), jnp.float32)
    x = jax.random.normal(k_x, (B, X_FEAT), jnp.float32)

    values, action = forward(z, x, params)
    jax.block_until_ready(values)
    jax.block_until_ready(action)
    print("KERNEL_OK")
</pallas_src>

<mosaic_0001>
module attributes {stable_mosaic.version = 11 : i64} {
  func.func @kernel(%arg0: memref<128x162xbf16, #tpu.memory_space<vmem>>, %arg1: memref<16x512xbf16, #tpu.memory_space<vmem>>, %arg2: memref<162x512xbf16, #tpu.memory_space<vmem>>, %arg3: memref<128x512xbf16, #tpu.memory_space<vmem>>, %arg4: memref<8x512xf32, #tpu.memory_space<vmem>>, %arg5: memref<3200x512xbf16, #tpu.memory_space<any>>, %arg6: memref<16x128xf32, #tpu.memory_space<vmem>>, %arg7: memref<128x512xf32, #tpu.memory_space<vmem>>, %arg8: memref<3200x512xbf16, #tpu.memory_space<vmem>>, %arg9: memref<!tpu.dma_semaphore, #tpu.memory_space<semaphore_mem>>) attributes {dimension_semantics = [], scalar_prefetch = 0 : i64, scratch_operands = 3 : i64, tpu.core_type = #tpu.core_type<tc>} {
    tpu.enqueue_dma source(%arg5 : memref<3200x512xbf16, #tpu.memory_space<any>>) target(%arg8 : memref<3200x512xbf16, #tpu.memory_space<vmem>>) target_semaphore(%arg9 : memref<!tpu.dma_semaphore, #tpu.memory_space<semaphore_mem>>)
    %c0 = arith.constant 0 : index
    %c0_0 = arith.constant 0 : index
    %0 = vector.load %arg0[%c0, %c0_0] : memref<128x162xbf16, #tpu.memory_space<vmem>>, vector<128x162xbf16>
    %c0_1 = arith.constant 0 : index
    %c0_2 = arith.constant 0 : index
    %1 = vector.load %arg2[%c0_1, %c0_2] : memref<162x512xbf16, #tpu.memory_space<vmem>>, vector<162x512xbf16>
    %cst = arith.constant dense<0.000000e+00> : vector<128x512xf32>
    %2 = tpu.matmul %0, %1, %cst {dimension_numbers = #tpu.dot_dimension_numbers<[1], [0], [0], [1], [0, 0, 1, 1], [], []>} : vector<128x162xbf16>, vector<162x512xbf16>, vector<128x512xf32> -> vector<128x512xf32>
    %c0_3 = arith.constant 0 : index
    %c0_4 = arith.constant 0 : index
    %3 = vector.load %arg4[%c0_3, %c0_4] : memref<8x512xf32, #tpu.memory_space<vmem>>, vector<1x512xf32>
    %4 = vector.broadcast %3 : vector<1x512xf32> to vector<128x512xf32>
    %5 = arith.addf %2, %4 : vector<128x512xf32>
    %c0_5 = arith.constant 0 : index
    %c0_6 = arith.constant 0 : index
    %6 = vector.load %arg7[%c0_5, %c0_6] : memref<128x512xf32, #tpu.memory_space<vmem>>, vector<128x512xf32>
    tpu.vector_store %arg7[%c0_5, %c0_6], %5 {strides = array<i32>} : memref<128x512xf32, #tpu.memory_space<vmem>>, vector<128x512xf32>,
    %c0_7 = arith.constant 0 : index
    %c0_8 = arith.constant 0 : index
    %7 = vector.load %arg3[%c0_7, %c0_8] : memref<128x512xbf16, #tpu.memory_space<vmem>>, vector<128x512xbf16>
    %cst_9 = arith.constant 0.000000e+00 : f32
    %8 = vector.broadcast %cst_9 : f32 to vector<16x128xf32>
    %cst_10 = arith.constant 0.000000e+00 : f32
    %9 = vector.broadcast %cst_10 : f32 to vector<16x128xf32>
    %c0_i32 = arith.constant 0 : i32
    %c16_i32 = arith.constant 16 : i32
    %10 = arith.muli %c0_i32, %c16_i32 : i32
    %11 = tpu.assume_multiple %10, 16 : i32
    %12 = arith.index_cast %11 : i32 to index
    %c0_11 = arith.constant 0 : index
    %13 = vector.load %arg7[%12, %c0_11] : memref<128x512xf32, #tpu.memory_space<vmem>>, vector<16x512xf32>
    %14 = arith.truncf %8 : vector<16x128xf32> to vector<16x128xbf16>
    %cst_12 = arith.constant dense<0.000000e+00> : vector<16x512xf32>
    %15 = tpu.matmul %14, %7, %cst_12 {dimension_numbers = #tpu.dot_dimension_numbers<[1], [0], [0], [1], [0, 0, 1, 1], [], []>} : vector<16x128xbf16>, vector<128x512xbf16>, vector<16x512xf32> -> vector<16x512xf32>
    %16 = arith.addf %13, %15 : vector<16x512xf32>
    %17 = vector.extract_strided_slice %16 {offsets = [0, 0], sizes = [16, 384], strides = [1, 1]} : vector<16x512xf32> to vector<16x384xf32>
    %18 = arith.negf %17 : vector<16x384xf32>
    %19 = math.exp %18 : vector<16x384xf32>
    %cst_13 = arith.constant 1.000000e+00 : f32
    %20 = vector.broadcast %cst_13 : f32 to vector<16x384xf32>
    %21 = arith.addf %20, %19 : vector<16x384xf32>
    %22 = arith.divf %20, %21 : vector<16x384xf32>
    %23 = vector.extract_strided_slice %22 {offsets = [0, 0], sizes = [16, 128], strides = [1, 1]} : vector<16x384xf32> to vector<16x128xf32>
    %24 = vector.extract_strided_slice %22 {offsets = [0, 128], sizes = [16, 128], strides = [1, 1]} : vector<16x384xf32> to vector<16x128xf32>
    %25 = vector.extract_strided_slice %22 {offsets = [0, 256], sizes = [16, 128], strides = [1, 1]} : vector<16x384xf32> to vector<16x128xf32>
    %26 = vector.extract_strided_slice %16 {offsets = [0, 384], sizes = [16, 128], strides = [1, 1]} : vector<16x512xf32> to vector<16x128xf32>
    %27 = math.tanh %26 : vector<16x128xf32>
    %28 = arith.mulf %24, %9 : vector<16x128xf32>
    %29 = arith.mulf %23, %27 : vector<16x128xf32>
    %30 = arith.addf %28, %29 : vector<16x128xf32>
    %31 = math.tanh %30 : vector<16x128xf32>
    %32 = arith.mulf %25, %31 : vector<16x128xf32>
    %c1_i32 = arith.constant 1 : i32
    %c16_i32_14 = arith.constant 16 : i32
    %33 = arith.muli %c1_i32, %c16_i32_14 : i32
    %34 = tpu.assume_multiple %33, 16 : i32
    %35 = arith.index_cast %34 : i32 to index
    %c0_15 = arith.constant 0 : index
    %36 = vector.load %arg7[%35, %c0_15] : memref<128x512xf32, #tpu.memory_space<vmem>>, vector<16x512xf32>
    %37 = arith.truncf %32 : vector<16x128xf32> to vector<16x128xbf16>
    %cst_16 = arith.constant dense<0.000000e+00> : vector<16x512xf32>
    %38 = tpu.matmul %37, %7, %cst_16 {dimension_numbers = #tpu.dot_dimension_numbers<[1], [0], [0], [1], [0, 0, 1, 1], [], []>} : vector<16x128xbf16>, vector<128x512xbf16>, vector<16x512xf32> -> vector<16x512xf32>
    %39 = arith.addf %36, %38 : vector<16x512xf32>
    %40 = vector.extract_strided_slice %39 {offsets = [0, 0], sizes = [16, 384], strides = [1, 1]} : vector<16x512xf32> to vector<16x384xf32>
    %41 = arith.negf %40 : vector<16x384xf32>
    %42 = math.exp %41 : vector<16x384xf32>
    %cst_17 = arith.constant 1.000000e+00 : f32
    %43 = vector.broadcast %cst_17 : f32 to vector<16x384xf32>
    %44 = arith.addf %43, %42 : vector<16x384xf32>
    %45 = arith.divf %43, %44 : vector<16x384xf32>
    %46 = vector.extract_strided_slice %45 {offsets = [0, 0], sizes = [16, 128], strides = [1, 1]} : vector<16x384xf32> to vector<16x128xf32>
    %47 = vector.extract_strided_slice %45 {offsets = [0, 128], sizes = [16, 128], strides = [1, 1]} : vector<16x384xf32> to vector<16x128xf32>
    %48 = vector.extract_strided_slice %45 {offsets = [0, 256], sizes = [16, 128], strides = [1, 1]} : vector<16x384xf32> to vector<16x128xf32>
    %49 = vector.extract_strided_slice %39 {offsets = [0, 384], sizes = [16, 128], strides = [1, 1]} : vector<16x512xf32> to vector<16x128xf32>
    %50 = math.tanh %49 : vector<16x128xf32>
    %51 = arith.mulf %47, %30 : vector<16x128xf32>
    %52 = arith.mulf %46, %50 : vector<16x128xf32>
    %53 = arith.addf %51, %52 : vector<16x128xf32>
    %54 = math.tanh %53 : vector<16x128xf32>
    %55 = arith.mulf %48, %54 : vector<16x128xf32>
    %c2_i32 = arith.constant 2 : i32
    %c16_i32_18 = arith.constant 16 : i32
    %56 = arith.muli %c2_i32, %c16_i32_18 : i32
    %57 = tpu.assume_multiple %56, 16 : i32
    %58 = arith.index_cast %57 : i32 to index
    %c0_19 = arith.constant 0 : index
    %59 = vector.load %arg7[%58, %c0_19] : memref<128x512xf32, #tpu.memory_space<vmem>>, vector<16x512xf32>
    %60 = arith.truncf %55 : vector<16x128xf32> to vector<16x128xbf16>
    %cst_20 = arith.constant dense<0.000000e+00> : vector<16x512xf32>
    %61 = tpu.matmul %60, %7, %cst_20 {dimension_numbers = #tpu.dot_dimension_numbers<[1], [0], [0], [1], [0, 0, 1, 1], [], []>} : vector<16x128xbf16>, vector<128x512xbf16>, vector<16x512xf32> -> vector<16x512xf32>
    %62 = arith.addf %59, %61 : vector<16x512xf32>
    %63 = vector.extract_strided_slice %62 {offsets = [0, 0], sizes = [16, 384], strides = [1, 1]} : vector<16x512xf32> to vector<16x384xf32>
    %64 = arith.negf %63 : vector<16x384xf32>
    %65 = math.exp %64 : vector<16x384xf32>
    %cst_21 = arith.constant 1.000000e+00 : f32
    %66 = vector.broadcast %cst_21 : f32 to vector<16x384xf32>
    %67 = arith.addf %66, %65 : vector<16x384xf32>
    %68 = arith.divf %66, %67 : vector<16x384xf32>
    %69 = vector.extract_strided_slice %68 {offsets = [0, 0], sizes = [16, 128], strides = [1, 1]} : vector<16x384xf32> to vector<16x128xf32>
    %70 = vector.extract_strided_slice %68 {offsets = [0, 128], sizes = [16, 128], strides = [1, 1]} : vector<16x384xf32> to vector<16x128xf32>
    %71 = vector.extract_strided_slice %68 {offsets = [0, 256], sizes = [16, 128], strides = [1, 1]} : vector<16x384xf32> to vector<16x128xf32>
    %72 = vector.extract_strided_slice %62 {offsets = [0, 384], sizes = [16, 128], strides = [1, 1]} : vector<16x512xf32> to vector<16x128xf32>
    %73 = math.tanh %72 : vector<16x128xf32>
    %74 = arith.mulf %70, %53 : vector<16x128xf32>
    %75 = arith.mulf %69, %73 : vector<16x128xf32>
    %76 = arith.addf %74, %75 : vector<16x128xf32>
    %77 = math.tanh %76 : vector<16x128xf32>
    %78 = arith.mulf %71, %77 : vector<16x128xf32>
    %c3_i32 = arith.constant 3 : i32
    %c16_i32_22 = arith.constant 16 : i32
    %79 = arith.muli %c3_i32, %c16_i32_22 : i32
    %80 = tpu.assume_multiple %79, 16 : i32
    %81 = arith.index_cast %80 : i32 to index
    %c0_23 = arith.constant 0 : index
    %82 = vector.load %arg7[%81, %c0_23] : memref<128x512xf32, #tpu.memory_space<vmem>>, vector<16x512xf32>
    %83 = arith.truncf %78 : vector<16x128xf32> to vector<16x128xbf16>
    %cst_24 = arith.constant dense<0.000000e+00> : vector<16x512xf32>
    %84 = tpu.matmul %83, %7, %cst_24 {dimension_numbers = #tpu.dot_dimension_numbers<[1], [0], [0], [1], [0, 0, 1, 1], [], []>} : vector<16x128xbf16>, vector<128x512xbf16>, vector<16x512xf32> -> vector<16x512xf32>
    %85 = arith.addf %82, %84 : vector<16x512xf32>
    %86 = vector.extract_strided_slice %85 {offsets = [0, 0], sizes = [16, 384], strides = [1, 1]} : vector<16x512xf32> to vector<16x384xf32>
    %87 = arith.negf %86 : vector<16x384xf32>
    %88 = math.exp %87 : vector<16x384xf32>
    %cst_25 = arith.constant 1.000000e+00 : f32
    %89 = vector.broadcast %cst_25 : f32 to vector<16x384xf32>
    %90 = arith.addf %89, %88 : vector<16x384xf32>
    %91 = arith.divf %89, %90 : vector<16x384xf32>
    %92 = vector.extract_strided_slice %91 {offsets = [0, 0], sizes = [16, 128], strides = [1, 1]} : vector<16x384xf32> to vector<16x128xf32>
    %93 = vector.extract_strided_slice %91 {offsets = [0, 128], sizes = [16, 128], strides = [1, 1]} : vector<16x384xf32> to vector<16x128xf32>
    %94 = vector.extract_strided_slice %91 {offsets = [0, 256], sizes = [16, 128], strides = [1, 1]} : vector<16x384xf32> to vector<16x128xf32>
    %95 = vector.extract_strided_slice %85 {offsets = [0, 384], sizes = [16, 128], strides = [1, 1]} : vector<16x512xf32> to vector<16x128xf32>
    %96 = math.tanh %95 : vector<16x128xf32>
    %97 = arith.mulf %93, %76 : vector<16x128xf32>
    %98 = arith.mulf %92, %96 : vector<16x128xf32>
    %99 = arith.addf %97, %98 : vector<16x128xf32>
    %100 = math.tanh %99 : vector<16x128xf32>
    %101 = arith.mulf %94, %100 : vector<16x128xf32>
    %c4_i32 = arith.constant 4 : i32
    %c16_i32_26 = arith.constant 16 : i32
    %102 = arith.muli %c4_i32, %c16_i32_26 : i32
    %103 = tpu.assume_multiple %102, 16 : i32
    %104 = arith.index_cast %103 : i32 to index
    %c0_27 = arith.constant 0 : index
    %105 = vector.load %arg7[%104, %c0_27] : memref<128x512xf32, #tpu.memory_space<vmem>>, vector<16x512xf32>
    %106 = arith.truncf %101 : vector<16x128xf32> to vector<16x128xbf16>
    %cst_28 = arith.constant dense<0.000000e+00> : vector<16x512xf32>
    %107 = tpu.matmul %106, %7, %cst_28 {dimension_numbers = #tpu.dot_dimension_numbers<[1], [0], [0], [1], [0, 0, 1, 1], [], []>} : vector<16x128xbf16>, vector<128x512xbf16>, vector<16x512xf32> -> vector<16x512xf32>
    %108 = arith.addf %105, %107 : vector<16x512xf32>
    %109 = vector.extract_strided_slice %108 {offsets = [0, 0], sizes = [16, 384], strides = [1, 1]} : vector<16x512xf32> to vector<16x384xf32>
    %110 = arith.negf %109 : vector<16x384xf32>
    %111 = math.exp %110 : vector<16x384xf32>
    %cst_29 = arith.constant 1.000000e+00 : f32
    %112 = vector.broadcast %cst_29 : f32 to vector<16x384xf32>
    %113 = arith.addf %112, %111 : vector<16x384xf32>
    %114 = arith.divf %112, %113 : vector<16x384xf32>
    %115 = vector.extract_strided_slice %114 {offsets = [0, 0], sizes = [16, 128], strides = [1, 1]} : vector<16x384xf32> to vector<16x128xf32>
    %116 = vector.extract_strided_slice %114 {offsets = [0, 128], sizes = [16, 128], strides = [1, 1]} : vector<16x384xf32> to vector<16x128xf32>
    %117 = vector.extract_strided_slice %114 {offsets = [0, 256], sizes = [16, 128], strides = [1, 1]} : vector<16x384xf32> to vector<16x128xf32>
    %118 = vector.extract_strided_slice %108 {offsets = [0, 384], sizes = [16, 128], strides = [1, 1]} : vector<16x512xf32> to vector<16x128xf32>
    %119 = math.tanh %118 : vector<16x128xf32>
    %120 = arith.mulf %116, %99 : vector<16x128xf32>
    %121 = arith.mulf %115, %119 : vector<16x128xf32>
    %122 = arith.addf %120, %121 : vector<16x128xf32>
    %123 = math.tanh %122 : vector<16x128xf32>
    %124 = arith.mulf %117, %123 : vector<16x128xf32>
    %c5_i32 = arith.constant 5 : i32
    %c16_i32_30 = arith.constant 16 : i32
    %125 = arith.muli %c5_i32, %c16_i32_30 : i32
    %126 = tpu.assume_multiple %125, 16 : i32
    %127 = arith.index_cast %126 : i32 to index
    %c0_31 = arith.constant 0 : index
    %128 = vector.load %arg7[%127, %c0_31] : memref<128x512xf32, #tpu.memory_space<vmem>>, vector<16x512xf32>
    %129 = arith.truncf %124 : vector<16x128xf32> to vector<16x128xbf16>
    %cst_32 = arith.constant dense<0.000000e+00> : vector<16x512xf32>
    %130 = tpu.matmul %129, %7, %cst_32 {dimension_numbers = #tpu.dot_dimension_numbers<[1], [0], [0], [1], [0, 0, 1, 1], [], []>} : vector<16x128xbf16>, vector<128x512xbf16>, vector<16x512xf32> -> vector<16x512xf32>
    %131 = arith.addf %128, %130 : vector<16x512xf32>
    %132 = vector.extract_strided_slice %131 {offsets = [0, 0], sizes = [16, 384], strides = [1, 1]} : vector<16x512xf32> to vector<16x384xf32>
    %133 = arith.negf %132 : vector<16x384xf32>
    %134 = math.exp %133 : vector<16x384xf32>
    %cst_33 = arith.constant 1.000000e+00 : f32
    %135 = vector.broadcast %cst_33 : f32 to vector<16x384xf32>
    %136 = arith.addf %135, %134 : vector<16x384xf32>
    %137 = arith.divf %135, %136 : vector<16x384xf32>
    %138 = vector.extract_strided_slice %137 {offsets = [0, 0], sizes = [16, 128], strides = [1, 1]} : vector<16x384xf32> to vector<16x128xf32>
    %139 = vector.extract_strided_slice %137 {offsets = [0, 128], sizes = [16, 128], strides = [1, 1]} : vector<16x384xf32> to vector<16x128xf32>
    %140 = vector.extract_strided_slice %137 {offsets = [0, 256], sizes = [16, 128], strides = [1, 1]} : vector<16x384xf32> to vector<16x128xf32>
    %141 = vector.extract_strided_slice %131 {offsets = [0, 384], sizes = [16, 128], strides = [1, 1]} : vector<16x512xf32> to vector<16x128xf32>
    %142 = math.tanh %141 : vector<16x128xf32>
    %143 = arith.mulf %139, %122 : vector<16x128xf32>
    %144 = arith.mulf %138, %142 : vector<16x128xf32>
    %145 = arith.addf %143, %144 : vector<16x128xf32>
    %146 = math.tanh %145 : vector<16x128xf32>
    %147 = arith.mulf %140, %146 : vector<16x128xf32>
    %c6_i32 = arith.constant 6 : i32
    %c16_i32_34 = arith.constant 16 : i32
    %148 = arith.muli %c6_i32, %c16_i32_34 : i32
    %149 = tpu.assume_multiple %148, 16 : i32
    %150 = arith.index_cast %149 : i32 to index
    %c0_35 = arith.constant 0 : index
    %151 = vector.load %arg7[%150, %c0_35] : memref<128x512xf32, #tpu.memory_space<vmem>>, vector<16x512xf32>
    %152 = arith.truncf %147 : vector<16x128xf32> to vector<16x128xbf16>
    %cst_36 = arith.constant dense<0.000000e+00> : vector<16x512xf32>
    %153 = tpu.matmul %152, %7, %cst_36 {dimension_numbers = #tpu.dot_dimension_numbers<[1], [0], [0], [1], [0, 0, 1, 1], [], []>} : vector<16x128xbf16>, vector<128x512xbf16>, vector<16x512xf32> -> vector<16x512xf32>
    %154 = arith.addf %151, %153 : vector<16x512xf32>
    %155 = vector.extract_strided_slice %154 {offsets = [0, 0], sizes = [16, 384], strides = [1, 1]} : vector<16x512xf32> to vector<16x384xf32>
    %156 = arith.negf %155 : vector<16x384xf32>
    %157 = math.exp %156 : vector<16x384xf32>
    %cst_37 = arith.constant 1.000000e+00 : f32
    %158 = vector.broadcast %cst_37 : f32 to vector<16x384xf32>
    %159 = arith.addf %158, %157 : vector<16x384xf32>
    %160 = arith.divf %158, %159 : vector<16x384xf32>
    %161 = vector.extract_strided_slice %160 {offsets = [0, 0], sizes = [16, 128], strides = [1, 1]} : vector<16x384xf32> to vector<16x128xf32>
    %162 = vector.extract_strided_slice %160 {offsets = [0, 128], sizes = [16, 128], strides = [1, 1]} : vector<16x384xf32> to vector<16x128xf32>
    %163 = vector.extract_strided_slice %160 {offsets = [0, 256], sizes = [16, 128], strides = [1, 1]} : vector<16x384xf32> to vector<16x128xf32>
    %164 = vector.extract_strided_slice %154 {offsets = [0, 384], sizes = [16, 128], strides = [1, 1]} : vector<16x512xf32> to vector<16x128xf32>
    %165 = math.tanh %164 : vector<16x128xf32>
    %166 = arith.mulf %162, %145 : vector<16x128xf32>
    %167 = arith.mulf %161, %165 : vector<16x128xf32>
    %168 = arith.addf %166, %167 : vector<16x128xf32>
    %169 = math.tanh %168 : vector<16x128xf32>
    %170 = arith.mulf %163, %169 : vector<16x128xf32>
    %c7_i32 = arith.constant 7 : i32
    %c16_i32_38 = arith.constant 16 : i32
    %171 = arith.muli %c7_i32, %c16_i32_38 : i32
    %172 = tpu.assume_multiple %171, 16 : i32
    %173 = arith.index_cast %172 : i32 to index
    %c0_39 = arith.constant 0 : index
    %174 = vector.load %arg7[%173, %c0_39] : memref<128x512xf32, #tpu.memory_space<vmem>>, vector<16x512xf32>
    %175 = arith.truncf %170 : vector<16x128xf32> to vector<16x128xbf16>
    %cst_40 = arith.constant dense<0.000000e+00> : vector<16x512xf32>
    %176 = tpu.matmul %175, %7, %cst_40 {dimension_numbers = #tpu.dot_dimension_numbers<[1], [0], [0], [1], [0, 0, 1, 1], [], []>} : vector<16x128xbf16>, vector<128x512xbf16>, vector<16x512xf32> -> vector<16x512xf32>
    %177 = arith.addf %174, %176 : vector<16x512xf32>
    %178 = vector.extract_strided_slice %177 {offsets = [0, 0], sizes = [16, 384], strides = [1, 1]} : vector<16x512xf32> to vector<16x384xf32>
    %179 = arith.negf %178 : vector<16x384xf32>
    %180 = math.exp %179 : vector<16x384xf32>
    %cst_41 = arith.constant 1.000000e+00 : f32
    %181 = vector.broadcast %cst_41 : f32 to vector<16x384xf32>
    %182 = arith.addf %181, %180 : vector<16x384xf32>
    %183 = arith.divf %181, %182 : vector<16x384xf32>
    %184 = vector.extract_strided_slice %183 {offsets = [0, 0], sizes = [16, 128], strides = [1, 1]} : vector<16x384xf32> to vector<16x128xf32>
    %185 = vector.extract_strided_slice %183 {offsets = [0, 128], sizes = [16, 128], strides = [1, 1]} : vector<16x384xf32> to vector<16x128xf32>
    %186 = vector.extract_strided_slice %183 {offsets = [0, 256], sizes = [16, 128], strides = [1, 1]} : vector<16x384xf32> to vector<16x128xf32>
    %187 = vector.extract_strided_slice %177 {offsets = [0, 384], sizes = [16, 128], strides = [1, 1]} : vector<16x512xf32> to vector<16x128xf32>
    %188 = math.tanh %187 : vector<16x128xf32>
    %189 = arith.mulf %185, %168 : vector<16x128xf32>
    %190 = arith.mulf %184, %188 : vector<16x128xf32>
    %191 = arith.addf %189, %190 : vector<16x128xf32>
    %192 = math.tanh %191 : vector<16x128xf32>
    %193 = arith.mulf %186, %192 : vector<16x128xf32>
    %c8_i32 = arith.constant 8 : i32
    tpu.wait_dma2 semaphore(%arg9 : memref<!tpu.dma_semaphore, #tpu.memory_space<semaphore_mem>>) src(%arg5 : memref<3200x512xbf16, #tpu.memory_space<any>>) dst(%arg8 : memref<3200x512xbf16, #tpu.memory_space<vmem>>)
    %194 = arith.truncf %193 : vector<16x128xf32> to vector<16x128xbf16>
    %c0_42 = arith.constant 0 : index
    %c0_43 = arith.constant 0 : index
    %195 = vector.load %arg8[%c0_42, %c0_43] : memref<3200x512xbf16, #tpu.memory_space<vmem>>, vector<128x512xbf16>
    %cst_44 = arith.constant dense<0.000000e+00> : vector<16x512xf32>
    %196 = tpu.matmul %194, %195, %cst_44 {dimension_numbers = #tpu.dot_dimension_numbers<[1], [0], [0], [1], [0, 0, 1, 1], [], []>} : vector<16x128xbf16>, vector<128x512xbf16>, vector<16x512xf32> -> vector<16x512xf32>
    %c0_45 = arith.constant 0 : index
    %c0_46 = arith.constant 0 : index
    %197 = vector.load %arg1[%c0_45, %c0_46] : memref<16x512xbf16, #tpu.memory_space<vmem>>, vector<16x512xbf16>
    %c128 = arith.constant 128 : index
    %c0_47 = arith.constant 0 : index
    %198 = vector.load %arg8[%c128, %c0_47] : memref<3200x512xbf16, #tpu.memory_space<vmem>>, vector<512x512xbf16>
    %cst_48 = arith.constant dense<0.000000e+00> : vector<16x512xf32>
    %199 = tpu.matmul %197, %198, %cst_48 {dimension_numbers = #tpu.dot_dimension_numbers<[1], [0], [0], [1], [0, 0, 1, 1], [], []>} : vector<16x512xbf16>, vector<512x512xbf16>, vector<16x512xf32> -> vector<16x512xf32>
    %200 = arith.addf %196, %199 : vector<16x512xf32>
    %c1 = arith.constant 1 : index
    %c0_49 = arith.constant 0 : index
    %201 = vector.load %arg4[%c1, %c0_49] : memref<8x512xf32, #tpu.memory_space<vmem>>, vector<1x512xf32>
    %202 = vector.broadcast %201 : vector<1x512xf32> to vector<16x512xf32>
    %203 = arith.addf %200, %202 : vector<16x512xf32>
    %cst_50 = arith.constant 0.000000e+00 : f32
    %204 = vector.broadcast %cst_50 : f32 to vector<16x512xf32>
    %205 = arith.maximumf %203, %204 : vector<16x512xf32>
    %206 = arith.truncf %205 : vector<16x512xf32> to vector<16x512xbf16>
    %c640 = arith.constant 640 : index
    %c0_51 = arith.constant 0 : index
    %207 = vector.load %arg8[%c640, %c0_51] : memref<3200x512xbf16, #tpu.memory_space<vmem>>, vector<512x512xbf16>
    %cst_52 = arith.constant dense<0.000000e+00> : vector<16x512xf32>
    %208 = tpu.matmul %206, %207, %cst_52 {dimension_numbers = #tpu.dot_dimension_numbers<[1], [0], [0], [1], [0, 0, 1, 1], [], []>} : vector<16x512xbf16>, vector<512x512xbf16>, vector<16x512xf32> -> vector<16x512xf32>
    %c2 = arith.constant 2 : index
    %c0_53 = arith.constant 0 : index
    %209 = vector.load %arg4[%c2, %c0_53] : memref<8x512xf32, #tpu.memory_space<vmem>>, vector<1x512xf32>
    %210 = vector.broadcast %209 : vector<1x512xf32> to vector<16x512xf32>
    %211 = arith.addf %208, %210 : vector<16x512xf32>
    %cst_54 = arith.constant 0.000000e+00 : f32
    %212 = vector.broadcast %cst_54 : f32 to vector<16x512xf32>
    %213 = arith.maximumf %211, %212 : vector<16x512xf32>
    %214 = arith.truncf %213 : vector<16x512xf32> to vector<16x512xbf16>
    %c1152 = arith.constant 1152 : index
    %c0_55 = arith.constant 0 : index
    %215 = vector.load %arg8[%c1152, %c0_55] : memref<3200x512xbf16, #tpu.memory_space<vmem>>, vector<512x512xbf16>
    %cst_56 = arith.constant dense<0.000000e+00> : vector<16x512xf32>
    %216 = tpu.matmul %214, %215, %cst_56 {dimension_numbers = #tpu.dot_dimension_numbers<[1], [0], [0], [1], [0, 0, 1, 1], [], []>} : vector<16x512xbf16>, vector<512x512xbf16>, vector<16x512xf32> -> vector<16x512xf32>
    %c3 = arith.constant 3 : index
    %c0_57 = arith.constant 0 : index
    %217 = vector.load %arg4[%c3, %c0_57] : memref<8x512xf32, #tpu.memory_space<vmem>>, vector<1x512xf32>
    %218 = vector.broadcast %217 : vector<1x512xf32> to vector<16x512xf32>
    %219 = arith.addf %216, %218 : vector<16x512xf32>
    %cst_58 = arith.constant 0.000000e+00 : f32
    %220 = vector.broadcast %cst_58 : f32 to vector<16x512xf32>
    %221 = arith.maximumf %219, %220 : vector<16x512xf32>
    %222 = arith.truncf %221 : vector<16x512xf32> to vector<16x512xbf16>
    %c1664 = arith.constant 1664 : index
    %c0_59 = arith.constant 0 : index
    %223 = vector.load %arg8[%c1664, %c0_59] : memref<3200x512xbf16, #tpu.memory_space<vmem>>, vector<512x512xbf16>
    %cst_60 = arith.constant dense<0.000000e+00> : vector<16x512xf32>
    %224 = tpu.matmul %222, %223, %cst_60 {dimension_numbers = #tpu.dot_dimension_numbers<[1], [0], [0], [1], [0, 0, 1, 1], [], []>} : vector<16x512xbf16>, vector<512x512xbf16>, vector<16x512xf32> -> vector<16x512xf32>
    %c4 = arith.constant 4 : index
    %c0_61 = arith.constant 0 : index
    %225 = vector.load %arg4[%c4, %c0_61] : memref<8x512xf32, #tpu.memory_space<vmem>>, vector<1x512xf32>
    %226 = vector.broadcast %225 : vector<1x512xf32> to vector<16x512xf32>
    %227 = arith.addf %224, %226 : vector<16x512xf32>
    %cst_62 = arith.constant 0.000000e+00 : f32
    %228 = vector.broadcast %cst_62 : f32 to vector<16x512xf32>
    %229 = arith.maximumf %227, %228 : vector<16x512xf32>
    %230 = arith.truncf %229 : vector<16x512xf32> to vector<16x512xbf16>
    %c2176 = arith.constant 2176 : index
    %c0_63 = arith.constant 0 : index
    %231 = vector.load %arg8[%c2176, %c0_63] : memref<3200x512xbf16, #tpu.memory_space<vmem>>, vector<512x512xbf16>
    %cst_64 = arith.constant dense<0.000000e+00> : vector<16x512xf32>
    %232 = tpu.matmul %230, %231, %cst_64 {dimension_numbers = #tpu.dot_dimension_numbers<[1], [0], [0], [1], [0, 0, 1, 1], [], []>} : vector<16x512xbf16>, vector<512x512xbf16>, vector<16x512xf32> -> vector<16x512xf32>
    %c5 = arith.constant 5 : index
    %c0_65 = arith.constant 0 : index
    %233 = vector.load %arg4[%c5, %c0_65] : memref<8x512xf32, #tpu.memory_space<vmem>>, vector<1x512xf32>
    %234 = vector.broadcast %233 : vector<1x512xf32> to vector<16x512xf32>
    %235 = arith.addf %232, %234 : vector<16x512xf32>
    %cst_66 = arith.constant 0.000000e+00 : f32
    %236 = vector.broadcast %cst_66 : f32 to vector<16x512xf32>
    %237 = arith.maximumf %235, %236 : vector<16x512xf32>
    %238 = arith.truncf %237 : vector<16x512xf32> to vector<16x512xbf16>
    %c2688 = arith.constant 2688 : index
    %c0_67 = arith.constant 0 : index
    %239 = vector.load %arg8[%c2688, %c0_67] : memref<3200x512xbf16, #tpu.memory_space<vmem>>, vector<512x128xbf16>
    %cst_68 = arith.constant dense<0.000000e+00> : vector<16x128xf32>
    %240 = tpu.matmul %238, %239, %cst_68 {dimension_numbers = #tpu.dot_dimension_numbers<[1], [0], [0], [1], [0, 0, 1, 1], [], []>} : vector<16x512xbf16>, vector<512x128xbf16>, vector<16x128xf32> -> vector<16x128xf32>
    %c6 = arith.constant 6 : index
    %c0_69 = arith.constant 0 : index
    %241 = vector.load %arg4[%c6, %c0_69] : memref<8x512xf32, #tpu.memory_space<vmem>>, vector<1x128xf32>
    %242 = vector.broadcast %241 : vector<1x128xf32> to vector<16x128xf32>
    %243 = arith.addf %240, %242 : vector<16x128xf32>
    %c0_70 = arith.constant 0 : index
    %c0_71 = arith.constant 0 : index
    %244 = vector.load %arg6[%c0_70, %c0_71] : memref<16x128xf32, #tpu.memory_space<vmem>>, vector<16x128xf32>
    tpu.vector_store %arg6[%c0_70, %c0_71], %243 {strides = array<i32>} : memref<16x128xf32, #tpu.memory_space<vmem>>, vector<16x128xf32>,
    return
  }
}

</mosaic_0001>

<bundles_post_ra>
// kernel: forward.1
= control target key start
LH: loop header
LB: loop body
LE: loop exit
PB: predicated region body
PF: predicated region fallthrough
CT: control target
= control target key end

     0   :  { %11 = vsyncpa [#allocation6], 0  ;;  %s5876_s0 = inlined_call_operand.vmem [shape: bf16[128,162], index: 0, kind: input, shape index: {}]   ;;  %s5877_s1 = inlined_call_operand.vmem [shape: bf16[16,512], index: 1, kind: input, shape index: {}]   ;;  %s5878_s2 = inlined_call_operand.hbm [shape: bf16[162,512], index: 2, kind: input, shape index: {}]   ;;  %s5879_s3 = inlined_call_operand.hbm [shape: bf16[128,512], index: 3, kind: input, shape index: {}]   ;;  %s5880_s4 = inlined_call_operand.hbm [shape: f32[8,512], index: 4, kind: input, shape index: {}]   ;;  %s5881_s5 = inlined_call_operand.hbm [shape: bf16[3200,512], index: 5, kind: input, shape index: {}]   ;;  %s5882_s6 = inlined_call_operand.vmem [shape: f32[16,128], index: 6, kind: output, shape index: {}]  }
   0x1   :  { %12 = vsyncpa [#allocation8], 0  ;;  %s5108_s21 = smov [#allocation7]   ;;  %s5109_s23 = smov [#allocation5]  }
   0x2   :  { %s34_s22 = sshll.u32 %s5108_s21, 4  ;;  %s22_s24 = sshll.u32 %s5109_s23, 4  ;;  %s35_s22 = int_to_ptr.vmem [resolvable:$true] %s34_s22  ;;  %s5157_s24 = int_to_ptr.vmem [resolvable:$true] %s22_s24 }
   0x3   :  { %s5036_s27 = scalar_lea.hbm %s5879_s3, 4096 }
   0x4   :  { %p5037_p0 = scmp.ne.s32.totalorder %s5879_s3, %s5036_s27  ;;  %p5040_p1 = scmp.lt.u32.totalorder %s5036_s27, %s5879_s3 }
   0x6   :  { %p5042_p2 = pnand %p5040_p1, %p5037_p0 }
   0x8   :  { %5045 = shalt.err (!%p5042_p2)
}
   0x9   :  { %s5046_s8 = scalar_lea.vmem %s35_s22, 4096  ;;  %p5051_p4 = scmp.lt.s32.totalorder %s35_s22, %s35_s22 }
   0xa   :  { %p5047_p3 = scmp.ne.s32.totalorder %s35_s22, %s5046_s8  ;;  %p5052_p5 = scmp.lt.s32.totalorder %s5046_s8, %s5046_s8 }
   0xc   :  { %p5053_p6 = por %p5052_p5, %p5051_p4 }
   0xe   :  { %p5054_p7 = pnand %p5053_p6, %p5047_p3 }
  0x10   :  { %5057 = shalt.err (!%p5054_p7)
}
  0x11   :  { %s5110_s9 = smov 256   ;;  %s5111_s10 = smov 16  }
  0x12   :  { %40 = dma.hbm_to_vmem [thread:$0]  %s5879_s3, 4096, %s35_s22, [#allocation8], %s5110_s9, %s5110_s9, %s5111_s10  }
  0x13   :  { %s5058_s15 = scalar_lea.hbm %s5878_s2, 5376 }
  0x14   :  { %p5059_p8 = scmp.ne.s32.totalorder %s5878_s2, %s5058_s15  ;;  %p5062_p9 = scmp.lt.u32.totalorder %s5058_s15, %s5878_s2 }
  0x16   :  { %p5064_p10 = pnand %p5062_p9, %p5059_p8 }
  0x18   :  { %5067 = shalt.err (!%p5064_p10)
}
  0x19   :  { %s5068_s20 = scalar_lea.vmem %s5157_s24, 5376  ;;  %p5073_p12 = scmp.lt.s32.totalorder %s5157_s24, %s5157_s24 }
  0x1a   :  { %p5069_p11 = scmp.ne.s32.totalorder %s5157_s24, %s5068_s20  ;;  %p5074_p13 = scmp.lt.s32.totalorder %s5068_s20, %s5068_s20 }
  0x1c   :  { %p5075_p0 = por %p5074_p13, %p5073_p12 }
  0x1e   :  { %p5076_p1 = pnand %p5075_p0, %p5069_p11 }
  0x20   :  { %5079 = shalt.err (!%p5076_p1)
}
  0x21   :  { %28 = dma.hbm_to_vmem [thread:$0]  %s5878_s2, 5376, %s5157_s24, [#allocation6], %s5110_s9, %s5110_s9, %s5111_s10  }
  0x22   :  { %s5112_s22 = smov [#allocation9]   ;;  %s5080_s27 = scalar_lea.hbm %s5880_s4, 512 }
  0x23   :  { %s47_s23 = sshll.u32 %s5112_s22, 4  ;;  %p5081_p2 = scmp.ne.s32.totalorder %s5880_s4, %s5080_s27  ;;  %s48_s23 = int_to_ptr.vmem [resolvable:$true] %s47_s23 }
  0x24   :  { %p5084_p3 = scmp.lt.u32.totalorder %s5080_s27, %s5880_s4 }
  0x26   :  { %p5086_p4 = pnand %p5084_p3, %p5081_p2 }
  0x28   :  { %5089 = shalt.err (!%p5086_p4)
}
  0x29   :  { %s5090_s8 = scalar_lea.vmem %s48_s23, 512  ;;  %p5095_p6 = scmp.lt.s32.totalorder %s48_s23, %s48_s23 }
  0x2a   :  { %p5091_p5 = scmp.ne.s32.totalorder %s48_s23, %s5090_s8  ;;  %p5096_p7 = scmp.lt.s32.totalorder %s5090_s8, %s5090_s8 }
  0x2c   :  { %p5097_p8 = por %p5096_p7, %p5095_p6 }
  0x2e   :  { %p5098_p9 = pnand %p5097_p8, %p5091_p5 }
  0x30   :  { %5101 = shalt.err (!%p5098_p9)
}
  0x31   :  { %50 = dma.hbm_to_vmem [thread:$0]  %s5880_s4, 512, %s48_s23, [#allocation8]  }
  0x32   :  { %5102 = dma.done.wait [#allocation6], 5376  }
  0x33   :  { %5103 = vsyncadd [#allocation6], 4294961920 }
  0x34   :  { %5104 = dma.done.wait [#allocation8], 4608  }
  0x35   :  { %5105 = vsyncadd [#allocation8], 4294962688  ;;  %s65_s10 = sld [smem:[#allocation0]]   ;;  %s5113_s11 = smov 512   ;;  %vm458_vm0 = vcmask 277504   ;;  %vm483_vm1 = vcmask 1040384  }
  0x36   :  { %77 = sst [smem:[#allocation11]] %s5113_s11  ;;  %s5114_s12 = smov 4  }
  0x37   :  { %79 = sst [smem:[#allocation11 + $0x1]] %s5113_s11  ;;  %s5115_s13 = smov 64  }
  0x38   :  { %81 = sst [smem:[#allocation11 + $0x2]] %s5114_s12  ;;  %s5116_s14 = smov 128  }
  0x39   :  { %83 = sst [smem:[#allocation11 + $0x3]] %s5115_s13  ;;  %s5117_s15 = smov 2  }
  0x3a   :  { %85 = sst [smem:[#allocation11 + $0x4]] %s5116_s14  ;;  %s5118_s16 = smov [#allocation3]  }
  0x3b   :  { %87 = sst [smem:[#allocation11 + $0x5]] %s5117_s15  ;;  %s73_s17 = sshll.u32 %s5118_s16, 4  ;;  %s74_s17 = int_to_ptr.vmem [resolvable:$true] %s73_s17 }
  0x3c   :  { %s4175_s18 = sshll.u32 %s65_s10, 26  ;;  %89 = sst [smem:[#allocation11 + $0x6]] %s5110_s9 }
  0x3d   :  { %s4176_s4 = sadd.s32 134217728, %s4175_s18  ;;  %91 = sst [smem:[#allocation11 + $0x7]] %s5115_s13 }
  0x3e   :  { %93 = sst [smem:[#allocation11 + $0x8]] %s5114_s12  ;;  %s5119_s19 = smov [#allocation4]  }
  0x3f   :  { %s5120_s20 = smov [#allocation10]  }
  0x40   :  { %95 = dma.general %s5881_s5, 102400, %s74_s17, %s5119_s19, %s5120_s20, [#allocation11], %s4176_s4, 0  }
  0x41   :  { %v4606_v0 = vld [vmem:[#allocation5 + $0x4] ss:$16 sps:$4 sm:$0xff]   ;;  %v4608_v1 = vld [vmem:[#allocation5 + $0xc] ss:$16 sps:$4 sm:$0xff]   ;;  %v4610_v2 = vld [vmem:[#allocation5] ss:$16 sps:$4 sm:$0xff]  }
  0x42   :  { %496 = vmatprep.subr.bf16.mxu0 %v4606_v0  ;;  %v4611_v3 = vld [vmem:[#allocation5 + $0x8] ss:$16 sps:$4 sm:$0xff]   ;;  %609 = vmatprep.subr.bf16.mxu1 %v4608_v1  ;;  %v4612_v4 = vld [vmem:[#allocation5 + $0x24] ss:$16 sps:$4 sm:$0xff]   ;;  %v4614_v5 = vld [vmem:[#allocation5 + $0x2c] ss:$16 sps:$4 sm:$0xff]  }
  0x43   :  { %497 = vmatpush1.bf16.msra.mxu0 %v4610_v2  ;;  %610 = vmatpush1.bf16.msra.mxu1 %v4611_v3  ;;  %v4616_v6 = vld [vmem:[#allocation5 + $0x20] ss:$16 sps:$4 sm:$0xff]   ;;  %v4617_v7 = vld [vmem:[#allocation5 + $0x28] ss:$16 sps:$4 sm:$0xff]   ;;  %v4618_v8 = vld [vmem:[#allocation5 + $0x44] ss:$16 sps:$4 sm:$0xff]  }
  0x44   :  { %498 = vmatprep.subr.bf16.mxu0 %v4612_v4  ;;  %611 = vmatprep.subr.bf16.mxu1 %v4614_v5  ;;  %v4620_v9 = vld [vmem:[#allocation5 + $0x4c] ss:$16 sps:$4 sm:$0xff]   ;;  %v4622_v10 = vld [vmem:[#allocation5 + $0x40] ss:$16 sps:$4 sm:$0xff]   ;;  %v4623_v11 = vld [vmem:[#allocation5 + $0x48] ss:$16 sps:$4 sm:$0xff]  }
  0x45   :  { %v4624_v12 = vld [vmem:[#allocation5 + $0x64] ss:$16 sps:$4 sm:$0xff]   ;;  %v4626_v13 = vld [vmem:[#allocation5 + $0x6c] ss:$16 sps:$4 sm:$0xff]   ;;  %v4628_v14 = vld [vmem:[#allocation5 + $0x60] ss:$16 sps:$4 sm:$0xff]  }
  0x46   :  { %v4629_v15 = vld [vmem:[#allocation5 + $0x68] ss:$16 sps:$4 sm:$0xff]   ;;  %v4630_v16 = vld [vmem:[#allocation5 + $0x84] ss:$16 sps:$4 sm:$0xff]   ;;  %v4632_v17 = vld [vmem:[#allocation5 + $0x8c] ss:$16 sps:$4 sm:$0xff]  }
  0x47   :  { %499 = vmatpush1.bf16.msra.mxu0 %v4616_v6  ;;  %612 = vmatpush1.bf16.msra.mxu1 %v4617_v7  ;;  %v4634_v18 = vld [vmem:[#allocation5 + $0x80] ss:$16 sps:$4 sm:$0xff]   ;;  %v4635_v19 = vld [vmem:[#allocation5 + $0x88] ss:$16 sps:$4 sm:$0xff]   ;;  %v4636_v20 = vld [vmem:[#allocation5 + $0xa4] ss:$16 sps:$4 sm:$0xff]  }
  0x48   :  { %500 = vmatprep.subr.bf16.mxu0 %v4618_v8  ;;  %613 = vmatprep.subr.bf16.mxu1 %v4620_v9  ;;  %v4638_v21 = vld [vmem:[#allocation5 + $0xac] ss:$16 sps:$4 sm:$0xff]   ;;  %v4640_v22 = vld [vmem:[#allocation5 + $0xa0] ss:$16 sps:$4 sm:$0xff]   ;;  %v4641_v23 = vld [vmem:[#allocation5 + $0xa8] ss:$16 sps:$4 sm:$0xff]  }
  0x49   :  { %v4642_v24 = vld [vmem:[#allocation5 + $0xc4] ss:$16 sps:$4 sm:$0xff]   ;;  %v4644_v25 = vld [vmem:[#allocation5 + $0xcc] ss:$16 sps:$4 sm:$0xff]   ;;  %v4646_v26 = vld [vmem:[#allocation5 + $0xc0] ss:$16 sps:$4 sm:$0xff]  }
  0x4a   :  { %v4647_v27 = vld [vmem:[#allocation5 + $0xc8] ss:$16 sps:$4 sm:$0xff]   ;;  %v4648_v28 = vld [vmem:[#allocation5 + $0xe4] ss:$16 sps:$4 sm:$0xff]   ;;  %v4650_v29 = vld [vmem:[#allocation5 + $0xec] ss:$16 sps:$4 sm:$0xff]  }
  0x4b   :  { %501 = vmatpush1.bf16.msra.mxu0 %v4622_v10  ;;  %614 = vmatpush1.bf16.msra.mxu1 %v4623_v11  ;;  %v4652_v30 = vld [vmem:[#allocation5 + $0xe0] ss:$16 sps:$4 sm:$0xff]   ;;  %v4653_v31 = vld [vmem:[#allocation5 + $0xe8] ss:$16 sps:$4 sm:$0xff]   ;;  %v4672_v32 = vld [vmem:[%s5876_s0 + $0x4] ss:$8 sps:$4 sm:$0xff]  }
  0x4c   :  { %502 = vmatprep.subr.bf16.mxu0 %v4624_v12  ;;  %615 = vmatprep.subr.bf16.mxu1 %v4626_v13  ;;  %v4654_v33 = vld [vmem:[#allocation5 + $0x104] ss:$16 sps:$4 sm:$0xff]   ;;  %v4656_v34 = vld [vmem:[#allocation5 + $0x10c] ss:$16 sps:$4 sm:$0xff]   ;;  %v4658_v35 = vld [vmem:[#allocation5 + $0x100] ss:$16 sps:$4 sm:$0xff]  }
  0x4d   :  { %4238 = vmatprep.mubr.msk.bf16.mxu0 %vm458_vm0, %v4672_v32  ;;  %4247 = vmatprep.mubr.msk.bf16.mxu1 %vm458_vm0, %v4672_v32  ;;  %v4659_v36 = vld [vmem:[#allocation5 + $0x108] ss:$16 sps:$4 sm:$0xff]   ;;  %v4660_v37 = vld [vmem:[#allocation5 + $0x124] ss:$16 sps:$4 sm:$0xff]   ;;  %v4662_v38 = vld [vmem:[#allocation5 + $0x12c] ss:$16 sps:$4 sm:$0xff]  }
  0x4e   :  { %v152_v39 = vld [vmem:[#allocation5 + $0x140] sm:$0x11]  ;;  %v153_v40 = vld [vmem:[#allocation5 + $0x148] sm:$0x11]  ;;  %v4676_v53 = vld [vmem:[%s5876_s0 + $0x14] ss:$8 sps:$4 sm:$0xff]  }
  0x4f   :  { %503 = vmatpush1.bf16.msra.mxu0 %v4628_v14  ;;  %616 = vmatpush1.bf16.msra.mxu1 %v4629_v15  ;;  %v4664_v41 = vld [vmem:[#allocation5 + $0x120] ss:$16 sps:$4 sm:$0xff]   ;;  %v4665_v42 = vld [vmem:[#allocation5 + $0x128] ss:$16 sps:$4 sm:$0xff]   ;;  %v4234_v43 = vcombine.high %v152_v39, %v152_v39  ;;  %v4236_v44 = vcombine.high %v153_v40, %v153_v40  ;;  %v4233_v45 = vcombine.low %v152_v39, %v152_v39  ;;  %v5213_v47 = vld [vmem:[#allocation7 + $0x4] ss:$16 sps:$4 sm:$0xff]  }
  0x50   :  { %504 = vmatprep.subr.bf16.mxu0 %v4630_v16  ;;  %617 = vmatprep.subr.bf16.mxu1 %v4632_v17  ;;  %v4235_v46 = vcombine.low %v153_v40, %v153_v40  ;;  %v5215_v50 = vld [vmem:[#allocation7 + $0xc] ss:$16 sps:$4 sm:$0xff]   ;;  %v4670_v51 = vld [vmem:[%s5876_s0] ss:$8 sps:$4 sm:$0xff]   ;;  %v5226_v54 = vld [vmem:[#allocation7 + $0x24] ss:$16 sps:$4 sm:$0xff]  }
  0x51   :  { %v485_v48 = vsel %vm483_vm1, %v4233_v45, 0  ;;  %v5220_v52 = vld [vmem:[#allocation7] ss:$16 sps:$4 sm:$0xff]   ;;  %v5229_v55 = vld [vmem:[#allocation7 + $0x8] ss:$16 sps:$4 sm:$0xff]   ;;  %v5121_v32 = vmov 0  }
  0x52   :  { %v491_v49 = vsel %vm483_vm1, %v4235_v46, 0  ;;  %v5231_v56 = vld [vmem:[#allocation7 + $0x2c] ss:$16 sps:$4 sm:$0xff]   ;;  %v5235_v57 = vld [vmem:[#allocation7 + $0x20] ss:$16 sps:$4 sm:$0xff]  }
  0x53   :  { %505 = vmatpush1.bf16.msra.mxu0 %v4634_v18  ;;  %618 = vmatpush1.bf16.msra.mxu1 %v4635_v19  ;;  %v5239_v58 = vld [vmem:[#allocation7 + $0x44] ss:$16 sps:$4 sm:$0xff]   ;;  %v5242_v59 = vld [vmem:[#allocation7 + $0x28] ss:$16 sps:$4 sm:$0xff]   ;;  %v5252_v62 = vld [vmem:[#allocation7 + $0x40] ss:$16 sps:$4 sm:$0xff]  }
  0x54   :  { %506 = vmatprep.subr.bf16.mxu0 %v4636_v20  ;;  %619 = vmatprep.subr.bf16.mxu1 %v4638_v21  ;;  %v4678_v60 = vld [vmem:[%s5876_s0 + $0x10] ss:$8 sps:$4 sm:$0xff]   ;;  %v4682_v61 = vld [vmem:[%s5876_s0 + $0x24] ss:$8 sps:$4 sm:$0xff]   ;;  %v4686_v6 = vld [vmem:[%s5876_s0 + $0x20] ss:$8 sps:$4 sm:$0xff]  }
  0x55   :  { %v5255_v63 = vld [vmem:[#allocation7 + $0x64] ss:$16 sps:$4 sm:$0xff]   ;;  %v5257_v0 = vld [vmem:[#allocation7 + $0x4c] ss:$16 sps:$4 sm:$0xff]   ;;  %v5260_v1 = vld [vmem:[#allocation7 + $0x48] ss:$16 sps:$4 sm:$0xff]  }
  0x56   :  { %v5262_v2 = vld [vmem:[#allocation7 + $0x6c] ss:$16 sps:$4 sm:$0xff]   ;;  %v5267_v3 = vld [vmem:[#allocation7 + $0x60] ss:$16 sps:$4 sm:$0xff]   ;;  %v5270_v4 = vld [vmem:[#allocation7 + $0x84] ss:$16 sps:$4 sm:$0xff]  }
  0x57   :  { %507 = vmatpush1.bf16.msra.mxu0 %v4640_v22  ;;  %620 = vmatpush1.bf16.msra.mxu1 %v4641_v23  ;;  %v5274_v5 = vld [vmem:[#allocation7 + $0x68] ss:$16 sps:$4 sm:$0xff]   ;;  %v4691_v7 = vld [vmem:[%s5876_s0 + $0x34] ss:$8 sps:$4 sm:$0xff]   ;;  %v5284_v8 = vld [vmem:[#allocation7 + $0x80] ss:$16 sps:$4 sm:$0xff]  }
  0x58   :  { %508 = vmatprep.subr.bf16.mxu0 %v4642_v24  ;;  %621 = vmatprep.subr.bf16.mxu1 %v4644_v25  ;;  %v5286_v9 = vld [vmem:[#allocation7 + $0x8c] ss:$16 sps:$4 sm:$0xff]   ;;  %v5289_v10 = vld [vmem:[#allocation7 + $0xa4] ss:$16 sps:$4 sm:$0xff]   ;;  %v5292_v11 = vld [vmem:[#allocation7 + $0x88] ss:$16 sps:$4 sm:$0xff]  }
  0x59   :  { %v5294_v12 = vld [vmem:[#allocation7 + $0xac] ss:$16 sps:$4 sm:$0xff]   ;;  %v5299_v13 = vld [vmem:[#allocation7 + $0xa0] ss:$16 sps:$4 sm:$0xff]   ;;  %v5303_v14 = vld [vmem:[#allocation7 + $0xc4] ss:$16 sps:$4 sm:$0xff]  }
  0x5a   :  { %v5306_v15 = vld [vmem:[#allocation7 + $0xa8] ss:$16 sps:$4 sm:$0xff]   ;;  %v4700_v17 = vld [vmem:[%s5876_s0 + $0x44] ss:$8 sps:$4 sm:$0xff]   ;;  %v5316_v18 = vld [vmem:[#allocation7 + $0xc0] ss:$16 sps:$4 sm:$0xff]  }
  0x5b   :  { %509 = vmatpush1.bf16.msra.mxu0 %v4646_v26  ;;  %622 = vmatpush1.bf16.msra.mxu1 %v4647_v27  ;;  %v4695_v16 = vld [vmem:[%s5876_s0 + $0x30] ss:$8 sps:$4 sm:$0xff]   ;;  %v5318_v19 = vld [vmem:[#allocation7 + $0xcc] ss:$16 sps:$4 sm:$0xff]   ;;  %v5322_v20 = vld [vmem:[#allocation7 + $0xe4] ss:$16 sps:$4 sm:$0xff]  }
  0x5c   :  { %510 = vmatprep.subr.bf16.mxu0 %v4648_v28  ;;  %623 = vmatprep.subr.bf16.mxu1 %v4650_v29  ;;  %v5324_v21 = vld [vmem:[#allocation7 + $0xc8] ss:$16 sps:$4 sm:$0xff]   ;;  %v5326_v22 = vld [vmem:[#allocation7 + $0xec] ss:$16 sps:$4 sm:$0xff]   ;;  %v5332_v23 = vld [vmem:[#allocation7 + $0xe0] ss:$16 sps:$4 sm:$0xff]  }
  0x5d   :  { %v5336_v24 = vld [vmem:[#allocation7 + $0xe8] ss:$16 sps:$4 sm:$0xff]   ;;  %v4709_v26 = vld [vmem:[%s5876_s0 + $0x54] ss:$8 sps:$4 sm:$0xff]   ;;  %v4718_v28 = vld [vmem:[%s5876_s0 + $0x64] ss:$8 sps:$4 sm:$0xff]  }
  0x5e   :  { %v4704_v25 = vld [vmem:[%s5876_s0 + $0x40] ss:$8 sps:$4 sm:$0xff]   ;;  %v4713_v27 = vld [vmem:[%s5876_s0 + $0x50] ss:$8 sps:$4 sm:$0xff]  }
  0x5f   :  { %511 = vmatpush1.bf16.msra.mxu0 %v4652_v30  ;;  %624 = vmatpush1.bf16.msra.mxu1 %v4653_v31  ;;  %v4722_v29 = vld [vmem:[%s5876_s0 + $0x60] ss:$8 sps:$4 sm:$0xff]   ;;  %v4730_v30 = vld [vmem:[%s5876_s0 + $0x74] ss:$8 sps:$4 sm:$0xff]   ;;  %v4732_v31 = vld [vmem:[%s5876_s0 + $0x70] ss:$8 sps:$4 sm:$0xff]  }
  0x60   :  { %512 = vmatprep.subr.bf16.mxu0 %v4654_v33  ;;  %625 = vmatprep.subr.bf16.mxu1 %v4656_v34  ;;  %v156_v33 = vlaneseq }
  0x62   :  { %v157_v34 = vshrl.u32 %v156_v33, 7 }
  0x63   :  { %513 = vmatpush1.bf16.msra.mxu0 %v4658_v35  ;;  %626 = vmatpush1.bf16.msra.mxu1 %v4659_v36  ;;  %v154_v36 = vld [vmem:[#allocation9] ss:$8 sm:$0xf] }
  0x64   :  { %514 = vmatprep.subr.bf16.mxu0 %v4660_v37  ;;  %627 = vmatprep.subr.bf16.mxu1 %v4662_v38  ;;  %v5408_v35 = vsub.s32 0, %v157_v34  ;;  %v5410_v37 = vsub.s32 1, %v157_v34 }
  0x66   :  { %v5413_v38 = vrot.slane %v154_v36, %v5408_v35  ;;  %v5416_v39 = vrot.slane %v154_v36, %v5410_v37 }
  0x67   :  { %515 = vmatpush1.bf16.msra.mxu0 %v4664_v41  ;;  %628 = vmatpush1.bf16.msra.mxu1 %v4665_v42  ;;  %v5418_v41 = vsub.s32 2, %v157_v34 }
  0x68   :  { %4237 = vmatprep.subr.msk.bf16.mxu0 %vm483_vm1, %v4234_v43  ;;  %4246 = vmatprep.subr.msk.bf16.mxu1 %vm483_vm1, %v4236_v44 }
  0x6b   :  { %517 = vmatpush1.bf16.msra.mxu0 %v485_v48  ;;  %630 = vmatpush1.bf16.msra.mxu1 %v491_v49 }
  0x6c   :  { %989 = vmatprep.subr.bf16.mxu0 %v5213_v47  ;;  %1032 = vmatprep.subr.bf16.mxu1 %v5215_v50 }
  0x6e   :  { %529 = vmatmul.mubr.bf16.vlgmr.msra.gmra.mrb[0].mxu0 %v4670_v51  ;;  %642 = vmatmul.mubr.bf16.vlgmr.msra.gmra.mrb[0].mxu1 %v4670_v51 }
  0x6f   :  { %990 = vmatpush1.bf16.msra.mxu0 %v5220_v52  ;;  %4239 = vmatprep.mubr.msk.bf16.mxu0 %vm458_vm0, %v4676_v53 }
  0x70   :  { %4248 = vmatprep.mubr.msk.bf16.mxu1 %vm458_vm0, %v4676_v53  ;;  %991 = vmatprep.subr.bf16.mxu0 %v5226_v54  ;;  %v5422_v53 = vsub.s32 3, %v157_v34 }
  0x71   :  { %1033 = vmatpush1.bf16.msra.mxu1 %v5229_v55 }
  0x72   :  { %1034 = vmatprep.subr.bf16.mxu1 %v5231_v56 }
  0x73   :  { %992 = vmatpush1.bf16.msra.mxu0 %v5235_v57 }
  0x74   :  { %993 = vmatprep.subr.bf16.mxu0 %v5239_v58 }
  0x75   :  { %1035 = vmatpush1.bf16.msra.mxu1 %v5242_v59 }
  0x76   :  { %539 = vmatmul.mubr.bf16.gmra.mrb[4].mxu0 %v4678_v60  ;;  %652 = vmatmul.mubr.bf16.gmra.mrb[4].mxu1 %v4678_v60 }
  0x77   :  { %4240 = vmatprep.mubr.msk.bf16.mxu0 %vm458_vm0, %v4682_v61  ;;  %4249 = vmatprep.mubr.msk.bf16.mxu1 %vm458_vm0, %v4682_v61 }
  0x78   :  { %994 = vmatpush1.bf16.msra.mxu0 %v5252_v62  ;;  %1036 = vmatprep.subr.bf16.mxu1 %v5257_v0 }
  0x79   :  { %995 = vmatprep.subr.bf16.mxu0 %v5255_v63  ;;  %1037 = vmatpush1.bf16.msra.mxu1 %v5260_v1 }
  0x7a   :  { %1038 = vmatprep.subr.bf16.mxu1 %v5262_v2 }
  0x7c   :  { %996 = vmatpush1.bf16.msra.mxu0 %v5267_v3 }
  0x7d   :  { %997 = vmatprep.subr.bf16.mxu0 %v5270_v4  ;;  %1039 = vmatpush1.bf16.msra.mxu1 %v5274_v5 }
  0x7e   :  { %549 = vmatmul.mubr.bf16.gmra.mrb[8].mxu0 %v4686_v6  ;;  %662 = vmatmul.mubr.bf16.gmra.mrb[8].mxu1 %v4686_v6 }
  0x7f   :  { %4241 = vmatprep.mubr.msk.bf16.mxu0 %vm458_vm0, %v4691_v7  ;;  %4250 = vmatprep.mubr.msk.bf16.mxu1 %vm458_vm0, %v4691_v7  ;;  %v5426_v7 = vrot.slane %v154_v36, %v5418_v41 }
  0x80   :  { %998 = vmatpush1.bf16.msra.mxu0 %v5284_v8  ;;  %1040 = vmatprep.subr.bf16.mxu1 %v5286_v9 }
  0x81   :  { %999 = vmatprep.subr.bf16.mxu0 %v5289_v10  ;;  %1041 = vmatpush1.bf16.msra.mxu1 %v5292_v11 }
  0x82   :  { %1042 = vmatprep.subr.bf16.mxu1 %v5294_v12 }
  0x84   :  { %1000 = vmatpush1.bf16.msra.mxu0 %v5299_v13 }
  0x85   :  { %1001 = vmatprep.subr.bf16.mxu0 %v5303_v14  ;;  %1043 = vmatpush1.bf16.msra.mxu1 %v5306_v15 }
  0x86   :  { %559 = vmatmul.mubr.bf16.gmra.mrb[12].mxu0 %v4695_v16  ;;  %672 = vmatmul.mubr.bf16.gmra.mrb[12].mxu1 %v4695_v16 }
  0x87   :  { %4242 = vmatprep.mubr.msk.bf16.mxu0 %vm458_vm0, %v4700_v17  ;;  %4251 = vmatprep.mubr.msk.bf16.mxu1 %vm458_vm0, %v4700_v17 }
  0x88   :  { %1002 = vmatpush1.bf16.msra.mxu0 %v5316_v18  ;;  %1044 = vmatprep.subr.bf16.mxu1 %v5318_v19 }
  0x89   :  { %1003 = vmatprep.subr.bf16.mxu0 %v5322_v20  ;;  %1045 = vmatpush1.bf16.msra.mxu1 %v5324_v21 }
  0x8a   :  { %1046 = vmatprep.subr.bf16.mxu1 %v5326_v22 }
  0x8c   :  { %1004 = vmatpush1.bf16.msra.mxu0 %v5332_v23 }
  0x8d   :  { %1047 = vmatpush1.bf16.msra.mxu1 %v5336_v24  ;;  %1143 = vmatprep.subr.bf16.mxu0 %v5213_v47 }
  0x8e   :  { %569 = vmatmul.mubr.bf16.gmra.mrb[16].mxu0 %v4704_v25  ;;  %682 = vmatmul.mubr.bf16.gmra.mrb[16].mxu1 %v4704_v25 }
  0x8f   :  { %4243 = vmatprep.mubr.msk.bf16.mxu0 %vm458_vm0, %v4709_v26  ;;  %4252 = vmatprep.mubr.msk.bf16.mxu1 %vm458_vm0, %v4709_v26 }
  0x90   :  { %1186 = vmatprep.subr.bf16.mxu1 %v5215_v50 }
  0x96   :  { %579 = vmatmul.mubr.bf16.gmra.mrb[20].mxu0 %v4713_v27  ;;  %692 = vmatmul.mubr.bf16.gmra.mrb[20].mxu1 %v4713_v27  ;;  %v5430_v27 = vrot.slane %v154_v36, %v5422_v53 }
  0x97   :  { %4244 = vmatprep.mubr.msk.bf16.mxu0 %vm458_vm0, %v4718_v28  ;;  %4253 = vmatprep.mubr.msk.bf16.mxu1 %vm458_vm0, %v4718_v28 }
  0x9e   :  { %589 = vmatmul.mubr.bf16.gmra.mrb[24].mxu0 %v4722_v29  ;;  %702 = vmatmul.mubr.bf16.gmra.mrb[24].mxu1 %v4722_v29 }
  0x9f   :  { %4245 = vmatprep.mubr.msk.bf16.mxu0 %vm458_vm0, %v4730_v30  ;;  %4254 = vmatprep.mubr.msk.bf16.mxu1 %vm458_vm0, %v4730_v30 }
  0xa6   :  { %599 = vmatmul.mubr.bf16.gmra.mrb[28].mxu0 %v4732_v31  ;;  %712 = vmatmul.mubr.bf16.gmra.mrb[28].mxu1 %v4732_v31 }
  0xa7   :  { %1021 = vmatprep.mubr.bf16.mxu0 %v5121_v32  ;;  %1064 = vmatprep.mubr.bf16.mxu1 %v5121_v32 }
  0xae   :  { %1022 = vmatmul.mubr.bf16.vlgmr.msra.gmra.mrb[0].mxu0 %v5121_v32  ;;  %1065 = vmatmul.mubr.bf16.vlgmr.msra.gmra.mrb[0].mxu1 %v5121_v32 }
  0xaf   :  { %1144 = vmatpush1.bf16.msra.mxu0 %v5220_v52  ;;  %1187 = vmatpush1.bf16.msra.mxu1 %v5229_v55 }
  0xb0   :  { %1145 = vmatprep.subr.bf16.mxu0 %v5226_v54  ;;  %1188 = vmatprep.subr.bf16.mxu1 %v5231_v56 }
  0xb1   :  { %1175 = vmatprep.mubr.bf16.mxu0 %v5121_v32  ;;  %1218 = vmatprep.mubr.bf16.mxu1 %v5121_v32 }
  0xb3   :  { %1146 = vmatpush1.bf16.msra.mxu0 %v5235_v57  ;;  %1189 = vmatpush1.bf16.msra.mxu1 %v5242_v59 }
  0xb4   :  { %1147 = vmatprep.subr.bf16.mxu0 %v5239_v58  ;;  %1190 = vmatprep.subr.bf16.mxu1 %v5257_v0 }
  0xb7   :  { %1148 = vmatpush1.bf16.msra.mxu0 %v5252_v62  ;;  %1191 = vmatpush1.bf16.msra.mxu1 %v5260_v1 }
  0xb8   :  { %1149 = vmatprep.subr.bf16.mxu0 %v5255_v63  ;;  %1192 = vmatprep.subr.bf16.mxu1 %v5262_v2 }
  0xbb   :  { %1150 = vmatpush1.bf16.msra.mxu0 %v5267_v3  ;;  %1193 = vmatpush1.bf16.msra.mxu1 %v5274_v5 }
  0xbc   :  { %1151 = vmatprep.subr.bf16.mxu0 %v5270_v4  ;;  %1194 = vmatprep.subr.bf16.mxu1 %v5286_v9 }
  0xbf   :  { %1152 = vmatpush1.bf16.msra.mxu0 %v5284_v8  ;;  %1195 = vmatpush1.bf16.msra.mxu1 %v5292_v11 }
  0xc0   :  { %1153 = vmatprep.subr.bf16.mxu0 %v5289_v10  ;;  %1196 = vmatprep.subr.bf16.mxu1 %v5294_v12 }
  0xc3   :  { %1154 = vmatpush1.bf16.msra.mxu0 %v5299_v13  ;;  %1197 = vmatpush1.bf16.msra.mxu1 %v5306_v15 }
  0xc4   :  { %1155 = vmatprep.subr.bf16.mxu0 %v5303_v14  ;;  %1198 = vmatprep.subr.bf16.mxu1 %v5318_v19 }
  0xc7   :  { %1156 = vmatpush1.bf16.msra.mxu0 %v5316_v18  ;;  %1199 = vmatpush1.bf16.msra.mxu1 %v5324_v21 }
  0xc8   :  { %1157 = vmatprep.subr.bf16.mxu0 %v5322_v20  ;;  %1200 = vmatprep.subr.bf16.mxu1 %v5326_v22 }
  0xcb   :  { %1158 = vmatpush1.bf16.msra.mxu0 %v5332_v23  ;;  %1201 = vmatpush1.bf16.msra.mxu1 %v5336_v24 }
  0xcc   :  { %1297 = vmatprep.subr.bf16.mxu0 %v5213_v47  ;;  %1340 = vmatprep.subr.bf16.mxu1 %v5215_v50 }
 0x181   :  { %v1023_v40 = vpop.f32.mrb[0].mxu0  ;;  %v1066_v42 = vpop.f32.mrb[0].mxu1 }
 0x182   :  { %v4384_v43 = vadd.f32 %v1023_v40, %v5413_v38  ;;  %v1025_v44 = vpop.f32.mrb[1].mxu0  ;;  %v1068_v45 = vpop.f32.mrb[1].mxu1  ;;  %v4416_v28 = vadd.f32 %v1066_v42, %v5426_v7 }
 0x183   :  { %v4385_v46 = vadd.f32 %v1025_v44, %v5416_v39  ;;  %v1027_v48 = vpop.f32.mrb[2].mxu0  ;;  %v1070_v49 = vpop.f32.mrb[2].mxu1  ;;  %v4417_v30 = vadd.f32 %v1068_v45, %v5430_v27 }
 0x184   :  { %v4287_v51 = vmul.f32 -1.442695, %v4384_v43  ;;  %v4386_v60 = vadd.f32 %v1027_v48, %v5413_v38  ;;  %v1029_v61 = vpop.f32.mrb[3].mxu0  ;;  %v1072_v6 = vpop.f32.mrb[3].mxu1  ;;  %v4418_v29 = vadd.f32 %v1070_v49, %v5426_v7  ;;  %v4289_v31 = vmul.f32 -1.442695, %v4416_v28 }
 0x185   :  { %v4288_v16 = vmul.f32 -1.442695, %v4385_v46  ;;  %v4387_v17 = vadd.f32 %v1029_v61, %v5416_v39  ;;  %v4419_v40 = vadd.f32 %v1072_v6, %v5430_v27 }
 0x186   :  { %4742 = vpow2.f32 %v4287_v51  ;;  %v4290_v25 = vmul.f32 -1.442695, %v4386_v60  ;;  %v4292_v33 = vmul.f32 -1.442695, %v4418_v29 }
 0x187   :  { %v4291_v26 = vmul.f32 -1.442695, %v4387_v17  ;;  %4744 = vpow2.f32 %v4288_v16 }
 0x188   :  { %4746 = vpow2.f32 %v4290_v25 }
 0x189   :  { %4748 = vpow2.f32 %v4291_v26 }
 0x18a   :  { %4750 = vtanh.f32 %v4417_v30 }
 0x18b   :  { %4752 = vpow2.f32 %v4289_v31 }
 0x18c   :  { %4754 = vpow2.f32 %v4292_v33 }
 0x190   :  { %v4743_v34 = vpop.eup %4742 }
 0x191   :  { %v1101_v43 = vadd.f32 1.0, %v4743_v34  ;;  %v4745_v44 = vpop.eup %4744 }
 0x192   :  { %v4747_v36 = vpop.eup %4746  ;;  %v1102_v46 = vadd.f32 1.0, %v4745_v44 }
 0x193   :  { %4756 = vrcp.f32 %v1101_v43  ;;  %v1104_v42 = vadd.f32 1.0, %v4747_v36  ;;  %v4749_v48 = vpop.eup %4748 }
 0x194   :  { %4758 = vtanh.f32 %v4419_v40  ;;  %v1105_v49 = vadd.f32 1.0, %v4749_v48  ;;  %v4751_v45 = vpop.eup %4750 }
 0x195   :  { %4760 = vrcp.f32 %v1102_v46  ;;  %v4753_v51 = vpop.eup %4752 }
 0x196   :  { %4762 = vrcp.f32 %v1104_v42  ;;  %v4755_v60 = vpop.eup %4754  ;;  %v1103_v26 = vadd.f32 1.0, %v4753_v51 }
 0x197   :  { %4764 = vrcp.f32 %v1105_v49  ;;  %v1106_v33 = vadd.f32 1.0, %v4755_v60 }
 0x198   :  { %4766 = vrcp.f32 %v1103_v26 }
 0x19d   :  { %v4757_v61 = vpop.eup %4756 }
 0x19e   :  { %v4759_v16 = vpop.eup %4758  ;;  %v1123_v6 = vmul.f32 %v4757_v61, %v4751_v45 }
 0x19f   :  { %v4761_v17 = vpop.eup %4760 }
 0x1a0   :  { %v4763_v25 = vpop.eup %4762  ;;  %v1121_v28 = vmul.f32 0.0, %v4761_v17 }
 0x1a1   :  { %v1124_v29 = vmul.f32 %v4763_v25, %v4759_v16  ;;  %v4765_v30 = vpop.eup %4764 }
 0x1a2   :  { %v5436_v31 = vadd.f32 %v1123_v6, %v1121_v28  ;;  %v1122_v34 = vmul.f32 0.0, %v4765_v30  ;;  %v4767_v43 = vpop.eup %4766 }
 0x1a4   :  { %4768 = vtanh.f32 %v5436_v31  ;;  %v5439_v40 = vadd.f32 %v1124_v29, %v1122_v34 }
 0x1a5   :  { %4770 = vrcp.f32 %v1106_v33 }
 0x1a6   :  { %4772 = vtanh.f32 %v5439_v40 }
 0x1ae   :  { %v4769_v44 = vpop.eup %4768 }
 0x1af   :  { %v4771_v36 = vpop.eup %4770  ;;  %v1129_v42 = vmul.f32 %v4769_v44, %v4767_v43 }
 0x1b0   :  { %v4773_v46 = vpop.eup %4772 }
 0x1b1   :  { %v1130_v48 = vmul.f32 %v4773_v46, %v4771_v36 }
 0x1b3   :  { %v1142_v49 = vpack.c.bf16 %v1130_v48, %v1129_v42 }
 0x1b5   :  { %1176 = vmatmul.mubr.bf16.vlgmr.msra.gmra.mrb[4].mxu0 %v1142_v49  ;;  %1219 = vmatmul.mubr.bf16.vlgmr.msra.gmra.mrb[4].mxu1 %v1142_v49 }
 0x1b6   :  { %1298 = vmatpush1.bf16.msra.mxu0 %v5220_v52  ;;  %1341 = vmatpush1.bf16.msra.mxu1 %v5229_v55 }
 0x1b7   :  { %1299 = vmatprep.subr.bf16.mxu0 %v5226_v54  ;;  %1342 = vmatprep.subr.bf16.mxu1 %v5231_v56 }
 0x1b8   :  { %1329 = vmatprep.mubr.bf16.mxu0 %v5121_v32  ;;  %1372 = vmatprep.mubr.bf16.mxu1 %v5121_v32 }
 0x1ba   :  { %1300 = vmatpush1.bf16.msra.mxu0 %v5235_v57  ;;  %1343 = vmatpush1.bf16.msra.mxu1 %v5242_v59 }
 0x1bb   :  { %1301 = vmatprep.subr.bf16.mxu0 %v5239_v58  ;;  %1344 = vmatprep.subr.bf16.mxu1 %v5257_v0 }
 0x1be   :  { %1302 = vmatpush1.bf16.msra.mxu0 %v5252_v62  ;;  %1345 = vmatpush1.bf16.msra.mxu1 %v5260_v1 }
 0x1bf   :  { %1303 = vmatprep.subr.bf16.mxu0 %v5255_v63  ;;  %1346 = vmatprep.subr.bf16.mxu1 %v5262_v2 }
 0x1c2   :  { %1304 = vmatpush1.bf16.msra.mxu0 %v5267_v3  ;;  %1347 = vmatpush1.bf16.msra.mxu1 %v5274_v5 }
 0x1c3   :  { %1305 = vmatprep.subr.bf16.mxu0 %v5270_v4  ;;  %1348 = vmatprep.subr.bf16.mxu1 %v5286_v9 }
 0x1c6   :  { %1306 = vmatpush1.bf16.msra.mxu0 %v5284_v8  ;;  %1349 = vmatpush1.bf16.msra.mxu1 %v5292_v11 }
 0x1c7   :  { %1307 = vmatprep.subr.bf16.mxu0 %v5289_v10  ;;  %1350 = vmatprep.subr.bf16.mxu1 %v5294_v12 }
 0x1ca   :  { %1308 = vmatpush1.bf16.msra.mxu0 %v5299_v13  ;;  %1351 = vmatpush1.bf16.msra.mxu1 %v5306_v15 }
 0x1cb   :  { %1309 = vmatprep.subr.bf16.mxu0 %v5303_v14  ;;  %1352 = vmatprep.subr.bf16.mxu1 %v5318_v19 }
 0x1ce   :  { %1310 = vmatpush1.bf16.msra.mxu0 %v5316_v18  ;;  %1353 = vmatpush1.bf16.msra.mxu1 %v5324_v21 }
 0x1cf   :  { %1311 = vmatprep.subr.bf16.mxu0 %v5322_v20  ;;  %1354 = vmatprep.subr.bf16.mxu1 %v5326_v22 }
 0x1d2   :  { %1312 = vmatpush1.bf16.msra.mxu0 %v5332_v23  ;;  %1355 = vmatpush1.bf16.msra.mxu1 %v5336_v24 }
 0x1d3   :  { %1451 = vmatprep.subr.bf16.mxu0 %v5213_v47  ;;  %1494 = vmatprep.subr.bf16.mxu1 %v5215_v50 }
 0x288   :  { %v1177_v45 = vpop.f32.mrb[4].mxu0  ;;  %v1220_v51 = vpop.f32.mrb[4].mxu1 }
 0x289   :  { %v4388_v60 = vadd.f32 %v1177_v45, %v5413_v38  ;;  %v1179_v61 = vpop.f32.mrb[5].mxu0  ;;  %v1222_v16 = vpop.f32.mrb[5].mxu1  ;;  %v4420_v36 = vadd.f32 %v1220_v51, %v5426_v7 }
 0x28a   :  { %v4389_v6 = vadd.f32 %v1179_v61, %v5416_v39  ;;  %v1181_v17 = vpop.f32.mrb[6].mxu0  ;;  %v1224_v25 = vpop.f32.mrb[6].mxu1  ;;  %v4421_v42 = vadd.f32 %v1222_v16, %v5430_v27 }
 0x28b   :  { %v4293_v26 = vmul.f32 -1.442695, %v4388_v60  ;;  %v4390_v28 = vadd.f32 %v1181_v17, %v5413_v38  ;;  %v1183_v29 = vpop.f32.mrb[7].mxu0  ;;  %v1226_v30 = vpop.f32.mrb[7].mxu1  ;;  %v4422_v46 = vadd.f32 %v1224_v25, %v5426_v7  ;;  %v4295_v48 = vmul.f32 -1.442695, %v4420_v36 }
 0x28c   :  { %v4294_v33 = vmul.f32 -1.442695, %v4389_v6  ;;  %v4391_v34 = vadd.f32 %v1183_v29, %v5416_v39  ;;  %v4423_v60 = vadd.f32 %v1226_v30, %v5430_v27 }
 0x28d   :  { %4774 = vpow2.f32 %v4293_v26  ;;  %v4296_v43 = vmul.f32 -1.442695, %v4390_v28  ;;  %v4298_v49 = vmul.f32 -1.442695, %v4422_v46 }
 0x28e   :  { %v4297_v44 = vmul.f32 -1.442695, %v4391_v34  ;;  %4776 = vpow2.f32 %v4294_v33 }
 0x28f   :  { %4778 = vpow2.f32 %v4296_v43 }
 0x290   :  { %4780 = vpow2.f32 %v4297_v44 }
 0x291   :  { %4782 = vtanh.f32 %v4421_v42 }
 0x292   :  { %4784 = vpow2.f32 %v4295_v48 }
 0x293   :  { %4786 = vpow2.f32 %v4298_v49 }
 0x297   :  { %v4775_v45 = vpop.eup %4774 }
 0x298   :  { %v1255_v61 = vadd.f32 1.0, %v4775_v45  ;;  %v4777_v6 = vpop.eup %4776 }
 0x299   :  { %v4779_v17 = vpop.eup %4778  ;;  %v1256_v26 = vadd.f32 1.0, %v4777_v6 }
 0x29a   :  { %4788 = vrcp.f32 %v1255_v61  ;;  %v1258_v51 = vadd.f32 1.0, %v4779_v17  ;;  %v4781_v28 = vpop.eup %4780 }
 0x29b   :  { %4790 = vtanh.f32 %v4423_v60  ;;  %v1259_v25 = vadd.f32 1.0, %v4781_v28  ;;  %v4783_v16 = vpop.eup %4782 }
 0x29c   :  { %4792 = vrcp.f32 %v1256_v26  ;;  %v4785_v29 = vpop.eup %4784 }
 0x29d   :  { %4794 = vrcp.f32 %v1258_v51  ;;  %v4787_v33 = vpop.eup %4786  ;;  %v1257_v46 = vadd.f32 1.0, %v4785_v29 }
 0x29e   :  { %4796 = vrcp.f32 %v1259_v25  ;;  %v1260_v60 = vadd.f32 1.0, %v4787_v33 }
 0x29f   :  { %4798 = vrcp.f32 %v1257_v46 }
 0x2a4   :  { %v4789_v34 = vpop.eup %4788 }
 0x2a5   :  { %v4791_v43 = vpop.eup %4790  ;;  %v1277_v30 = vmul.f32 %v4789_v34, %v4783_v16 }
 0x2a6   :  { %v4793_v44 = vpop.eup %4792 }
 0x2a7   :  { %v4795_v36 = vpop.eup %4794  ;;  %v1275_v42 = vmul.f32 %v4793_v44, %v5436_v31 }
 0x2a8   :  { %v1278_v48 = vmul.f32 %v4795_v36, %v4791_v43  ;;  %v4797_v49 = vpop.eup %4796 }
 0x2a9   :  { %v5485_v45 = vadd.f32 %v1277_v30, %v1275_v42  ;;  %v1276_v61 = vmul.f32 %v4797_v49, %v5439_v40  ;;  %v4799_v17 = vpop.eup %4798 }
 0x2ab   :  { %4800 = vtanh.f32 %v5485_v45  ;;  %v5489_v6 = vadd.f32 %v1278_v48, %v1276_v61 }
 0x2ac   :  { %4802 = vrcp.f32 %v1260_v60 }
 0x2ad   :  { %4804 = vtanh.f32 %v5489_v6 }
 0x2b5   :  { %v4801_v26 = vpop.eup %4800 }
 0x2b6   :  { %v4803_v51 = vpop.eup %4802  ;;  %v1283_v31 = vmul.f32 %v4801_v26, %v4799_v17 }
 0x2b7   :  { %v4805_v28 = vpop.eup %4804 }
 0x2b8   :  { %v1284_v25 = vmul.f32 %v4805_v28, %v4803_v51 }
 0x2ba   :  { %v1296_v16 = vpack.c.bf16 %v1284_v25, %v1283_v31 }
 0x2bc   :  { %1330 = vmatmul.mubr.bf16.vlgmr.msra.gmra.mrb[8].mxu0 %v1296_v16  ;;  %1373 = vmatmul.mubr.bf16.vlgmr.msra.gmra.mrb[8].mxu1 %v1296_v16 }
 0x2bd   :  { %1452 = vmatpush1.bf16.msra.mxu0 %v5220_v52  ;;  %1495 = vmatpush1.bf16.msra.mxu1 %v5229_v55 }
 0x2be   :  { %1453 = vmatprep.subr.bf16.mxu0 %v5226_v54  ;;  %1496 = vmatprep.subr.bf16.mxu1 %v5231_v56 }
 0x2bf   :  { %1483 = vmatprep.mubr.bf16.mxu0 %v5121_v32  ;;  %1526 = vmatprep.mubr.bf16.mxu1 %v5121_v32 }
 0x2c1   :  { %1454 = vmatpush1.bf16.msra.mxu0 %v5235_v57  ;;  %1497 = vmatpush1.bf16.msra.mxu1 %v5242_v59 }
 0x2c2   :  { %1455 = vmatprep.subr.bf16.mxu0 %v5239_v58  ;;  %1498 = vmatprep.subr.bf16.mxu1 %v5257_v0 }
 0x2c5   :  { %1456 = vmatpush1.bf16.msra.mxu0 %v5252_v62  ;;  %1499 = vmatpush1.bf16.msra.mxu1 %v5260_v1 }
 0x2c6   :  { %1457 = vmatprep.subr.bf16.mxu0 %v5255_v63  ;;  %1500 = vmatprep.subr.bf16.mxu1 %v5262_v2 }
 0x2c9   :  { %1458 = vmatpush1.bf16.msra.mxu0 %v5267_v3  ;;  %1501 = vmatpush1.bf16.msra.mxu1 %v5274_v5 }
 0x2ca   :  { %1459 = vmatprep.subr.bf16.mxu0 %v5270_v4  ;;  %1502 = vmatprep.subr.bf16.mxu1 %v5286_v9 }
 0x2cd   :  { %1460 = vmatpush1.bf16.msra.mxu0 %v5284_v8  ;;  %1503 = vmatpush1.bf16.msra.mxu1 %v5292_v11 }
 0x2ce   :  { %1461 = vmatprep.subr.bf16.mxu0 %v5289_v10  ;;  %1504 = vmatprep.subr.bf16.mxu1 %v5294_v12 }
 0x2d1   :  { %1462 = vmatpush1.bf16.msra.mxu0 %v5299_v13  ;;  %1505 = vmatpush1.bf16.msra.mxu1 %v5306_v15 }
 0x2d2   :  { %1463 = vmatprep.subr.bf16.mxu0 %v5303_v14  ;;  %1506 = vmatprep.subr.bf16.mxu1 %v5318_v19 }
 0x2d5   :  { %1464 = vmatpush1.bf16.msra.mxu0 %v5316_v18  ;;  %1507 = vmatpush1.bf16.msra.mxu1 %v5324_v21 }
 0x2d6   :  { %1465 = vmatprep.subr.bf16.mxu0 %v5322_v20  ;;  %1508 = vmatprep.subr.bf16.mxu1 %v5326_v22 }
 0x2d9   :  { %1466 = vmatpush1.bf16.msra.mxu0 %v5332_v23  ;;  %1509 = vmatpush1.bf16.msra.mxu1 %v5336_v24 }
 0x2da   :  { %1605 = vmatprep.subr.bf16.mxu0 %v5213_v47  ;;  %1648 = vmatprep.subr.bf16.mxu1 %v5215_v50 }
 0x38f   :  { %v1331_v40 = vpop.f32.mrb[8].mxu0  ;;  %v1374_v29 = vpop.f32.mrb[8].mxu1 }
 0x390   :  { %v4392_v33 = vadd.f32 %v1331_v40, %v5413_v38  ;;  %v1333_v34 = vpop.f32.mrb[9].mxu0  ;;  %v1376_v43 = vpop.f32.mrb[9].mxu1  ;;  %v4424_v51 = vadd.f32 %v1374_v29, %v5426_v7 }
 0x391   :  { %v4393_v30 = vadd.f32 %v1333_v34, %v5416_v39  ;;  %v1335_v44 = vpop.f32.mrb[10].mxu0  ;;  %v1378_v36 = vpop.f32.mrb[10].mxu1  ;;  %v4425_v31 = vadd.f32 %v1376_v43, %v5430_v27 }
 0x392   :  { %v4299_v46 = vmul.f32 -1.442695, %v4392_v33  ;;  %v4394_v42 = vadd.f32 %v1335_v44, %v5413_v38  ;;  %v1337_v48 = vpop.f32.mrb[11].mxu0  ;;  %v1380_v49 = vpop.f32.mrb[11].mxu1  ;;  %v4426_v28 = vadd.f32 %v1378_v36, %v5426_v7  ;;  %v4301_v25 = vmul.f32 -1.442695, %v4424_v51 }
 0x393   :  { %v4300_v60 = vmul.f32 -1.442695, %v4393_v30  ;;  %v4395_v61 = vadd.f32 %v1337_v48, %v5416_v39  ;;  %v4427_v33 = vadd.f32 %v1380_v49, %v5430_v27 }
 0x394   :  { %4806 = vpow2.f32 %v4299_v46  ;;  %v4302_v17 = vmul.f32 -1.442695, %v4394_v42  ;;  %v4304_v16 = vmul.f32 -1.442695, %v4426_v28 }
 0x395   :  { %v4303_v26 = vmul.f32 -1.442695, %v4395_v61  ;;  %4808 = vpow2.f32 %v4300_v60 }
 0x396   :  { %4810 = vpow2.f32 %v4302_v17 }
 0x397   :  { %4812 = vpow2.f32 %v4303_v26 }
 0x398   :  { %4814 = vtanh.f32 %v4425_v31 }
 0x399   :  { %4816 = vpow2.f32 %v4301_v25 }
 0x39a   :  { %4818 = vpow2.f32 %v4304_v16 }
 0x39e   :  { %v4807_v40 = vpop.eup %4806 }
 0x39f   :  { %v1409_v34 = vadd.f32 1.0, %v4807_v40  ;;  %v4809_v30 = vpop.eup %4808 }
 0x3a0   :  { %v4811_v44 = vpop.eup %4810  ;;  %v1410_v46 = vadd.f32 1.0, %v4809_v30 }
 0x3a1   :  { %4820 = vrcp.f32 %v1409_v34  ;;  %v1412_v29 = vadd.f32 1.0, %v4811_v44  ;;  %v4813_v42 = vpop.eup %4812 }
 0x3a2   :  { %4822 = vtanh.f32 %v4427_v33  ;;  %v1413_v36 = vadd.f32 1.0, %v4813_v42  ;;  %v4815_v43 = vpop.eup %4814 }
 0x3a3   :  { %4824 = vrcp.f32 %v1410_v46  ;;  %v4817_v48 = vpop.eup %4816 }
 0x3a4   :  { %4826 = vrcp.f32 %v1412_v29  ;;  %v4819_v60 = vpop.eup %4818  ;;  %v1411_v28 = vadd.f32 1.0, %v4817_v48 }
 0x3a5   :  { %4828 = vrcp.f32 %v1413_v36  ;;  %v1414_v33 = vadd.f32 1.0, %v4819_v60 }
 0x3a6   :  { %4830 = vrcp.f32 %v1411_v28 }
 0x3ab   :  { %v4821_v61 = vpop.eup %4820 }
 0x3ac   :  { %v4823_v17 = vpop.eup %4822  ;;  %v1431_v49 = vmul.f32 %v4821_v61, %v4815_v43 }
 0x3ad   :  { %v4825_v26 = vpop.eup %4824 }
 0x3ae   :  { %v4827_v51 = vpop.eup %4826  ;;  %v1429_v31 = vmul.f32 %v4825_v26, %v5485_v45 }
 0x3af   :  { %v1432_v25 = vmul.f32 %v4827_v51, %v4823_v17  ;;  %v4829_v16 = vpop.eup %4828 }
 0x3b0   :  { %v5535_v40 = vadd.f32 %v1431_v49, %v1429_v31  ;;  %v1430_v34 = vmul.f32 %v4829_v16, %v5489_v6  ;;  %v4831_v44 = vpop.eup %4830 }
 0x3b2   :  { %4832 = vtanh.f32 %v5535_v40  ;;  %v5539_v30 = vadd.f32 %v1432_v25, %v1430_v34 }
 0x3b3   :  { %4834 = vrcp.f32 %v1414_v33 }
 0x3b4   :  { %4836 = vtanh.f32 %v5539_v30 }
 0x3bc   :  { %v4833_v46 = vpop.eup %4832 }
 0x3bd   :  { %v4835_v29 = vpop.eup %4834  ;;  %v1437_v45 = vmul.f32 %v4833_v46, %v4831_v44 }
 0x3be   :  { %v4837_v42 = vpop.eup %4836 }
 0x3bf   :  { %v1438_v36 = vmul.f32 %v4837_v42, %v4835_v29 }
 0x3c1   :  { %v1450_v43 = vpack.c.bf16 %v1438_v36, %v1437_v45 }
 0x3c3   :  { %1484 = vmatmul.mubr.bf16.vlgmr.msra.gmra.mrb[12].mxu0 %v1450_v43  ;;  %1527 = vmatmul.mubr.bf16.vlgmr.msra.gmra.mrb[12].mxu1 %v1450_v43 }
 0x3c4   :  { %1606 = vmatpush1.bf16.msra.mxu0 %v5220_v52  ;;  %1649 = vmatpush1.bf16.msra.mxu1 %v5229_v55 }
 0x3c5   :  { %1607 = vmatprep.subr.bf16.mxu0 %v5226_v54  ;;  %1650 = vmatprep.subr.bf16.mxu1 %v5231_v56 }
 0x3c6   :  { %1637 = vmatprep.mubr.bf16.mxu0 %v5121_v32  ;;  %1680 = vmatprep.mubr.bf16.mxu1 %v5121_v32 }
 0x3c8   :  { %1608 = vmatpush1.bf16.msra.mxu0 %v5235_v57  ;;  %1651 = vmatpush1.bf16.msra.mxu1 %v5242_v59 }
 0x3c9   :  { %1609 = vmatprep.subr.bf16.mxu0 %v5239_v58  ;;  %1652 = vmatprep.subr.bf16.mxu1 %v5257_v0 }
 0x3cc   :  { %1610 = vmatpush1.bf16.msra.mxu0 %v5252_v62  ;;  %1653 = vmatpush1.bf16.msra.mxu1 %v5260_v1 }
 0x3cd   :  { %1611 = vmatprep.subr.bf16.mxu0 %v5255_v63  ;;  %1654 = vmatprep.subr.bf16.mxu1 %v5262_v2 }
 0x3d0   :  { %1612 = vmatpush1.bf16.msra.mxu0 %v5267_v3  ;;  %1655 = vmatpush1.bf16.msra.mxu1 %v5274_v5 }
 0x3d1   :  { %1613 = vmatprep.subr.bf16.mxu0 %v5270_v4  ;;  %1656 = vmatprep.subr.bf16.mxu1 %v5286_v9 }
 0x3d4   :  { %1614 = vmatpush1.bf16.msra.mxu0 %v5284_v8  ;;  %1657 = vmatpush1.bf16.msra.mxu1 %v5292_v11 }
 0x3d5   :  { %1615 = vmatprep.subr.bf16.mxu0 %v5289_v10  ;;  %1658 = vmatprep.subr.bf16.mxu1 %v5294_v12 }
 0x3d8   :  { %1616 = vmatpush1.bf16.msra.mxu0 %v5299_v13  ;;  %1659 = vmatpush1.bf16.msra.mxu1 %v5306_v15 }
 0x3d9   :  { %1617 = vmatprep.subr.bf16.mxu0 %v5303_v14  ;;  %1660 = vmatprep.subr.bf16.mxu1 %v5318_v19 }
 0x3dc   :  { %1618 = vmatpush1.bf16.msra.mxu0 %v5316_v18  ;;  %1661 = vmatpush1.bf16.msra.mxu1 %v5324_v21 }
 0x3dd   :  { %1619 = vmatprep.subr.bf16.mxu0 %v5322_v20  ;;  %1662 = vmatprep.subr.bf16.mxu1 %v5326_v22 }
 0x3e0   :  { %1620 = vmatpush1.bf16.msra.mxu0 %v5332_v23  ;;  %1663 = vmatpush1.bf16.msra.mxu1 %v5336_v24 }
 0x3e1   :  { %1759 = vmatprep.subr.bf16.mxu0 %v5213_v47  ;;  %1802 = vmatprep.subr.bf16.mxu1 %v5215_v50 }
 0x496   :  { %v1485_v52 = vpop.f32.mrb[12].mxu0  ;;  %v1528_v54 = vpop.f32.mrb[12].mxu1 }
 0x497   :  { %v4396_v55 = vadd.f32 %v1485_v52, %v5413_v38  ;;  %v1487_v56 = vpop.f32.mrb[13].mxu0  ;;  %v1530_v57 = vpop.f32.mrb[13].mxu1  ;;  %v4428_v5 = vadd.f32 %v1528_v54, %v5426_v7 }
 0x498   :  { %v4397_v58 = vadd.f32 %v1487_v56, %v5416_v39  ;;  %v1489_v59 = vpop.f32.mrb[14].mxu0  ;;  %v1532_v62 = vpop.f32.mrb[14].mxu1  ;;  %v4429_v9 = vadd.f32 %v1530_v57, %v5430_v27 }
 0x499   :  { %v4305_v63 = vmul.f32 -1.442695, %v4396_v55  ;;  %v4398_v0 = vadd.f32 %v1489_v59, %v5413_v38  ;;  %v1491_v1 = vpop.f32.mrb[15].mxu0  ;;  %v1534_v2 = vpop.f32.mrb[15].mxu1  ;;  %v4430_v8 = vadd.f32 %v1532_v62, %v5426_v7  ;;  %v4307_v10 = vmul.f32 -1.442695, %v4428_v5 }
 0x49a   :  { %v4306_v3 = vmul.f32 -1.442695, %v4397_v58  ;;  %v4399_v47 = vadd.f32 %v1491_v1, %v5416_v39  ;;  %v4431_v6 = vadd.f32 %v1534_v2, %v5430_v27  ;;  %v5598_v1 = vld [vmem:[#allocation7 + $0x24] ss:$16 sps:$4 sm:$0xff]   ;;  %v5601_v2 = vld [vmem:[#allocation7 + $0x2c] ss:$16 sps:$4 sm:$0xff]  }
 0x49b   :  { %4838 = vpow2.f32 %v4305_v63  ;;  %v4308_v50 = vmul.f32 -1.442695, %v4398_v0  ;;  %v4310_v11 = vmul.f32 -1.442695, %v4430_v8  ;;  %v5592_v0 = vld [vmem:[#allocation7] ss:$16 sps:$4 sm:$0xff]  }
 0x49c   :  { %v4309_v4 = vmul.f32 -1.442695, %v4399_v47  ;;  %4840 = vpow2.f32 %v4306_v3  ;;  %v5606_v3 = vld [vmem:[#allocation7 + $0x20] ss:$16 sps:$4 sm:$0xff]   ;;  %v5609_v47 = vld [vmem:[#allocation7 + $0x28] ss:$16 sps:$4 sm:$0xff]  }
 0x49d   :  { %4842 = vpow2.f32 %v4308_v50  ;;  %v5612_v50 = vld [vmem:[#allocation7 + $0x44] ss:$16 sps:$4 sm:$0xff]   ;;  %v5618_v5 = vld [vmem:[#allocation7 + $0x40] ss:$16 sps:$4 sm:$0xff]   ;;  %v5621_v8 = vld [vmem:[#allocation7 + $0x48] ss:$16 sps:$4 sm:$0xff]  }
 0x49e   :  { %4844 = vpow2.f32 %v4309_v4  ;;  %v5615_v4 = vld [vmem:[#allocation7 + $0x4c] ss:$16 sps:$4 sm:$0xff]  }
 0x49f   :  { %4846 = vtanh.f32 %v4429_v9  ;;  %v5624_v9 = vld [vmem:[#allocation7 + $0x64] ss:$16 sps:$4 sm:$0xff]  }
 0x4a0   :  { %4848 = vpow2.f32 %v4307_v10  ;;  %v5627_v10 = vld [vmem:[#allocation7 + $0x6c] ss:$16 sps:$4 sm:$0xff]  }
 0x4a1   :  { %4850 = vpow2.f32 %v4310_v11  ;;  %v5630_v11 = vld [vmem:[#allocation7 + $0x60] ss:$16 sps:$4 sm:$0xff]  }
 0x4a5   :  { %v4839_v12 = vpop.eup %4838 }
 0x4a6   :  { %v1563_v48 = vadd.f32 1.0, %v4839_v12  ;;  %v4841_v60 = vpop.eup %4840  ;;  %v5633_v12 = vld [vmem:[#allocation7 + $0x68] ss:$16 sps:$4 sm:$0xff]  }
 0x4a7   :  { %v4843_v61 = vpop.eup %4842  ;;  %v1564_v17 = vadd.f32 1.0, %v4841_v60  ;;  %v5642_v60 = vld [vmem:[#allocation7 + $0x80] ss:$16 sps:$4 sm:$0xff]  }
 0x4a8   :  { %4852 = vrcp.f32 %v1563_v48  ;;  %v1566_v49 = vadd.f32 1.0, %v4843_v61  ;;  %v4845_v26 = vpop.eup %4844  ;;  %v5639_v48 = vld [vmem:[#allocation7 + $0x8c] ss:$16 sps:$4 sm:$0xff]   ;;  %v5645_v61 = vld [vmem:[#allocation7 + $0x88] ss:$16 sps:$4 sm:$0xff]  }
 0x4a9   :  { %4854 = vtanh.f32 %v4431_v6  ;;  %v1567_v51 = vadd.f32 1.0, %v4845_v26  ;;  %v4847_v28 = vpop.eup %4846  ;;  %v5636_v6 = vld [vmem:[#allocation7 + $0x84] ss:$16 sps:$4 sm:$0xff]  }
 0x4aa   :  { %4856 = vrcp.f32 %v1564_v17  ;;  %v4849_v31 = vpop.eup %4848  ;;  %v5648_v17 = vld [vmem:[#allocation7 + $0xa4] ss:$16 sps:$4 sm:$0xff]  }
 0x4ab   :  { %4858 = vrcp.f32 %v1566_v49  ;;  %v4851_v25 = vpop.eup %4850  ;;  %v1565_v29 = vadd.f32 1.0, %v4849_v31  ;;  %v5651_v49 = vld [vmem:[#allocation7 + $0xac] ss:$16 sps:$4 sm:$0xff]   ;;  %v5664_v26 = vld [vmem:[#allocation7 + $0x4] ss:$16 sps:$4 sm:$0xff]  }
 0x4ac   :  { %4860 = vrcp.f32 %v1567_v51  ;;  %v1568_v52 = vadd.f32 1.0, %v4851_v25 }
 0x4ad   :  { %4862 = vrcp.f32 %v1565_v29 }
 0x4b2   :  { %v4853_v16 = vpop.eup %4852 }
 0x4b3   :  { %v4855_v33 = vpop.eup %4854  ;;  %v1585_v34 = vmul.f32 %v4853_v16, %v4847_v28 }
 0x4b4   :  { %v4857_v44 = vpop.eup %4856 }
 0x4b5   :  { %v4859_v46 = vpop.eup %4858  ;;  %v1583_v42 = vmul.f32 %v4857_v44, %v5535_v40 }
 0x4b6   :  { %v1586_v45 = vmul.f32 %v4859_v46, %v4855_v33  ;;  %v4861_v36 = vpop.eup %4860 }
 0x4b7   :  { %v5585_v43 = vadd.f32 %v1585_v34, %v1583_v42  ;;  %v1584_v54 = vmul.f32 %v4861_v36, %v5539_v30  ;;  %v4863_v56 = vpop.eup %4862  ;;  %v5595_v30 = vld [vmem:[#allocation7 + $0x8] ss:$16 sps:$4 sm:$0xff]  }
 0x4b9   :  { %4864 = vtanh.f32 %v5585_v43  ;;  %v5589_v55 = vadd.f32 %v1586_v45, %v1584_v54 }
 0x4ba   :  { %4866 = vrcp.f32 %v1568_v52 }
 0x4bb   :  { %4868 = vtanh.f32 %v5589_v55 }
 0x4c3   :  { %v4865_v57 = vpop.eup %4864 }
 0x4c4   :  { %v4867_v58 = vpop.eup %4866  ;;  %v1591_v40 = vmul.f32 %v4865_v57, %v4863_v56 }
 0x4c5   :  { %v4869_v59 = vpop.eup %4868 }
 0x4c6   :  { %v1592_v62 = vmul.f32 %v4869_v59, %v4867_v58 }
 0x4c8   :  { %v1604_v63 = vpack.c.bf16 %v1592_v62, %v1591_v40 }
 0x4ca   :  { %1638 = vmatmul.mubr.bf16.vlgmr.msra.gmra.mrb[16].mxu0 %v1604_v63  ;;  %1681 = vmatmul.mubr.bf16.vlgmr.msra.gmra.mrb[16].mxu1 %v1604_v63 }
 0x4cb   :  { %1760 = vmatpush1.bf16.msra.mxu0 %v5592_v0  ;;  %1803 = vmatpush1.bf16.msra.mxu1 %v5595_v30 }
 0x4cc   :  { %1761 = vmatprep.subr.bf16.mxu0 %v5598_v1  ;;  %1804 = vmatprep.subr.bf16.mxu1 %v5601_v2 }
 0x4cd   :  { %1791 = vmatprep.mubr.bf16.mxu0 %v5121_v32  ;;  %1834 = vmatprep.mubr.bf16.mxu1 %v5121_v32 }
 0x4cf   :  { %1762 = vmatpush1.bf16.msra.mxu0 %v5606_v3  ;;  %1805 = vmatpush1.bf16.msra.mxu1 %v5609_v47 }
 0x4d0   :  { %1763 = vmatprep.subr.bf16.mxu0 %v5612_v50  ;;  %1806 = vmatprep.subr.bf16.mxu1 %v5615_v4 }
 0x4d3   :  { %1764 = vmatpush1.bf16.msra.mxu0 %v5618_v5  ;;  %1807 = vmatpush1.bf16.msra.mxu1 %v5621_v8 }
 0x4d4   :  { %1765 = vmatprep.subr.bf16.mxu0 %v5624_v9  ;;  %1808 = vmatprep.subr.bf16.mxu1 %v5627_v10 }
 0x4d7   :  { %1766 = vmatpush1.bf16.msra.mxu0 %v5630_v11  ;;  %1809 = vmatpush1.bf16.msra.mxu1 %v5633_v12 }
 0x4d8   :  { %1767 = vmatprep.subr.bf16.mxu0 %v5636_v6  ;;  %1810 = vmatprep.subr.bf16.mxu1 %v5639_v48 }
 0x4db   :  { %1768 = vmatpush1.bf16.msra.mxu0 %v5642_v60  ;;  %1811 = vmatpush1.bf16.msra.mxu1 %v5645_v61 }
 0x4dc   :  { %1769 = vmatprep.subr.bf16.mxu0 %v5648_v17  ;;  %1812 = vmatprep.subr.bf16.mxu1 %v5651_v49 }
 0x4df   :  { %1770 = vmatpush1.bf16.msra.mxu0 %v5299_v13  ;;  %1813 = vmatpush1.bf16.msra.mxu1 %v5306_v15  ;;  %v5667_v13 = vld [vmem:[#allocation7 + $0xc] ss:$16 sps:$4 sm:$0xff]  }
 0x4e0   :  { %1771 = vmatprep.subr.bf16.mxu0 %v5303_v14  ;;  %1814 = vmatprep.subr.bf16.mxu1 %v5318_v19 }
 0x4e3   :  { %1772 = vmatpush1.bf16.msra.mxu0 %v5316_v18  ;;  %1815 = vmatpush1.bf16.msra.mxu1 %v5324_v21 }
 0x4e4   :  { %1773 = vmatprep.subr.bf16.mxu0 %v5322_v20  ;;  %1816 = vmatprep.subr.bf16.mxu1 %v5326_v22 }
 0x4e7   :  { %1774 = vmatpush1.bf16.msra.mxu0 %v5332_v23  ;;  %1817 = vmatpush1.bf16.msra.mxu1 %v5336_v24 }
 0x4e8   :  { %1913 = vmatprep.subr.bf16.mxu0 %v5664_v26  ;;  %1956 = vmatprep.subr.bf16.mxu1 %v5667_v13 }
 0x59d   :  { %v1639_v14 = vpop.f32.mrb[16].mxu0  ;;  %v1682_v15 = vpop.f32.mrb[16].mxu1 }
 0x59e   :  { %v4400_v18 = vadd.f32 %v1639_v14, %v5413_v38  ;;  %v1641_v19 = vpop.f32.mrb[17].mxu0  ;;  %v1684_v20 = vpop.f32.mrb[17].mxu1  ;;  %v4432_v44 = vadd.f32 %v1682_v15, %v5426_v7 }
 0x59f   :  { %v4401_v21 = vadd.f32 %v1641_v19, %v5416_v39  ;;  %v1643_v22 = vpop.f32.mrb[18].mxu0  ;;  %v1686_v23 = vpop.f32.mrb[18].mxu1  ;;  %v4433_v29 = vadd.f32 %v1684_v20, %v5430_v27 }
 0x5a0   :  { %v4311_v51 = vmul.f32 -1.442695, %v4400_v18  ;;  %v4402_v24 = vadd.f32 %v1643_v22, %v5413_v38  ;;  %v1645_v28 = vpop.f32.mrb[19].mxu0  ;;  %v1688_v31 = vpop.f32.mrb[19].mxu1  ;;  %v4434_v46 = vadd.f32 %v1686_v23, %v5426_v7  ;;  %v4313_v42 = vmul.f32 -1.442695, %v4432_v44 }
 0x5a1   :  { %v4312_v25 = vmul.f32 -1.442695, %v4401_v21  ;;  %v4403_v16 = vadd.f32 %v1645_v28, %v5416_v39  ;;  %v4435_v52 = vadd.f32 %v1688_v31, %v5430_v27 }
 0x5a2   :  { %4870 = vpow2.f32 %v4311_v51  ;;  %v4314_v33 = vmul.f32 -1.442695, %v4402_v24  ;;  %v4316_v45 = vmul.f32 -1.442695, %v4434_v46 }
 0x5a3   :  { %v4315_v34 = vmul.f32 -1.442695, %v4403_v16  ;;  %4872 = vpow2.f32 %v4312_v25 }
 0x5a4   :  { %4874 = vpow2.f32 %v4314_v33 }
 0x5a5   :  { %4876 = vpow2.f32 %v4315_v34 }
 0x5a6   :  { %4878 = vtanh.f32 %v4433_v29 }
 0x5a7   :  { %4880 = vpow2.f32 %v4313_v42 }
 0x5a8   :  { %4882 = vpow2.f32 %v4316_v45 }
 0x5ac   :  { %v4871_v36 = vpop.eup %4870 }
 0x5ad   :  { %v1717_v54 = vadd.f32 1.0, %v4871_v36  ;;  %v4873_v56 = vpop.eup %4872  ;;  %v5711_v36 = vld [vmem:[#allocation7 + $0xa8] ss:$16 sps:$4 sm:$0xff]  }
 0x5ae   :  { %v4875_v57 = vpop.eup %4874  ;;  %v1718_v58 = vadd.f32 1.0, %v4873_v56  ;;  %v5720_v56 = vld [vmem:[#allocation7 + $0xc0] ss:$16 sps:$4 sm:$0xff]  }
 0x5af   :  { %4884 = vrcp.f32 %v1717_v54  ;;  %v1720_v59 = vadd.f32 1.0, %v4875_v57  ;;  %v4877_v40 = vpop.eup %4876  ;;  %v5717_v54 = vld [vmem:[#allocation7 + $0xcc] ss:$16 sps:$4 sm:$0xff]   ;;  %v5723_v57 = vld [vmem:[#allocation7 + $0xc8] ss:$16 sps:$4 sm:$0xff]  }
 0x5b0   :  { %4886 = vtanh.f32 %v4435_v52  ;;  %v1721_v62 = vadd.f32 1.0, %v4877_v40  ;;  %v4879_v63 = vpop.eup %4878  ;;  %v5714_v52 = vld [vmem:[#allocation7 + $0xc4] ss:$16 sps:$4 sm:$0xff]   ;;  %v5732_v40 = vld [vmem:[#allocation7 + $0xe0] ss:$16 sps:$4 sm:$0xff]  }
 0x5b1   :  { %4888 = vrcp.f32 %v1718_v58  ;;  %v4881_v14 = vpop.eup %4880  ;;  %v5726_v58 = vld [vmem:[#allocation7 + $0xe4] ss:$16 sps:$4 sm:$0xff]  }
 0x5b2   :  { %4890 = vrcp.f32 %v1720_v59  ;;  %v4883_v15 = vpop.eup %4882  ;;  %v1719_v23 = vadd.f32 1.0, %v4881_v14  ;;  %v5729_v59 = vld [vmem:[#allocation7 + $0xec] ss:$16 sps:$4 sm:$0xff]  }
 0x5b3   :  { %4892 = vrcp.f32 %v1721_v62  ;;  %v1722_v25 = vadd.f32 1.0, %v4883_v15  ;;  %v5735_v62 = vld [vmem:[#allocation7 + $0xe8] ss:$16 sps:$4 sm:$0xff]  }
 0x5b4   :  { %4894 = vrcp.f32 %v1719_v23 }
 0x5b9   :  { %v4885_v18 = vpop.eup %4884 }
 0x5ba   :  { %v4887_v19 = vpop.eup %4886  ;;  %v1739_v20 = vmul.f32 %v4885_v18, %v4879_v63 }
 0x5bb   :  { %v4889_v21 = vpop.eup %4888 }
 0x5bc   :  { %v4891_v22 = vpop.eup %4890  ;;  %v1737_v51 = vmul.f32 %v4889_v21, %v5585_v43 }
 0x5bd   :  { %v1740_v24 = vmul.f32 %v4891_v22, %v4887_v19  ;;  %v4893_v28 = vpop.eup %4892 }
 0x5be   :  { %v5679_v31 = vadd.f32 %v1739_v20, %v1737_v51  ;;  %v1738_v16 = vmul.f32 %v4893_v28, %v5589_v55  ;;  %v4895_v34 = vpop.eup %4894  ;;  %v5708_v55 = vld [vmem:[#allocation7 + $0xa0] ss:$16 sps:$4 sm:$0xff]  }
 0x5c0   :  { %4896 = vtanh.f32 %v5679_v31  ;;  %v5683_v33 = vadd.f32 %v1740_v24, %v1738_v16 }
 0x5c1   :  { %4898 = vrcp.f32 %v1722_v25 }
 0x5c2   :  { %4900 = vtanh.f32 %v5683_v33 }
 0x5ca   :  { %v4897_v44 = vpop.eup %4896 }
 0x5cb   :  { %v4899_v46 = vpop.eup %4898  ;;  %v1745_v43 = vmul.f32 %v4897_v44, %v4895_v34 }
 0x5cc   :  { %v4901_v29 = vpop.eup %4900 }
 0x5cd   :  { %v1746_v42 = vmul.f32 %v4901_v29, %v4899_v46 }
 0x5cf   :  { %v1758_v45 = vpack.c.bf16 %v1746_v42, %v1745_v43 }
 0x5d1   :  { %1792 = vmatmul.mubr.bf16.vlgmr.msra.gmra.mrb[20].mxu0 %v1758_v45  ;;  %1835 = vmatmul.mubr.bf16.vlgmr.msra.gmra.mrb[20].mxu1 %v1758_v45 }
 0x5d2   :  { %1914 = vmatpush1.bf16.msra.mxu0 %v5592_v0  ;;  %1957 = vmatpush1.bf16.msra.mxu1 %v5595_v30 }
 0x5d3   :  { %1915 = vmatprep.subr.bf16.mxu0 %v5598_v1  ;;  %1958 = vmatprep.subr.bf16.mxu1 %v5601_v2 }
 0x5d4   :  { %1945 = vmatprep.mubr.bf16.mxu0 %v5121_v32  ;;  %1988 = vmatprep.mubr.bf16.mxu1 %v5121_v32 }
 0x5d6   :  { %1916 = vmatpush1.bf16.msra.mxu0 %v5606_v3  ;;  %1959 = vmatpush1.bf16.msra.mxu1 %v5609_v47 }
 0x5d7   :  { %1917 = vmatprep.subr.bf16.mxu0 %v5612_v50  ;;  %1960 = vmatprep.subr.bf16.mxu1 %v5615_v4 }
 0x5da   :  { %1918 = vmatpush1.bf16.msra.mxu0 %v5618_v5  ;;  %1961 = vmatpush1.bf16.msra.mxu1 %v5621_v8 }
 0x5db   :  { %1919 = vmatprep.subr.bf16.mxu0 %v5624_v9  ;;  %1962 = vmatprep.subr.bf16.mxu1 %v5627_v10 }
 0x5de   :  { %1920 = vmatpush1.bf16.msra.mxu0 %v5630_v11  ;;  %1963 = vmatpush1.bf16.msra.mxu1 %v5633_v12 }
 0x5df   :  { %1921 = vmatprep.subr.bf16.mxu0 %v5636_v6  ;;  %1964 = vmatprep.subr.bf16.mxu1 %v5639_v48 }
 0x5e2   :  { %1922 = vmatpush1.bf16.msra.mxu0 %v5642_v60  ;;  %1965 = vmatpush1.bf16.msra.mxu1 %v5645_v61 }
 0x5e3   :  { %1923 = vmatprep.subr.bf16.mxu0 %v5648_v17  ;;  %1966 = vmatprep.subr.bf16.mxu1 %v5651_v49 }
 0x5e6   :  { %1924 = vmatpush1.bf16.msra.mxu0 %v5708_v55  ;;  %1967 = vmatpush1.bf16.msra.mxu1 %v5711_v36 }
 0x5e7   :  { %1925 = vmatprep.subr.bf16.mxu0 %v5714_v52  ;;  %1968 = vmatprep.subr.bf16.mxu1 %v5717_v54 }
 0x5ea   :  { %1926 = vmatpush1.bf16.msra.mxu0 %v5720_v56  ;;  %1969 = vmatpush1.bf16.msra.mxu1 %v5723_v57 }
 0x5eb   :  { %1927 = vmatprep.subr.bf16.mxu0 %v5726_v58  ;;  %1970 = vmatprep.subr.bf16.mxu1 %v5729_v59 }
 0x5ee   :  { %1928 = vmatpush1.bf16.msra.mxu0 %v5732_v40  ;;  %1971 = vmatpush1.bf16.msra.mxu1 %v5735_v62 }
 0x5ef   :  { %2067 = vmatprep.subr.bf16.mxu0 %v5664_v26  ;;  %2110 = vmatprep.subr.bf16.mxu1 %v5667_v13 }
 0x6a4   :  { %v1793_v63 = vpop.f32.mrb[20].mxu0  ;;  %v1836_v14 = vpop.f32.mrb[20].mxu1 }
 0x6a5   :  { %v4404_v15 = vadd.f32 %v1793_v63, %v5413_v38  ;;  %v1795_v18 = vpop.f32.mrb[21].mxu0  ;;  %v1838_v19 = vpop.f32.mrb[21].mxu1  ;;  %v4436_v34 = vadd.f32 %v1836_v14, %v5426_v7 }
 0x6a6   :  { %v4405_v20 = vadd.f32 %v1795_v18, %v5416_v39  ;;  %v1797_v21 = vpop.f32.mrb[22].mxu0  ;;  %v1840_v22 = vpop.f32.mrb[22].mxu1  ;;  %v4437_v46 = vadd.f32 %v1838_v19, %v5430_v27 }
 0x6a7   :  { %v4317_v23 = vmul.f32 -1.442695, %v4404_v15  ;;  %v4406_v51 = vadd.f32 %v1797_v21, %v5413_v38  ;;  %v1799_v24 = vpop.f32.mrb[23].mxu0  ;;  %v1842_v28 = vpop.f32.mrb[23].mxu1  ;;  %v4438_v44 = vadd.f32 %v1840_v22, %v5426_v7  ;;  %v4319_v29 = vmul.f32 -1.442695, %v4436_v34 }
 0x6a8   :  { %v4318_v25 = vmul.f32 -1.442695, %v4405_v20  ;;  %v4407_v26 = vadd.f32 %v1799_v24, %v5416_v39  ;;  %v4439_v45 = vadd.f32 %v1842_v28, %v5430_v27 }
 0x6a9   :  { %4902 = vpow2.f32 %v4317_v23  ;;  %v4320_v13 = vmul.f32 -1.442695, %v4406_v51  ;;  %v4322_v43 = vmul.f32 -1.442695, %v4438_v44 }
 0x6aa   :  { %v4321_v16 = vmul.f32 -1.442695, %v4407_v26  ;;  %4904 = vpow2.f32 %v4318_v25 }
 0x6ab   :  { %4906 = vpow2.f32 %v4320_v13 }
 0x6ac   :  { %4908 = vpow2.f32 %v4321_v16 }
 0x6ad   :  { %4910 = vtanh.f32 %v4437_v46 }
 0x6ae   :  { %4912 = vpow2.f32 %v4319_v29 }
 0x6af   :  { %4914 = vpow2.f32 %v4322_v43 }
 0x6b3   :  { %v4903_v42 = vpop.eup %4902 }
 0x6b4   :  { %v1871_v63 = vadd.f32 1.0, %v4903_v42  ;;  %v4905_v15 = vpop.eup %4904 }
 0x6b5   :  { %v4907_v18 = vpop.eup %4906  ;;  %v1872_v20 = vadd.f32 1.0, %v4905_v15 }
 0x6b6   :  { %4916 = vrcp.f32 %v1871_v63  ;;  %v1874_v14 = vadd.f32 1.0, %v4907_v18  ;;  %v4909_v21 = vpop.eup %4908 }
 0x6b7   :  { %4918 = vtanh.f32 %v4439_v45  ;;  %v1875_v22 = vadd.f32 1.0, %v4909_v21  ;;  %v4911_v19 = vpop.eup %4910 }
 0x6b8   :  { %4920 = vrcp.f32 %v1872_v20  ;;  %v4913_v23 = vpop.eup %4912 }
 0x6b9   :  { %4922 = vrcp.f32 %v1874_v14  ;;  %v4915_v51 = vpop.eup %4914  ;;  %v1873_v16 = vadd.f32 1.0, %v4913_v23 }
 0x6ba   :  { %4924 = vrcp.f32 %v1875_v22  ;;  %v1876_v43 = vadd.f32 1.0, %v4915_v51 }
 0x6bb   :  { %4926 = vrcp.f32 %v1873_v16 }
 0x6c0   :  { %v4917_v24 = vpop.eup %4916 }
 0x6c1   :  { %v4919_v25 = vpop.eup %4918  ;;  %v1893_v28 = vmul.f32 %v4917_v24, %v4911_v19 }
 0x6c2   :  { %v4921_v26 = vpop.eup %4920 }
 0x6c3   :  { %v4923_v13 = vpop.eup %4922  ;;  %v1891_v34 = vmul.f32 %v4921_v26, %v5679_v31 }
 0x6c4   :  { %v1894_v44 = vmul.f32 %v4923_v13, %v4919_v25  ;;  %v4925_v46 = vpop.eup %4924 }
 0x6c5   :  { %v5749_v29 = vadd.f32 %v1893_v28, %v1891_v34  ;;  %v1892_v42 = vmul.f32 %v4925_v46, %v5683_v33  ;;  %v4927_v63 = vpop.eup %4926 }
 0x6c7   :  { %4928 = vtanh.f32 %v5749_v29  ;;  %v5753_v45 = vadd.f32 %v1894_v44, %v1892_v42 }
 0x6c8   :  { %4930 = vrcp.f32 %v1876_v43 }
 0x6c9   :  { %4932 = vtanh.f32 %v5753_v45 }
 0x6d1   :  { %v4929_v15 = vpop.eup %4928 }
 0x6d2   :  { %v4931_v18 = vpop.eup %4930  ;;  %v1899_v31 = vmul.f32 %v4929_v15, %v4927_v63 }
 0x6d3   :  { %v4933_v20 = vpop.eup %4932 }
 0x6d4   :  { %v1900_v14 = vmul.f32 %v4933_v20, %v4931_v18 }
 0x6d6   :  { %v1912_v21 = vpack.c.bf16 %v1900_v14, %v1899_v31 }
 0x6d8   :  { %1946 = vmatmul.mubr.bf16.vlgmr.msra.gmra.mrb[24].mxu0 %v1912_v21  ;;  %1989 = vmatmul.mubr.bf16.vlgmr.msra.gmra.mrb[24].mxu1 %v1912_v21 }
 0x6d9   :  { %2068 = vmatpush1.bf16.msra.mxu0 %v5592_v0  ;;  %2111 = vmatpush1.bf16.msra.mxu1 %v5595_v30 }
 0x6da   :  { %2069 = vmatprep.subr.bf16.mxu0 %v5598_v1  ;;  %2112 = vmatprep.subr.bf16.mxu1 %v5601_v2 }
 0x6db   :  { %2099 = vmatprep.mubr.bf16.mxu0 %v5121_v32  ;;  %2142 = vmatprep.mubr.bf16.mxu1 %v5121_v32 }
 0x6dd   :  { %2070 = vmatpush1.bf16.msra.mxu0 %v5606_v3  ;;  %2113 = vmatpush1.bf16.msra.mxu1 %v5609_v47 }
 0x6de   :  { %2071 = vmatprep.subr.bf16.mxu0 %v5612_v50  ;;  %2114 = vmatprep.subr.bf16.mxu1 %v5615_v4 }
 0x6e1   :  { %2072 = vmatpush1.bf16.msra.mxu0 %v5618_v5  ;;  %2115 = vmatpush1.bf16.msra.mxu1 %v5621_v8 }
 0x6e2   :  { %2073 = vmatprep.subr.bf16.mxu0 %v5624_v9  ;;  %2116 = vmatprep.subr.bf16.mxu1 %v5627_v10 }
 0x6e5   :  { %2074 = vmatpush1.bf16.msra.mxu0 %v5630_v11  ;;  %2117 = vmatpush1.bf16.msra.mxu1 %v5633_v12 }
 0x6e6   :  { %2075 = vmatprep.subr.bf16.mxu0 %v5636_v6  ;;  %2118 = vmatprep.subr.bf16.mxu1 %v5639_v48 }
 0x6e9   :  { %2076 = vmatpush1.bf16.msra.mxu0 %v5642_v60  ;;  %2119 = vmatpush1.bf16.msra.mxu1 %v5645_v61 }
 0x6ea   :  { %2077 = vmatprep.subr.bf16.mxu0 %v5648_v17  ;;  %2120 = vmatprep.subr.bf16.mxu1 %v5651_v49 }
 0x6ed   :  { %2078 = vmatpush1.bf16.msra.mxu0 %v5708_v55  ;;  %2121 = vmatpush1.bf16.msra.mxu1 %v5711_v36 }
 0x6ee   :  { %2079 = vmatprep.subr.bf16.mxu0 %v5714_v52  ;;  %2122 = vmatprep.subr.bf16.mxu1 %v5717_v54 }
 0x6f1   :  { %2080 = vmatpush1.bf16.msra.mxu0 %v5720_v56  ;;  %2123 = vmatpush1.bf16.msra.mxu1 %v5723_v57 }
 0x6f2   :  { %2081 = vmatprep.subr.bf16.mxu0 %v5726_v58  ;;  %2124 = vmatprep.subr.bf16.mxu1 %v5729_v59 }
 0x6f5   :  { %2082 = vmatpush1.bf16.msra.mxu0 %v5732_v40  ;;  %2125 = vmatpush1.bf16.msra.mxu1 %v5735_v62 }
 0x7ab   :  { %v1947_v0 = vpop.f32.mrb[24].mxu0  ;;  %v1990_v30 = vpop.f32.mrb[24].mxu1 }
 0x7ac   :  { %v4408_v1 = vadd.f32 %v1947_v0, %v5413_v38  ;;  %v1949_v2 = vpop.f32.mrb[25].mxu0  ;;  %v1992_v3 = vpop.f32.mrb[25].mxu1  ;;  %v4440_v60 = vadd.f32 %v1990_v30, %v5426_v7 }
 0x7ad   :  { %v4409_v47 = vadd.f32 %v1949_v2, %v5416_v39  ;;  %v1951_v50 = vpop.f32.mrb[26].mxu0  ;;  %v1994_v4 = vpop.f32.mrb[26].mxu1  ;;  %v4441_v17 = vadd.f32 %v1992_v3, %v5430_v27 }
 0x7ae   :  { %v4323_v5 = vmul.f32 -1.442695, %v4408_v1  ;;  %v4410_v8 = vadd.f32 %v1951_v50, %v5413_v38  ;;  %v1953_v9 = vpop.f32.mrb[27].mxu0  ;;  %v1996_v10 = vpop.f32.mrb[27].mxu1  ;;  %v4442_v61 = vadd.f32 %v1994_v4, %v5426_v7  ;;  %v4325_v49 = vmul.f32 -1.442695, %v4440_v60 }
 0x7af   :  { %v4324_v11 = vmul.f32 -1.442695, %v4409_v47  ;;  %v4411_v12 = vadd.f32 %v1953_v9, %v5416_v39  ;;  %v4443_v36 = vadd.f32 %v1996_v10, %v5430_v27 }
 0x7b0   :  { %4934 = vpow2.f32 %v4323_v5  ;;  %v4326_v6 = vmul.f32 -1.442695, %v4410_v8  ;;  %v4328_v33 = vmul.f32 -1.442695, %v4442_v61 }
 0x7b1   :  { %v4327_v48 = vmul.f32 -1.442695, %v4411_v12  ;;  %4936 = vpow2.f32 %v4324_v11 }
 0x7b2   :  { %4938 = vpow2.f32 %v4326_v6 }
 0x7b3   :  { %4940 = vpow2.f32 %v4327_v48 }
 0x7b4   :  { %4942 = vtanh.f32 %v4441_v17 }
 0x7b5   :  { %4944 = vpow2.f32 %v4325_v49 }
 0x7b6   :  { %4946 = vpow2.f32 %v4328_v33 }
 0x7ba   :  { %v4935_v55 = vpop.eup %4934 }
 0x7bb   :  { %v2025_v52 = vadd.f32 1.0, %v4935_v55  ;;  %v4937_v54 = vpop.eup %4936 }
 0x7bc   :  { %v4939_v56 = vpop.eup %4938  ;;  %v2026_v57 = vadd.f32 1.0, %v4937_v54 }
 0x7bd   :  { %4948 = vrcp.f32 %v2025_v52  ;;  %v2028_v58 = vadd.f32 1.0, %v4939_v56  ;;  %v4941_v59 = vpop.eup %4940 }
 0x7be   :  { %4950 = vtanh.f32 %v4443_v36  ;;  %v2029_v40 = vadd.f32 1.0, %v4941_v59  ;;  %v4943_v62 = vpop.eup %4942 }
 0x7bf   :  { %4952 = vrcp.f32 %v2026_v57  ;;  %v4945_v22 = vpop.eup %4944 }
 0x7c0   :  { %4954 = vrcp.f32 %v2028_v58  ;;  %v4947_v19 = vpop.eup %4946  ;;  %v2027_v26 = vadd.f32 1.0, %v4945_v22 }
 0x7c1   :  { %4956 = vrcp.f32 %v2029_v40  ;;  %v2030_v46 = vadd.f32 1.0, %v4947_v19 }
 0x7c2   :  { %4958 = vrcp.f32 %v2027_v26 }
 0x7c7   :  { %v4949_v23 = vpop.eup %4948 }
 0x7c8   :  { %v4951_v51 = vpop.eup %4950  ;;  %v2047_v24 = vmul.f32 %v4949_v23, %v4943_v62 }
 0x7c9   :  { %v4953_v25 = vpop.eup %4952 }
 0x7ca   :  { %v4955_v28 = vpop.eup %4954  ;;  %v2045_v13 = vmul.f32 %v4953_v25, %v5749_v29 }
 0x7cb   :  { %v2048_v16 = vmul.f32 %v4955_v28, %v4951_v51  ;;  %v4957_v34 = vpop.eup %4956 }
 0x7cc   :  { %v5797_v44 = vadd.f32 %v2047_v24, %v2045_v13  ;;  %v2046_v43 = vmul.f32 %v4957_v34, %v5753_v45  ;;  %v4959_v63 = vpop.eup %4958 }
 0x7ce   :  { %4960 = vtanh.f32 %v5797_v44  ;;  %v5801_v42 = vadd.f32 %v2048_v16, %v2046_v43 }
 0x7cf   :  { %4962 = vrcp.f32 %v2030_v46 }
 0x7d0   :  { %4964 = vtanh.f32 %v5801_v42 }
 0x7d8   :  { %v4961_v15 = vpop.eup %4960 }
 0x7d9   :  { %v4963_v18 = vpop.eup %4962  ;;  %v2053_v29 = vmul.f32 %v4961_v15, %v4959_v63 }
 0x7da   :  { %v4965_v20 = vpop.eup %4964 }
 0x7db   :  { %v2054_v31 = vmul.f32 %v4965_v20, %v4963_v18 }
 0x7dd   :  { %v2066_v14 = vpack.c.bf16 %v2054_v31, %v2053_v29 }
 0x7df   :  { %2100 = vmatmul.mubr.bf16.vlgmr.msra.gmra.mrb[28].mxu0 %v2066_v14  ;;  %2143 = vmatmul.mubr.bf16.vlgmr.msra.gmra.mrb[28].mxu1 %v2066_v14 }
 0x8b2   :  { %v2101_v21 = vpop.f32.mrb[28].mxu0  ;;  %v2144_v0 = vpop.f32.mrb[28].mxu1 }
 0x8b3   :  { %v4412_v45 = vadd.f32 %v2101_v21, %v5413_v38  ;;  %v2103_v30 = vpop.f32.mrb[29].mxu0  ;;  %v2146_v1 = vpop.f32.mrb[29].mxu1  ;;  %v4444_v6 = vadd.f32 %v2144_v0, %v5426_v7 }
 0x8b4   :  { %v4413_v2 = vadd.f32 %v2103_v30, %v5416_v39  ;;  %v2105_v3 = vpop.f32.mrb[30].mxu0  ;;  %v2148_v47 = vpop.f32.mrb[30].mxu1  ;;  %v4445_v60 = vadd.f32 %v2146_v1, %v5430_v27 }
 0x8b5   :  { %v4329_v50 = vmul.f32 -1.442695, %v4412_v45  ;;  %v4414_v4 = vadd.f32 %v2105_v3, %v5413_v38  ;;  %v2107_v5 = vpop.f32.mrb[31].mxu0  ;;  %v2150_v8 = vpop.f32.mrb[31].mxu1  ;;  %v4446_v48 = vadd.f32 %v2148_v47, %v5426_v7  ;;  %v4331_v61 = vmul.f32 -1.442695, %v4444_v6 }
 0x8b6   :  { %v4330_v9 = vmul.f32 -1.442695, %v4413_v2  ;;  %v4415_v10 = vadd.f32 %v2107_v5, %v5416_v39  ;;  %v4447_v49 = vadd.f32 %v2150_v8, %v5430_v27 }
 0x8b7   :  { %4966 = vpow2.f32 %v4329_v50  ;;  %v4332_v11 = vmul.f32 -1.442695, %v4414_v4  ;;  %v4334_v17 = vmul.f32 -1.442695, %v4446_v48 }
 0x8b8   :  { %v4333_v12 = vmul.f32 -1.442695, %v4415_v10  ;;  %4968 = vpow2.f32 %v4330_v9 }
 0x8b9   :  { %4970 = vpow2.f32 %v4332_v11 }
 0x8ba   :  { %4972 = vpow2.f32 %v4333_v12 }
 0x8bb   :  { %4974 = vtanh.f32 %v4445_v60 }
 0x8bc   :  { %4976 = vpow2.f32 %v4331_v61 }
 0x8bd   :  { %4978 = vpow2.f32 %v4334_v17 }
 0x8c1   :  { %v4967_v38 = vpop.eup %4966 }
 0x8c2   :  { %v2179_v33 = vadd.f32 1.0, %v4967_v38  ;;  %v4969_v39 = vpop.eup %4968 }
 0x8c3   :  { %v4971_v55 = vpop.eup %4970  ;;  %v2180_v36 = vadd.f32 1.0, %v4969_v39 }
 0x8c4   :  { %4980 = vrcp.f32 %v2179_v33  ;;  %v2182_v52 = vadd.f32 1.0, %v4971_v55  ;;  %v4973_v54 = vpop.eup %4972 }
 0x8c5   :  { %4982 = vtanh.f32 %v4447_v49  ;;  %v2183_v7 = vadd.f32 1.0, %v4973_v54  ;;  %v4975_v56 = vpop.eup %4974 }
 0x8c6   :  { %4984 = vrcp.f32 %v2180_v36  ;;  %v4977_v57 = vpop.eup %4976 }
 0x8c7   :  { %4986 = vrcp.f32 %v2182_v52  ;;  %v4979_v58 = vpop.eup %4978  ;;  %v2181_v22 = vadd.f32 1.0, %v4977_v57 }
 0x8c8   :  { %4988 = vrcp.f32 %v2183_v7  ;;  %v2184_v28 = vadd.f32 1.0, %v4979_v58 }
 0x8c9   :  { %4990 = vrcp.f32 %v2181_v22 }
 0x8ce   :  { %v4981_v59 = vpop.eup %4980 }
 0x8cf   :  { %v4983_v40 = vpop.eup %4982  ;;  %v2201_v27 = vmul.f32 %v4981_v59, %v4975_v56 }
 0x8d0   :  { %v4985_v62 = vpop.eup %4984 }
 0x8d1   :  { %v4987_v19 = vpop.eup %4986  ;;  %v2199_v23 = vmul.f32 %v4985_v62, %v5797_v44 }
 0x8d2   :  { %v2202_v51 = vmul.f32 %v4987_v19, %v4983_v40  ;;  %v4989_v24 = vpop.eup %4988 }
 0x8d3   :  { %v2203_v25 = vadd.f32 %v2201_v27, %v2199_v23  ;;  %v2200_v26 = vmul.f32 %v4989_v24, %v5801_v42  ;;  %v4991_v16 = vpop.eup %4990 }
 0x8d5   :  { %4992 = vtanh.f32 %v2203_v25  ;;  %v2204_v13 = vadd.f32 %v2202_v51, %v2200_v26 }
 0x8d6   :  { %4994 = vrcp.f32 %v2184_v28 }
 0x8d7   :  { %4996 = vtanh.f32 %v2204_v13 }
 0x8df   :  { %v4993_v34 = vpop.eup %4992 }
 0x8e0   :  { %v5814_v46 = vmul.f32 %v4993_v34, %v4991_v16  ;;  %v4995_v43 = vpop.eup %4994 }
 0x8e1   :  { %v4997_v63 = vpop.eup %4996 }
 0x8e2   :  { %v5816_v15 = vmul.f32 %v4997_v63, %v4995_v43 }
 0x8e3   :  { %5106 = dma.done.wait [#allocation4], 102400 }
 0x8e4   :  { %5107 = vsyncadd [#allocation4], 4294864896  ;;  %v2251_v44 = vld [vmem:[#allocation3 + $0x108] sm:$0xff]  ;;  %v2253_v18 = vld [vmem:[#allocation3 + $0x118] sm:$0xff] }
 0x8e5   :  { %v2250_v20 = vld [vmem:[#allocation3 + $0x100] sm:$0xff]  ;;  %2398 = vmatprep.subr.bf16.mxu0 %v2251_v44  ;;  %2484 = vmatprep.subr.bf16.mxu1 %v2253_v18  ;;  %v2252_v42 = vld [vmem:[#allocation3 + $0x110] sm:$0xff]  ;;  %v2255_v29 = vld [vmem:[#allocation3 + $0x128] sm:$0xff] }
 0x8e6   :  { %v2257_v31 = vld [vmem:[#allocation3 + $0x138] sm:$0xff]  ;;  %2399 = vmatpush1.bf16.msra.mxu0 %v2250_v20  ;;  %2485 = vmatpush1.bf16.msra.mxu1 %v2252_v42  ;;  %v2254_v14 = vld [vmem:[#allocation3 + $0x120] sm:$0xff]  ;;  %v2256_v21 = vld [vmem:[#allocation3 + $0x130] sm:$0xff] }
 0x8e7   :  { %2400 = vmatprep.subr.bf16.mxu0 %v2255_v29  ;;  %2486 = vmatprep.subr.bf16.mxu1 %v2257_v31  ;;  %v2259_v0 = vld [vmem:[#allocation3 + $0x148] sm:$0xff]  ;;  %v2261_v45 = vld [vmem:[#allocation3 + $0x158] sm:$0xff]  ;;  %v2258_v30 = vld [vmem:[#allocation3 + $0x140] sm:$0xff] }
 0x8e8   :  { %v2260_v1 = vld [vmem:[#allocation3 + $0x150] sm:$0xff]  ;;  %v2263_v2 = vld [vmem:[#allocation3 + $0x168] sm:$0xff]  ;;  %v2265_v3 = vld [vmem:[#allocation3 + $0x178] sm:$0xff] }
 0x8e9   :  { %v2262_v47 = vld [vmem:[#allocation3 + $0x160] sm:$0xff]  ;;  %v2264_v50 = vld [vmem:[#allocation3 + $0x170] sm:$0xff]  ;;  %v2267_v4 = vld [vmem:[#allocation3 + $0x188] sm:$0xff] }
 0x8ea   :  { %2401 = vmatpush1.bf16.msra.mxu0 %v2254_v14  ;;  %2487 = vmatpush1.bf16.msra.mxu1 %v2256_v21  ;;  %v2269_v5 = vld [vmem:[#allocation3 + $0x198] sm:$0xff]  ;;  %v2266_v8 = vld [vmem:[#allocation3 + $0x180] sm:$0xff]  ;;  %v2268_v9 = vld [vmem:[#allocation3 + $0x190] sm:$0xff] }
 0x8eb   :  { %2402 = vmatprep.subr.bf16.mxu0 %v2259_v0  ;;  %2488 = vmatprep.subr.bf16.mxu1 %v2261_v45  ;;  %v2271_v10 = vld [vmem:[#allocation3 + $0x1a8] sm:$0xff]  ;;  %v2273_v11 = vld [vmem:[#allocation3 + $0x1b8] sm:$0xff]  ;;  %v2270_v12 = vld [vmem:[#allocation3 + $0x1a0] sm:$0xff] }
 0x8ec   :  { %v2272_v6 = vld [vmem:[#allocation3 + $0x1b0] sm:$0xff]  ;;  %v2275_v48 = vld [vmem:[#allocation3 + $0x1c8] sm:$0xff]  ;;  %v2277_v60 = vld [vmem:[#allocation3 + $0x1d8] sm:$0xff] }
 0x8ed   :  { %v5032_v61 = vld [vmem:[%s5877_s1 + $0x4] ss:$16 sps:$4 sm:$0xff]   ;;  %v2279_v49 = vld [vmem:[#allocation3 + $0x1e8] sm:$0xff]  ;;  %v2281_v33 = vld [vmem:[#allocation3 + $0x1f8] sm:$0xff] }
 0x8ee   :  { %2403 = vmatpush1.bf16.msra.mxu0 %v2258_v30  ;;  %2489 = vmatpush1.bf16.msra.mxu1 %v2260_v1  ;;  %v2274_v17 = vld [vmem:[#allocation3 + $0x1c0] sm:$0xff]  ;;  %v2276_v38 = vld [vmem:[#allocation3 + $0x1d0] sm:$0xff]  ;;  %v2283_v36 = vld [vmem:[#allocation3 + $0x208] sm:$0xff] }
 0x8ef   :  { %2404 = vmatprep.subr.bf16.mxu0 %v2263_v2  ;;  %2490 = vmatprep.subr.bf16.mxu1 %v2265_v3  ;;  %v2278_v39 = vld [vmem:[#allocation3 + $0x1e0] sm:$0xff]  ;;  %v2280_v55 = vld [vmem:[#allocation3 + $0x1f0] sm:$0xff]  ;;  %v2285_v52 = vld [vmem:[#allocation3 + $0x218] sm:$0xff] }
 0x8f0   :  { %2430 = vmatprep.mubr.bf16.mxu0 %v5032_v61  ;;  %2516 = vmatprep.mubr.bf16.mxu1 %v5032_v61  ;;  %v2282_v54 = vld [vmem:[#allocation3 + $0x200] sm:$0xff]  ;;  %v2284_v7 = vld [vmem:[#allocation3 + $0x210] sm:$0xff]  ;;  %v2287_v56 = vld [vmem:[#allocation3 + $0x228] sm:$0xff] }
 0x8f1   :  { %v2289_v57 = vld [vmem:[#allocation3 + $0x238] sm:$0xff]  ;;  %v2286_v58 = vld [vmem:[#allocation3 + $0x220] sm:$0xff]  ;;  %v2288_v59 = vld [vmem:[#allocation3 + $0x230] sm:$0xff] }
 0x8f2   :  { %2405 = vmatpush1.bf16.msra.mxu0 %v2262_v47  ;;  %2491 = vmatpush1.bf16.msra.mxu1 %v2264_v50  ;;  %v2291_v40 = vld [vmem:[#allocation3 + $0x248] sm:$0xff]  ;;  %v2293_v27 = vld [vmem:[#allocation3 + $0x258] sm:$0xff]  ;;  %v2290_v62 = vld [vmem:[#allocation3 + $0x240] sm:$0xff] }
 0x8f3   :  { %2406 = vmatprep.subr.bf16.mxu0 %v2267_v4  ;;  %2492 = vmatprep.subr.bf16.mxu1 %v2269_v5  ;;  %v2292_v22 = vld [vmem:[#allocation3 + $0x250] sm:$0xff]  ;;  %v2295_v19 = vld [vmem:[#allocation3 + $0x268] sm:$0xff]  ;;  %v2297_v23 = vld [vmem:[#allocation3 + $0x278] sm:$0xff] }
 0x8f4   :  { %v2294_v51 = vld [vmem:[#allocation3 + $0x260] sm:$0xff]  ;;  %v2296_v24 = vld [vmem:[#allocation3 + $0x270] sm:$0xff]  ;;  %v2299_v25 = vld [vmem:[#allocation3 + $0x288] sm:$0xff] }
 0x8f5   :  { %v2301_v28 = vld [vmem:[#allocation3 + $0x298] sm:$0xff]  ;;  %v2298_v26 = vld [vmem:[#allocation3 + $0x280] sm:$0xff]  ;;  %v2300_v13 = vld [vmem:[#allocation3 + $0x290] sm:$0xff] }
 0x8f6   :  { %2407 = vmatpush1.bf16.msra.mxu0 %v2266_v8  ;;  %2493 = vmatpush1.bf16.msra.mxu1 %v2268_v9  ;;  %v2303_v16 = vld [vmem:[#allocation3 + $0x2a8] sm:$0xff]  ;;  %v2305_v34 = vld [vmem:[#allocation3 + $0x2b8] sm:$0xff]  ;;  %v2302_v43 = vld [vmem:[#allocation3 + $0x2a0] sm:$0xff] }
 0x8f7   :  { %2408 = vmatprep.subr.bf16.mxu0 %v2271_v10  ;;  %2494 = vmatprep.subr.bf16.mxu1 %v2273_v11  ;;  %v2304_v63 = vld [vmem:[#allocation3 + $0x2b0] sm:$0xff]  ;;  %v2307_v44 = vld [vmem:[#allocation3 + $0x2c8] sm:$0xff]  ;;  %v2309_v18 = vld [vmem:[#allocation3 + $0x2d8] sm:$0xff] }
 0x8f8   :  { %v2306_v20 = vld [vmem:[#allocation3 + $0x2c0] sm:$0xff]  ;;  %v2308_v42 = vld [vmem:[#allocation3 + $0x2d0] sm:$0xff]  ;;  %v2311_v29 = vld [vmem:[#allocation3 + $0x2e8] sm:$0xff] }
 0x8f9   :  { %v2313_v31 = vld [vmem:[#allocation3 + $0x2f8] sm:$0xff]  ;;  %v2310_v14 = vld [vmem:[#allocation3 + $0x2e0] sm:$0xff]  ;;  %v2312_v21 = vld [vmem:[#allocation3 + $0x2f0] sm:$0xff] }
 0x8fa   :  { %2409 = vmatpush1.bf16.msra.mxu0 %v2270_v12  ;;  %2495 = vmatpush1.bf16.msra.mxu1 %v2272_v6  ;;  %v2315_v0 = vld [vmem:[#allocation3 + $0x308] sm:$0xff]  ;;  %v2317_v45 = vld [vmem:[#allocation3 + $0x318] sm:$0xff]  ;;  %v5030_v30 = vld [vmem:[%s5877_s1] ss:$16 sps:$4 sm:$0xff]  }
 0x8fb   :  { %2410 = vmatprep.subr.bf16.mxu0 %v2275_v48  ;;  %2496 = vmatprep.subr.bf16.mxu1 %v2277_v60  ;;  %v2314_v1 = vld [vmem:[#allocation3 + $0x300] sm:$0xff]  ;;  %v2316_v2 = vld [vmem:[#allocation3 + $0x310] sm:$0xff]  ;;  %v2319_v3 = vld [vmem:[#allocation3 + $0x328] sm:$0xff] }
 0x8fc   :  { %v2321_v47 = vld [vmem:[#allocation3 + $0x338] sm:$0xff]  ;;  %v2318_v4 = vld [vmem:[#allocation3 + $0x320] sm:$0xff]  ;;  %v2320_v5 = vld [vmem:[#allocation3 + $0x330] sm:$0xff] }
 0x8fd   :  { %v5035_v50 = vld [vmem:[%s5877_s1 + $0xc] ss:$16 sps:$4 sm:$0xff]   ;;  %v2322_v10 = vld [vmem:[#allocation3 + $0x340] sm:$0xff]  ;;  %v2324_v11 = vld [vmem:[#allocation3 + $0x350] sm:$0xff] }
 0x8fe   :  { %2411 = vmatpush1.bf16.msra.mxu0 %v2274_v17  ;;  %2497 = vmatpush1.bf16.msra.mxu1 %v2276_v38  ;;  %v2323_v8 = vld [vmem:[#allocation3 + $0x348] sm:$0xff]  ;;  %v2325_v9 = vld [vmem:[#allocation3 + $0x358] sm:$0xff]  ;;  %v2326_v48 = vld [vmem:[#allocation3 + $0x360] sm:$0xff] }
 0x8ff   :  { %2412 = vmatprep.subr.bf16.mxu0 %v2279_v49  ;;  %2498 = vmatprep.subr.bf16.mxu1 %v2281_v33  ;;  %v2327_v12 = vld [vmem:[#allocation3 + $0x368] sm:$0xff]  ;;  %v2329_v6 = vld [vmem:[#allocation3 + $0x378] sm:$0xff]  ;;  %v2328_v60 = vld [vmem:[#allocation3 + $0x370] sm:$0xff] }
 0x900   :  { %v2331_v61 = vld [vmem:[#allocation3 + $0x388] sm:$0xff]  ;;  %v2333_v17 = vld [vmem:[#allocation3 + $0x398] sm:$0xff]  ;;  %v2330_v38 = vld [vmem:[#allocation3 + $0x380] sm:$0xff] }
 0x901   :  { %v2332_v49 = vld [vmem:[#allocation3 + $0x390] sm:$0xff]  ;;  %v2335_v33 = vld [vmem:[#allocation3 + $0x3a8] sm:$0xff] }
 0x902   :  { %2413 = vmatpush1.bf16.msra.mxu0 %v2278_v39  ;;  %2499 = vmatpush1.bf16.msra.mxu1 %v2280_v55  ;;  %v2337_v39 = vld [vmem:[#allocation3 + $0x3b8] sm:$0xff]  ;;  %v2334_v55 = vld [vmem:[#allocation3 + $0x3a0] sm:$0xff] }
 0x903   :  { %2414 = vmatprep.subr.bf16.mxu0 %v2283_v36  ;;  %2500 = vmatprep.subr.bf16.mxu1 %v2285_v52  ;;  %v2336_v36 = vld [vmem:[#allocation3 + $0x3b0] sm:$0xff]  ;;  %v2339_v52 = vld [vmem:[#allocation3 + $0x3c8] sm:$0xff] }
 0x906   :  { %2415 = vmatpush1.bf16.msra.mxu0 %v2282_v54  ;;  %2501 = vmatpush1.bf16.msra.mxu1 %v2284_v7  ;;  %v2341_v54 = vld [vmem:[#allocation3 + $0x3d8] sm:$0xff]  ;;  %v2338_v7 = vld [vmem:[#allocation3 + $0x3c0] sm:$0xff] }
 0x907   :  { %2416 = vmatprep.subr.bf16.mxu0 %v2287_v56  ;;  %2502 = vmatprep.subr.bf16.mxu1 %v2289_v57  ;;  %v2340_v56 = vld [vmem:[#allocation3 + $0x3d0] sm:$0xff]  ;;  %v2343_v57 = vld [vmem:[#allocation3 + $0x3e8] sm:$0xff] }
 0x90a   :  { %2417 = vmatpush1.bf16.msra.mxu0 %v2286_v58  ;;  %2503 = vmatpush1.bf16.msra.mxu1 %v2288_v59  ;;  %v2345_v58 = vld [vmem:[#allocation3 + $0x3f8] sm:$0xff]  ;;  %v2342_v59 = vld [vmem:[#allocation3 + $0x3e0] sm:$0xff] }
 0x90b   :  { %2418 = vmatprep.subr.bf16.mxu0 %v2291_v40  ;;  %2504 = vmatprep.subr.bf16.mxu1 %v2293_v27  ;;  %v2344_v40 = vld [vmem:[#allocation3 + $0x3f0] sm:$0xff]  ;;  %v2347_v27 = vld [vmem:[#allocation3 + $0x408] sm:$0xff] }
 0x90e   :  { %2419 = vmatpush1.bf16.msra.mxu0 %v2290_v62  ;;  %2505 = vmatpush1.bf16.msra.mxu1 %v2292_v22  ;;  %v2349_v62 = vld [vmem:[#allocation3 + $0x418] sm:$0xff]  ;;  %v2346_v22 = vld [vmem:[#allocation3 + $0x400] sm:$0xff] }
 0x90f   :  { %2420 = vmatprep.subr.bf16.mxu0 %v2295_v19  ;;  %2506 = vmatprep.subr.bf16.mxu1 %v2297_v23  ;;  %v2348_v19 = vld [vmem:[#allocation3 + $0x410] sm:$0xff]  ;;  %v2351_v23 = vld [vmem:[#allocation3 + $0x428] sm:$0xff] }
 0x912   :  { %2421 = vmatpush1.bf16.msra.mxu0 %v2294_v51  ;;  %2507 = vmatpush1.bf16.msra.mxu1 %v2296_v24  ;;  %v2353_v51 = vld [vmem:[#allocation3 + $0x438] sm:$0xff]  ;;  %v2350_v24 = vld [vmem:[#allocation3 + $0x420] sm:$0xff] }
 0x913   :  { %2422 = vmatprep.subr.bf16.mxu0 %v2299_v25  ;;  %2508 = vmatprep.subr.bf16.mxu1 %v2301_v28  ;;  %v2352_v25 = vld [vmem:[#allocation3 + $0x430] sm:$0xff]  ;;  %v2355_v28 = vld [vmem:[#allocation3 + $0x448] sm:$0xff] }
 0x916   :  { %2423 = vmatpush1.bf16.msra.mxu0 %v2298_v26  ;;  %2509 = vmatpush1.bf16.msra.mxu1 %v2300_v13  ;;  %v2357_v26 = vld [vmem:[#allocation3 + $0x458] sm:$0xff]  ;;  %v2354_v13 = vld [vmem:[#allocation3 + $0x440] sm:$0xff] }
 0x917   :  { %2424 = vmatprep.subr.bf16.mxu0 %v2303_v16  ;;  %2510 = vmatprep.subr.bf16.mxu1 %v2305_v34  ;;  %v2356_v16 = vld [vmem:[#allocation3 + $0x450] sm:$0xff]  ;;  %v2359_v34 = vld [vmem:[#allocation3 + $0x468] sm:$0xff] }
 0x91a   :  { %2425 = vmatpush1.bf16.msra.mxu0 %v2302_v43  ;;  %2511 = vmatpush1.bf16.msra.mxu1 %v2304_v63  ;;  %v2361_v43 = vld [vmem:[#allocation3 + $0x478] sm:$0xff]  ;;  %v2358_v63 = vld [vmem:[#allocation3 + $0x460] sm:$0xff] }
 0x91b   :  { %2426 = vmatprep.subr.bf16.mxu0 %v2307_v44  ;;  %2512 = vmatprep.subr.bf16.mxu1 %v2309_v18  ;;  %v2360_v44 = vld [vmem:[#allocation3 + $0x470] sm:$0xff]  ;;  %v2363_v18 = vld [vmem:[#allocation3 + $0x488] sm:$0xff] }
 0x91e   :  { %2427 = vmatpush1.bf16.msra.mxu0 %v2306_v20  ;;  %2513 = vmatpush1.bf16.msra.mxu1 %v2308_v42  ;;  %v2365_v20 = vld [vmem:[#allocation3 + $0x498] sm:$0xff]  ;;  %v2362_v42 = vld [vmem:[#allocation3 + $0x480] sm:$0xff] }
 0x91f   :  { %2428 = vmatprep.subr.bf16.mxu0 %v2311_v29  ;;  %2514 = vmatprep.subr.bf16.mxu1 %v2313_v31  ;;  %v2364_v29 = vld [vmem:[#allocation3 + $0x490] sm:$0xff]  ;;  %v2367_v31 = vld [vmem:[#allocation3 + $0x4a8] sm:$0xff] }
 0x922   :  { %2429 = vmatpush1.bf16.msra.mxu0 %v2310_v14  ;;  %2515 = vmatpush1.bf16.msra.mxu1 %v2312_v21  ;;  %v2369_v14 = vld [vmem:[#allocation3 + $0x4b8] sm:$0xff]  ;;  %v2366_v21 = vld [vmem:[#allocation3 + $0x4a0] sm:$0xff] }
 0x923   :  { %2441 = vmatprep.subr.bf16.mxu0 %v2315_v0  ;;  %2527 = vmatprep.subr.bf16.mxu1 %v2317_v45  ;;  %v2368_v0 = vld [vmem:[#allocation3 + $0x4b0] sm:$0xff]  ;;  %v2371_v45 = vld [vmem:[#allocation3 + $0x4c8] sm:$0xff] }
 0x925   :  { %2431 = vmatmul.mubr.bf16.vlgmr.msra.gmra.mrb[32].mxu0 %v5030_v30  ;;  %2517 = vmatmul.mubr.bf16.vlgmr.msra.gmra.mrb[32].mxu1 %v5030_v30  ;;  %v2373_v30 = vld [vmem:[#allocation3 + $0x4d8] sm:$0xff] }
 0x926   :  { %2442 = vmatpush1.bf16.msra.mxu0 %v2314_v1  ;;  %2528 = vmatpush1.bf16.msra.mxu1 %v2316_v2  ;;  %v2370_v1 = vld [vmem:[#allocation3 + $0x4c0] sm:$0xff]  ;;  %v2372_v2 = vld [vmem:[#allocation3 + $0x4d0] sm:$0xff] }
 0x927   :  { %2443 = vmatprep.subr.bf16.mxu0 %v2319_v3  ;;  %2529 = vmatprep.subr.bf16.mxu1 %v2321_v47  ;;  %v2375_v3 = vld [vmem:[#allocation3 + $0x4e8] sm:$0xff]  ;;  %v2377_v47 = vld [vmem:[#allocation3 + $0x4f8] sm:$0xff] }
 0x928   :  { %2473 = vmatprep.mubr.bf16.mxu0 %v5035_v50  ;;  %2559 = vmatprep.mubr.bf16.mxu1 %v5035_v50  ;;  %v2374_v50 = vld [vmem:[#allocation3 + $0x4e0] sm:$0xff] }
 0x92a   :  { %2444 = vmatpush1.bf16.msra.mxu0 %v2318_v4  ;;  %2530 = vmatpush1.bf16.msra.mxu1 %v2320_v5  ;;  %v2376_v4 = vld [vmem:[#allocation3 + $0x4f0] sm:$0xff]  ;;  %v2215_v5 = vld [vmem:[#allocation3 + $0x8] sm:$0xff] }
 0x92b   :  { %2445 = vmatprep.subr.bf16.mxu0 %v2323_v8  ;;  %2531 = vmatprep.subr.bf16.mxu1 %v2325_v9  ;;  %v2217_v8 = vld [vmem:[#allocation3 + $0x18] sm:$0xff] }
 0x92c   :  { %v5033_v9 = vld [vmem:[%s5877_s1 + $0x8] ss:$16 sps:$4 sm:$0xff]  }
 0x92e   :  { %2446 = vmatpush1.bf16.msra.mxu0 %v2322_v10  ;;  %2532 = vmatpush1.bf16.msra.mxu1 %v2324_v11  ;;  %v2214_v10 = vld [vmem:[#allocation3] sm:$0xff]  ;;  %v2216_v11 = vld [vmem:[#allocation3 + $0x10] sm:$0xff] }
 0x92f   :  { %2447 = vmatprep.subr.bf16.mxu0 %v2327_v12  ;;  %2533 = vmatprep.subr.bf16.mxu1 %v2329_v6  ;;  %v2219_v12 = vld [vmem:[#allocation3 + $0x28] sm:$0xff]  ;;  %v2221_v6 = vld [vmem:[#allocation3 + $0x38] sm:$0xff] }
 0x932   :  { %2448 = vmatpush1.bf16.msra.mxu0 %v2326_v48  ;;  %2534 = vmatpush1.bf16.msra.mxu1 %v2328_v60  ;;  %v2218_v48 = vld [vmem:[#allocation3 + $0x20] sm:$0xff]  ;;  %v2220_v60 = vld [vmem:[#allocation3 + $0x30] sm:$0xff] }
 0x933   :  { %2449 = vmatprep.subr.bf16.mxu0 %v2331_v61  ;;  %2535 = vmatprep.subr.bf16.mxu1 %v2333_v17  ;;  %v2223_v61 = vld [vmem:[#allocation3 + $0x48] sm:$0xff]  ;;  %v2225_v17 = vld [vmem:[#allocation3 + $0x58] sm:$0xff] }
 0x936   :  { %2450 = vmatpush1.bf16.msra.mxu0 %v2330_v38  ;;  %2536 = vmatpush1.bf16.msra.mxu1 %v2332_v49  ;;  %v2222_v38 = vld [vmem:[#allocation3 + $0x40] sm:$0xff]  ;;  %v2224_v49 = vld [vmem:[#allocation3 + $0x50] sm:$0xff] }
 0x937   :  { %2451 = vmatprep.subr.bf16.mxu0 %v2335_v33  ;;  %2537 = vmatprep.subr.bf16.mxu1 %v2337_v39  ;;  %v2227_v33 = vld [vmem:[#allocation3 + $0x68] sm:$0xff]  ;;  %v2229_v39 = vld [vmem:[#allocation3 + $0x78] sm:$0xff] }
 0x93a   :  { %2452 = vmatpush1.bf16.msra.mxu0 %v2334_v55  ;;  %2538 = vmatpush1.bf16.msra.mxu1 %v2336_v36  ;;  %v2226_v55 = vld [vmem:[#allocation3 + $0x60] sm:$0xff]  ;;  %v2228_v36 = vld [vmem:[#allocation3 + $0x70] sm:$0xff] }
 0x93b   :  { %2453 = vmatprep.subr.bf16.mxu0 %v2339_v52  ;;  %2539 = vmatprep.subr.bf16.mxu1 %v2341_v54  ;;  %v2231_v52 = vld [vmem:[#allocation3 + $0x88] sm:$0xff]  ;;  %v2233_v54 = vld [vmem:[#allocation3 + $0x98] sm:$0xff] }
 0x93e   :  { %2454 = vmatpush1.bf16.msra.mxu0 %v2338_v7  ;;  %2540 = vmatpush1.bf16.msra.mxu1 %v2340_v56  ;;  %v2232_v7 = vld [vmem:[#allocation3 + $0x90] sm:$0xff]  ;;  %v2235_v56 = vld [vmem:[#allocation3 + $0xa8] sm:$0xff] }
 0x93f   :  { %2455 = vmatprep.subr.bf16.mxu0 %v2343_v57  ;;  %2541 = vmatprep.subr.bf16.mxu1 %v2345_v58  ;;  %v2237_v57 = vld [vmem:[#allocation3 + $0xb8] sm:$0xff]  ;;  %v2234_v58 = vld [vmem:[#allocation3 + $0xa0] sm:$0xff] }
 0x942   :  { %2456 = vmatpush1.bf16.msra.mxu0 %v2342_v59  ;;  %2542 = vmatpush1.bf16.msra.mxu1 %v2344_v40  ;;  %v2236_v59 = vld [vmem:[#allocation3 + $0xb0] sm:$0xff]  ;;  %v2239_v40 = vld [vmem:[#allocation3 + $0xc8] sm:$0xff] }
 0x943   :  { %2457 = vmatprep.subr.bf16.mxu0 %v2347_v27  ;;  %2543 = vmatprep.subr.bf16.mxu1 %v2349_v62  ;;  %v2241_v27 = vld [vmem:[#allocation3 + $0xd8] sm:$0xff]  ;;  %v2238_v62 = vld [vmem:[#allocation3 + $0xc0] sm:$0xff] }
 0x946   :  { %2458 = vmatpush1.bf16.msra.mxu0 %v2346_v22  ;;  %2544 = vmatpush1.bf16.msra.mxu1 %v2348_v19  ;;  %v2240_v22 = vld [vmem:[#allocation3 + $0xd0] sm:$0xff]  ;;  %v2243_v19 = vld [vmem:[#allocation3 + $0xe8] sm:$0xff] }
 0x947   :  { %2459 = vmatprep.subr.bf16.mxu0 %v2351_v23  ;;  %2545 = vmatprep.subr.bf16.mxu1 %v2353_v51  ;;  %v2245_v23 = vld [vmem:[#allocation3 + $0xf8] sm:$0xff]  ;;  %v2242_v51 = vld [vmem:[#allocation3 + $0xe0] sm:$0xff] }
 0x94a   :  { %2460 = vmatpush1.bf16.msra.mxu0 %v2350_v24  ;;  %2546 = vmatpush1.bf16.msra.mxu1 %v2352_v25  ;;  %v2244_v24 = vld [vmem:[#allocation3 + $0xf0] sm:$0xff]  ;;  %v2700_v25 = vld [vmem:[#allocation3 + $0x508] sm:$0xff] }
 0x94b   :  { %2461 = vmatprep.subr.bf16.mxu0 %v2355_v28  ;;  %2547 = vmatprep.subr.bf16.mxu1 %v2357_v26  ;;  %v2702_v28 = vld [vmem:[#allocation3 + $0x518] sm:$0xff]  ;;  %v2213_v26 = vpack.c.bf16 %v5816_v15, %v5814_v46  ;;  %v2707_v46 = vld [vmem:[#allocation3 + $0x540] sm:$0xff]  ;;  %v2709_v15 = vld [vmem:[#allocation3 + $0x550] sm:$0xff] }
 0x94e   :  { %2462 = vmatpush1.bf16.msra.mxu0 %v2354_v13  ;;  %2548 = vmatpush1.bf16.msra.mxu1 %v2356_v16  ;;  %v2699_v13 = vld [vmem:[#allocation3 + $0x500] sm:$0xff]  ;;  %v2701_v16 = vld [vmem:[#allocation3 + $0x510] sm:$0xff] }
 0x94f   :  { %2463 = vmatprep.subr.bf16.mxu0 %v2359_v34  ;;  %2549 = vmatprep.subr.bf16.mxu1 %v2361_v43  ;;  %v2704_v34 = vld [vmem:[#allocation3 + $0x528] sm:$0xff]  ;;  %v2706_v43 = vld [vmem:[#allocation3 + $0x538] sm:$0xff] }
 0x952   :  { %2464 = vmatpush1.bf16.msra.mxu0 %v2358_v63  ;;  %2550 = vmatpush1.bf16.msra.mxu1 %v2360_v44  ;;  %v2703_v63 = vld [vmem:[#allocation3 + $0x520] sm:$0xff]  ;;  %v2705_v44 = vld [vmem:[#allocation3 + $0x530] sm:$0xff] }
 0x953   :  { %2465 = vmatprep.subr.bf16.mxu0 %v2363_v18  ;;  %2551 = vmatprep.subr.bf16.mxu1 %v2365_v20  ;;  %v2708_v18 = vld [vmem:[#allocation3 + $0x548] sm:$0xff]  ;;  %v2710_v20 = vld [vmem:[#allocation3 + $0x558] sm:$0xff] }
 0x956   :  { %2466 = vmatpush1.bf16.msra.mxu0 %v2362_v42  ;;  %2552 = vmatpush1.bf16.msra.mxu1 %v2364_v29  ;;  %v2712_v42 = vld [vmem:[#allocation3 + $0x568] sm:$0xff]  ;;  %v2714_v29 = vld [vmem:[#allocation3 + $0x578] sm:$0xff] }
 0x957   :  { %2467 = vmatprep.subr.bf16.mxu0 %v2367_v31  ;;  %2553 = vmatprep.subr.bf16.mxu1 %v2369_v14  ;;  %v2711_v31 = vld [vmem:[#allocation3 + $0x560] sm:$0xff]  ;;  %v2713_v14 = vld [vmem:[#allocation3 + $0x570] sm:$0xff] }
 0x95a   :  { %2468 = vmatpush1.bf16.msra.mxu0 %v2366_v21  ;;  %2554 = vmatpush1.bf16.msra.mxu1 %v2368_v0  ;;  %v2716_v21 = vld [vmem:[#allocation3 + $0x588] sm:$0xff]  ;;  %v2718_v0 = vld [vmem:[#allocation3 + $0x598] sm:$0xff] }
 0x95b   :  { %2469 = vmatprep.subr.bf16.mxu0 %v2371_v45  ;;  %2555 = vmatprep.subr.bf16.mxu1 %v2373_v30  ;;  %v2715_v45 = vld [vmem:[#allocation3 + $0x580] sm:$0xff]  ;;  %v2717_v30 = vld [vmem:[#allocation3 + $0x590] sm:$0xff] }
 0x95e   :  { %2470 = vmatpush1.bf16.msra.mxu0 %v2370_v1  ;;  %2556 = vmatpush1.bf16.msra.mxu1 %v2372_v2  ;;  %v2720_v1 = vld [vmem:[#allocation3 + $0x5a8] sm:$0xff]  ;;  %v2722_v2 = vld [vmem:[#allocation3 + $0x5b8] sm:$0xff] }
 0x95f   :  { %2471 = vmatprep.subr.bf16.mxu0 %v2375_v3  ;;  %2557 = vmatprep.subr.bf16.mxu1 %v2377_v47  ;;  %v2719_v3 = vld [vmem:[#allocation3 + $0x5a0] sm:$0xff]  ;;  %v2721_v47 = vld [vmem:[#allocation3 + $0x5b0] sm:$0xff] }
 0x962   :  { %2472 = vmatpush1.bf16.msra.mxu0 %v2374_v50  ;;  %2558 = vmatpush1.bf16.msra.mxu1 %v2376_v4  ;;  %v2724_v50 = vld [vmem:[#allocation3 + $0x5c8] sm:$0xff]  ;;  %v2726_v4 = vld [vmem:[#allocation3 + $0x5d8] sm:$0xff] }
 0x963   :  { %2570 = vmatprep.subr.bf16.mxu0 %v2215_v5  ;;  %2613 = vmatprep.subr.bf16.mxu1 %v2217_v8  ;;  %v2723_v5 = vld [vmem:[#allocation3 + $0x5c0] sm:$0xff]  ;;  %v2725_v8 = vld [vmem:[#allocation3 + $0x5d0] sm:$0xff] }
 0x965   :  { %2474 = vmatmul.mubr.bf16.vlgmr.msra.gmra.mrb[32].mxu0 %v5033_v9  ;;  %2560 = vmatmul.mubr.bf16.vlgmr.msra.gmra.mrb[32].mxu1 %v5033_v9  ;;  %v2728_v9 = vld [vmem:[#allocation3 + $0x5e8] sm:$0xff] }
 0x966   :  { %2571 = vmatpush1.bf16.msra.mxu0 %v2214_v10  ;;  %2614 = vmatpush1.bf16.msra.mxu1 %v2216_v11  ;;  %v2730_v10 = vld [vmem:[#allocation3 + $0x5f8] sm:$0xff]  ;;  %v2727_v11 = vld [vmem:[#allocation3 + $0x5e0] sm:$0xff] }
 0x967   :  { %2572 = vmatprep.subr.bf16.mxu0 %v2219_v12  ;;  %2615 = vmatprep.subr.bf16.mxu1 %v2221_v6  ;;  %v2729_v12 = vld [vmem:[#allocation3 + $0x5f0] sm:$0xff]  ;;  %v2732_v6 = vld [vmem:[#allocation3 + $0x608] sm:$0xff] }
 0x968   :  { %2602 = vmatprep.mubr.bf16.mxu0 %v5121_v32  ;;  %2645 = vmatprep.mubr.bf16.mxu1 %v5121_v32  ;;  %v2230_v32 = vld [vmem:[#allocation3 + $0x80] sm:$0xff] }
 0x96a   :  { %2573 = vmatpush1.bf16.msra.mxu0 %v2218_v48  ;;  %2616 = vmatpush1.bf16.msra.mxu1 %v2220_v60  ;;  %v2734_v48 = vld [vmem:[#allocation3 + $0x618] sm:$0xff]  ;;  %v2731_v60 = vld [vmem:[#allocation3 + $0x600] sm:$0xff] }
 0x96b   :  { %2574 = vmatprep.subr.bf16.mxu0 %v2223_v61  ;;  %2617 = vmatprep.subr.bf16.mxu1 %v2225_v17  ;;  %v2733_v61 = vld [vmem:[#allocation3 + $0x610] sm:$0xff]  ;;  %v2736_v17 = vld [vmem:[#allocation3 + $0x628] sm:$0xff] }
 0x96e   :  { %2575 = vmatpush1.bf16.msra.mxu0 %v2222_v38  ;;  %2618 = vmatpush1.bf16.msra.mxu1 %v2224_v49  ;;  %v2738_v38 = vld [vmem:[#allocation3 + $0x638] sm:$0xff]  ;;  %v2735_v49 = vld [vmem:[#allocation3 + $0x620] sm:$0xff] }
 0x96f   :  { %2576 = vmatprep.subr.bf16.mxu0 %v2227_v33  ;;  %2619 = vmatprep.subr.bf16.mxu1 %v2229_v39  ;;  %v2737_v33 = vld [vmem:[#allocation3 + $0x630] sm:$0xff]  ;;  %v2740_v39 = vld [vmem:[#allocation3 + $0x648] sm:$0xff] }
 0x972   :  { %2577 = vmatpush1.bf16.msra.mxu0 %v2226_v55  ;;  %2620 = vmatpush1.bf16.msra.mxu1 %v2228_v36  ;;  %v2742_v55 = vld [vmem:[#allocation3 + $0x658] sm:$0xff]  ;;  %v2739_v36 = vld [vmem:[#allocation3 + $0x640] sm:$0xff] }
 0x973   :  { %2578 = vmatprep.subr.bf16.mxu0 %v2231_v52  ;;  %2621 = vmatprep.subr.bf16.mxu1 %v2233_v54  ;;  %v2741_v52 = vld [vmem:[#allocation3 + $0x650] sm:$0xff]  ;;  %v2744_v54 = vld [vmem:[#allocation3 + $0x668] sm:$0xff] }
 0x976   :  { %2579 = vmatpush1.bf16.msra.mxu0 %v2230_v32  ;;  %2622 = vmatpush1.bf16.msra.mxu1 %v2232_v7  ;;  %v2746_v32 = vld [vmem:[#allocation3 + $0x678] sm:$0xff]  ;;  %v2743_v7 = vld [vmem:[#allocation3 + $0x660] sm:$0xff] }
 0x977   :  { %2580 = vmatprep.subr.bf16.mxu0 %v2235_v56  ;;  %2623 = vmatprep.subr.bf16.mxu1 %v2237_v57  ;;  %v2745_v56 = vld [vmem:[#allocation3 + $0x670] sm:$0xff]  ;;  %v2748_v57 = vld [vmem:[#allocation3 + $0x688] sm:$0xff] }
 0x97a   :  { %2581 = vmatpush1.bf16.msra.mxu0 %v2234_v58  ;;  %2624 = vmatpush1.bf16.msra.mxu1 %v2236_v59  ;;  %v2750_v58 = vld [vmem:[#allocation3 + $0x698] sm:$0xff]  ;;  %v2747_v59 = vld [vmem:[#allocation3 + $0x680] sm:$0xff] }
 0x97b   :  { %2582 = vmatprep.subr.bf16.mxu0 %v2239_v40  ;;  %2625 = vmatprep.subr.bf16.mxu1 %v2241_v27  ;;  %v2749_v40 = vld [vmem:[#allocation3 + $0x690] sm:$0xff]  ;;  %v2752_v27 = vld [vmem:[#allocation3 + $0x6a8] sm:$0xff] }
 0x97e   :  { %2583 = vmatpush1.bf16.msra.mxu0 %v2238_v62  ;;  %2626 = vmatpush1.bf16.msra.mxu1 %v2240_v22  ;;  %v2754_v62 = vld [vmem:[#allocation3 + $0x6b8] sm:$0xff]  ;;  %v2751_v22 = vld [vmem:[#allocation3 + $0x6a0] sm:$0xff] }
 0x97f   :  { %2584 = vmatprep.subr.bf16.mxu0 %v2243_v19  ;;  %2627 = vmatprep.subr.bf16.mxu1 %v2245_v23  ;;  %v2753_v19 = vld [vmem:[#allocation3 + $0x6b0] sm:$0xff]  ;;  %v2756_v23 = vld [vmem:[#allocation3 + $0x6c8] sm:$0xff] }
 0x982   :  { %2585 = vmatpush1.bf16.msra.mxu0 %v2242_v51  ;;  %2628 = vmatpush1.bf16.msra.mxu1 %v2244_v24  ;;  %v2758_v51 = vld [vmem:[#allocation3 + $0x6d8] sm:$0xff]  ;;  %v2755_v24 = vld [vmem:[#allocation3 + $0x6c0] sm:$0xff] }
 0x983   :  { %2850 = vmatprep.subr.bf16.mxu0 %v2700_v25  ;;  %2936 = vmatprep.subr.bf16.mxu1 %v2702_v28  ;;  %v2757_v25 = vld [vmem:[#allocation3 + $0x6d0] sm:$0xff]  ;;  %v2760_v28 = vld [vmem:[#allocation3 + $0x6e8] sm:$0xff] }
 0x985   :  { %2603 = vmatmul.mubr.bf16.vlgmr.msra.gmra.mrb[32].mxu0 %v2213_v26  ;;  %2646 = vmatmul.mubr.bf16.vlgmr.msra.gmra.mrb[32].mxu1 %v2213_v26  ;;  %v2762_v26 = vld [vmem:[#allocation3 + $0x6f8] sm:$0xff] }
 0x986   :  { %2851 = vmatpush1.bf16.msra.mxu0 %v2699_v13  ;;  %2937 = vmatpush1.bf16.msra.mxu1 %v2701_v16  ;;  %v2759_v13 = vld [vmem:[#allocation3 + $0x6e0] sm:$0xff]  ;;  %v2761_v16 = vld [vmem:[#allocation3 + $0x6f0] sm:$0xff] }
 0x987   :  { %2852 = vmatprep.subr.bf16.mxu0 %v2704_v34  ;;  %2938 = vmatprep.subr.bf16.mxu1 %v2706_v43  ;;  %v2764_v34 = vld [vmem:[#allocation3 + $0x708] sm:$0xff]  ;;  %v2766_v43 = vld [vmem:[#allocation3 + $0x718] sm:$0xff] }
 0x98a   :  { %2853 = vmatpush1.bf16.msra.mxu0 %v2703_v63  ;;  %2939 = vmatpush1.bf16.msra.mxu1 %v2705_v44  ;;  %v2657_v63 = vld [vmem:[#allocation9 + $0x1] ss:$8 sm:$0xf] }
 0x98b   :  { %2854 = vmatprep.subr.bf16.mxu0 %v2708_v18  ;;  %2940 = vmatprep.subr.bf16.mxu1 %v2710_v20  ;;  %v2662_v44 = vrot.slane %v2657_v63, %v5408_v35  ;;  %v2670_v18 = vrot.slane %v2657_v63, %v5418_v41  ;;  %v2666_v20 = vrot.slane %v2657_v63, %v5410_v37 }
 0x98e   :  { %2855 = vmatpush1.bf16.msra.mxu0 %v2707_v46  ;;  %2941 = vmatpush1.bf16.msra.mxu1 %v2709_v15  ;;  %v2674_v46 = vrot.slane %v2657_v63, %v5422_v53  ;;  %v2794_v63 = vld [vmem:[#allocation3 + $0x7f8] sm:$0xff] }
 0x98f   :  { %2856 = vmatprep.subr.bf16.mxu0 %v2712_v42  ;;  %2942 = vmatprep.subr.bf16.mxu1 %v2714_v29 }
 0x992   :  { %2857 = vmatpush1.bf16.msra.mxu0 %v2711_v31  ;;  %2943 = vmatpush1.bf16.msra.mxu1 %v2713_v14 }
 0x993   :  { %2858 = vmatprep.subr.bf16.mxu0 %v2716_v21  ;;  %2944 = vmatprep.subr.bf16.mxu1 %v2718_v0 }
 0x996   :  { %2859 = vmatpush1.bf16.msra.mxu0 %v2715_v45  ;;  %2945 = vmatpush1.bf16.msra.mxu1 %v2717_v30 }
 0x997   :  { %2860 = vmatprep.subr.bf16.mxu0 %v2720_v1  ;;  %2946 = vmatprep.subr.bf16.mxu1 %v2722_v2 }
 0x99a   :  { %2861 = vmatpush1.bf16.msra.mxu0 %v2719_v3  ;;  %2947 = vmatpush1.bf16.msra.mxu1 %v2721_v47 }
 0x99b   :  { %2862 = vmatprep.subr.bf16.mxu0 %v2724_v50  ;;  %2948 = vmatprep.subr.bf16.mxu1 %v2726_v4 }
 0x99e   :  { %2863 = vmatpush1.bf16.msra.mxu0 %v2723_v5  ;;  %2949 = vmatpush1.bf16.msra.mxu1 %v2725_v8 }
 0x99f   :  { %2864 = vmatprep.subr.bf16.mxu0 %v2728_v9  ;;  %2950 = vmatprep.subr.bf16.mxu1 %v2730_v10 }
 0x9a2   :  { %2865 = vmatpush1.bf16.msra.mxu0 %v2727_v11  ;;  %2951 = vmatpush1.bf16.msra.mxu1 %v2729_v12 }
 0x9a3   :  { %2866 = vmatprep.subr.bf16.mxu0 %v2732_v6  ;;  %2952 = vmatprep.subr.bf16.mxu1 %v2734_v48 }
 0x9a6   :  { %2867 = vmatpush1.bf16.msra.mxu0 %v2731_v60  ;;  %2953 = vmatpush1.bf16.msra.mxu1 %v2733_v61 }
 0x9a7   :  { %2868 = vmatprep.subr.bf16.mxu0 %v2736_v17  ;;  %2954 = vmatprep.subr.bf16.mxu1 %v2738_v38 }
 0x9aa   :  { %2869 = vmatpush1.bf16.msra.mxu0 %v2735_v49  ;;  %2955 = vmatpush1.bf16.msra.mxu1 %v2737_v33  ;;  %v2763_v33 = vld [vmem:[#allocation3 + $0x700] sm:$0xff] }
 0x9ab   :  { %2870 = vmatprep.subr.bf16.mxu0 %v2740_v39  ;;  %2956 = vmatprep.subr.bf16.mxu1 %v2742_v55  ;;  %v2765_v39 = vld [vmem:[#allocation3 + $0x710] sm:$0xff]  ;;  %v2768_v55 = vld [vmem:[#allocation3 + $0x728] sm:$0xff] }
 0x9ae   :  { %2871 = vmatpush1.bf16.msra.mxu0 %v2739_v36  ;;  %2957 = vmatpush1.bf16.msra.mxu1 %v2741_v52  ;;  %v2770_v36 = vld [vmem:[#allocation3 + $0x738] sm:$0xff]  ;;  %v2767_v52 = vld [vmem:[#allocation3 + $0x720] sm:$0xff] }
 0x9af   :  { %2872 = vmatprep.subr.bf16.mxu0 %v2744_v54  ;;  %2958 = vmatprep.subr.bf16.mxu1 %v2746_v32  ;;  %v2769_v54 = vld [vmem:[#allocation3 + $0x730] sm:$0xff]  ;;  %v2772_v32 = vld [vmem:[#allocation3 + $0x748] sm:$0xff] }
 0x9b2   :  { %2873 = vmatpush1.bf16.msra.mxu0 %v2743_v7  ;;  %2959 = vmatpush1.bf16.msra.mxu1 %v2745_v56  ;;  %v2774_v7 = vld [vmem:[#allocation3 + $0x758] sm:$0xff]  ;;  %v2771_v56 = vld [vmem:[#allocation3 + $0x740] sm:$0xff] }
 0x9b3   :  { %2874 = vmatprep.subr.bf16.mxu0 %v2748_v57  ;;  %2960 = vmatprep.subr.bf16.mxu1 %v2750_v58  ;;  %v2773_v57 = vld [vmem:[#allocation3 + $0x750] sm:$0xff]  ;;  %v2776_v58 = vld [vmem:[#allocation3 + $0x768] sm:$0xff] }
 0x9b6   :  { %2875 = vmatpush1.bf16.msra.mxu0 %v2747_v59  ;;  %2961 = vmatpush1.bf16.msra.mxu1 %v2749_v40  ;;  %v2778_v59 = vld [vmem:[#allocation3 + $0x778] sm:$0xff]  ;;  %v2775_v40 = vld [vmem:[#allocation3 + $0x760] sm:$0xff] }
 0x9b7   :  { %2876 = vmatprep.subr.bf16.mxu0 %v2752_v27  ;;  %2962 = vmatprep.subr.bf16.mxu1 %v2754_v62  ;;  %v2777_v27 = vld [vmem:[#allocation3 + $0x770] sm:$0xff]  ;;  %v2780_v62 = vld [vmem:[#allocation3 + $0x788] sm:$0xff] }
 0x9ba   :  { %2877 = vmatpush1.bf16.msra.mxu0 %v2751_v22  ;;  %2963 = vmatpush1.bf16.msra.mxu1 %v2753_v19  ;;  %v2782_v22 = vld [vmem:[#allocation3 + $0x798] sm:$0xff]  ;;  %v2779_v19 = vld [vmem:[#allocation3 + $0x780] sm:$0xff] }
 0x9bb   :  { %2878 = vmatprep.subr.bf16.mxu0 %v2756_v23  ;;  %2964 = vmatprep.subr.bf16.mxu1 %v2758_v51  ;;  %v2781_v23 = vld [vmem:[#allocation3 + $0x790] sm:$0xff]  ;;  %v2784_v51 = vld [vmem:[#allocation3 + $0x7a8] sm:$0xff] }
 0x9be   :  { %2879 = vmatpush1.bf16.msra.mxu0 %v2755_v24  ;;  %2965 = vmatpush1.bf16.msra.mxu1 %v2757_v25  ;;  %v2786_v24 = vld [vmem:[#allocation3 + $0x7b8] sm:$0xff]  ;;  %v2783_v25 = vld [vmem:[#allocation3 + $0x7a0] sm:$0xff] }
 0x9bf   :  { %2880 = vmatprep.subr.bf16.mxu0 %v2760_v28  ;;  %2966 = vmatprep.subr.bf16.mxu1 %v2762_v26  ;;  %v2785_v28 = vld [vmem:[#allocation3 + $0x7b0] sm:$0xff]  ;;  %v2788_v26 = vld [vmem:[#allocation3 + $0x7c8] sm:$0xff] }
 0x9c2   :  { %2881 = vmatpush1.bf16.msra.mxu0 %v2759_v13  ;;  %2967 = vmatpush1.bf16.msra.mxu1 %v2761_v16  ;;  %v2790_v13 = vld [vmem:[#allocation3 + $0x7d8] sm:$0xff]  ;;  %v2787_v16 = vld [vmem:[#allocation3 + $0x7c0] sm:$0xff] }
 0x9c3   :  { %2893 = vmatprep.subr.bf16.mxu0 %v2764_v34  ;;  %2979 = vmatprep.subr.bf16.mxu1 %v2766_v43  ;;  %v2789_v34 = vld [vmem:[#allocation3 + $0x7d0] sm:$0xff]  ;;  %v2792_v43 = vld [vmem:[#allocation3 + $0x7e8] sm:$0xff] }
 0xa58   :  { %v2604_v15 = vpop.f32.mrb[32].mxu0  ;;  %v2647_v42 = vpop.f32.mrb[32].mxu1 }
 0xa59   :  { %v2679_v29 = vadd.f32 %v2662_v44, %v2604_v15  ;;  %v2681_v31 = vadd.f32 %v2670_v18, %v2647_v42  ;;  %v2606_v14 = vpop.f32.mrb[33].mxu0  ;;  %v2649_v21 = vpop.f32.mrb[33].mxu1  ;;  %v2795_v15 = vld [vmem:[#allocation3 + $0x800] sm:$0xff]  ;;  %v2797_v42 = vld [vmem:[#allocation3 + $0x810] sm:$0xff] }
 0xa5a   :  { %v2680_v0 = vadd.f32 %v2666_v20, %v2606_v14  ;;  %v2682_v45 = vadd.f32 %v2674_v46, %v2649_v21  ;;  %v2608_v30 = vpop.f32.mrb[34].mxu0  ;;  %v2651_v1 = vpop.f32.mrb[34].mxu1  ;;  %v2799_v14 = vld [vmem:[#allocation3 + $0x820] sm:$0xff]  ;;  %v2801_v21 = vld [vmem:[#allocation3 + $0x830] sm:$0xff] }
 0xa5b   :  { %v2683_v2 = vadd.f32 %v2662_v44, %v2608_v30  ;;  %v2685_v3 = vadd.f32 %v2670_v18, %v2651_v1  ;;  %v2610_v47 = vpop.f32.mrb[35].mxu0  ;;  %v2653_v50 = vpop.f32.mrb[35].mxu1  ;;  %v2687_v8 = vmax.f32 %v2679_v29, 0.0  ;;  %v2689_v9 = vmax.f32 %v2681_v31, 0.0  ;;  %v2791_v44 = vld [vmem:[#allocation3 + $0x7e0] sm:$0xff]  ;;  %v2793_v18 = vld [vmem:[#allocation3 + $0x7f0] sm:$0xff] }
 0xa5c   :  { %v2684_v4 = vadd.f32 %v2666_v20, %v2610_v47  ;;  %v2686_v5 = vadd.f32 %v2674_v46, %v2653_v50  ;;  %v2688_v12 = vmax.f32 %v2680_v0, 0.0  ;;  %v2690_v6 = vmax.f32 %v2682_v45, 0.0  ;;  %v2796_v20 = vld [vmem:[#allocation3 + $0x808] sm:$0xff]  ;;  %v2798_v46 = vld [vmem:[#allocation3 + $0x818] sm:$0xff]  ;;  %v2803_v30 = vld [vmem:[#allocation3 + $0x840] sm:$0xff] }
 0xa5d   :  { %v2691_v10 = vmax.f32 %v2683_v2, 0.0  ;;  %v2693_v11 = vmax.f32 %v2685_v3, 0.0  ;;  %v2800_v29 = vld [vmem:[#allocation3 + $0x828] sm:$0xff]  ;;  %v2802_v31 = vld [vmem:[#allocation3 + $0x838] sm:$0xff]  ;;  %v2805_v1 = vld [vmem:[#allocation3 + $0x850] sm:$0xff] }
 0xa5e   :  { %v2692_v48 = vmax.f32 %v2684_v4, 0.0  ;;  %v2694_v60 = vmax.f32 %v2686_v5, 0.0  ;;  %v2804_v0 = vld [vmem:[#allocation3 + $0x848] sm:$0xff]  ;;  %v2806_v45 = vld [vmem:[#allocation3 + $0x858] sm:$0xff]  ;;  %v2807_v47 = vld [vmem:[#allocation3 + $0x860] sm:$0xff] }
 0xa5f   :  { %v2695_v61 = vpack.c.bf16 %v2691_v10, %v2687_v8  ;;  %v5838_v17 = vpack.c.bf16 %v2693_v11, %v2689_v9  ;;  %v2808_v2 = vld [vmem:[#allocation3 + $0x868] sm:$0xff]  ;;  %v2810_v3 = vld [vmem:[#allocation3 + $0x878] sm:$0xff]  ;;  %v2809_v50 = vld [vmem:[#allocation3 + $0x870] sm:$0xff] }
 0xa60   :  { %v2696_v38 = vpack.c.bf16 %v2692_v48, %v2688_v12  ;;  %v2698_v49 = vpack.c.bf16 %v2694_v60, %v2690_v6  ;;  %v2812_v4 = vld [vmem:[#allocation3 + $0x888] sm:$0xff]  ;;  %v2814_v5 = vld [vmem:[#allocation3 + $0x898] sm:$0xff]  ;;  %v2811_v8 = vld [vmem:[#allocation3 + $0x880] sm:$0xff] }
 0xa61   :  { %v2813_v9 = vld [vmem:[#allocation3 + $0x890] sm:$0xff]  ;;  %v2816_v10 = vld [vmem:[#allocation3 + $0x8a8] sm:$0xff]  ;;  %v2818_v11 = vld [vmem:[#allocation3 + $0x8b8] sm:$0xff] }
 0xa62   :  { %2882 = vmatprep.mubr.bf16.mxu0 %v2696_v38  ;;  %2968 = vmatprep.mubr.bf16.mxu1 %v2696_v38  ;;  %v2815_v12 = vld [vmem:[#allocation3 + $0x8a0] sm:$0xff]  ;;  %v2817_v6 = vld [vmem:[#allocation3 + $0x8b0] sm:$0xff]  ;;  %v2820_v48 = vld [vmem:[#allocation3 + $0x8c8] sm:$0xff] }
 0xa63   :  { %2883 = vmatmul.mubr.bf16.vlgmr.msra.gmra.mrb[36].mxu0 %v2695_v61  ;;  %2969 = vmatmul.mubr.bf16.vlgmr.msra.gmra.mrb[36].mxu1 %v2695_v61  ;;  %v2822_v60 = vld [vmem:[#allocation3 + $0x8d8] sm:$0xff]  ;;  %v2819_v61 = vld [vmem:[#allocation3 + $0x8c0] sm:$0xff]  ;;  %v2821_v38 = vld [vmem:[#allocation3 + $0x8d0] sm:$0xff] }
 0xa64   :  { %2894 = vmatpush1.bf16.msra.mxu0 %v2763_v33  ;;  %2980 = vmatpush1.bf16.msra.mxu1 %v2765_v39  ;;  %v2826_v33 = vld [vmem:[#allocation3 + $0x8f8] sm:$0xff]  ;;  %v2823_v39 = vld [vmem:[#allocation3 + $0x8e0] sm:$0xff] }
 0xa65   :  { %2925 = vmatprep.mubr.bf16.mxu0 %v2698_v49  ;;  %3011 = vmatprep.mubr.bf16.mxu1 %v2698_v49  ;;  %v2824_v49 = vld [vmem:[#allocation3 + $0x8e8] sm:$0xff] }
 0xa66   :  { %2895 = vmatprep.subr.bf16.mxu0 %v2768_v55  ;;  %2981 = vmatprep.subr.bf16.mxu1 %v2770_v36  ;;  %v2825_v55 = vld [vmem:[#allocation3 + $0x8f0] sm:$0xff]  ;;  %v3035_v36 = vld [vmem:[#allocation3 + $0x908] sm:$0xff] }
 0xa68   :  { %2896 = vmatpush1.bf16.msra.mxu0 %v2767_v52  ;;  %2982 = vmatpush1.bf16.msra.mxu1 %v2769_v54  ;;  %v3037_v52 = vld [vmem:[#allocation3 + $0x918] sm:$0xff]  ;;  %v3034_v54 = vld [vmem:[#allocation3 + $0x900] sm:$0xff] }
 0xa69   :  { %2897 = vmatprep.subr.bf16.mxu0 %v2772_v32  ;;  %2983 = vmatprep.subr.bf16.mxu1 %v2774_v7  ;;  %v3036_v32 = vld [vmem:[#allocation3 + $0x910] sm:$0xff]  ;;  %v3039_v7 = vld [vmem:[#allocation3 + $0x928] sm:$0xff] }
 0xa6c   :  { %2898 = vmatpush1.bf16.msra.mxu0 %v2771_v56  ;;  %2984 = vmatpush1.bf16.msra.mxu1 %v2773_v57  ;;  %v3041_v56 = vld [vmem:[#allocation3 + $0x938] sm:$0xff]  ;;  %v3038_v57 = vld [vmem:[#allocation3 + $0x920] sm:$0xff] }
 0xa6d   :  { %2899 = vmatprep.subr.bf16.mxu0 %v2776_v58  ;;  %2985 = vmatprep.subr.bf16.mxu1 %v2778_v59  ;;  %v3040_v58 = vld [vmem:[#allocation3 + $0x930] sm:$0xff]  ;;  %v3043_v59 = vld [vmem:[#allocation3 + $0x948] sm:$0xff] }
 0xa70   :  { %2900 = vmatpush1.bf16.msra.mxu0 %v2775_v40  ;;  %2986 = vmatpush1.bf16.msra.mxu1 %v2777_v27  ;;  %v3045_v40 = vld [vmem:[#allocation3 + $0x958] sm:$0xff]  ;;  %v3042_v27 = vld [vmem:[#allocation3 + $0x940] sm:$0xff] }
 0xa71   :  { %2901 = vmatprep.subr.bf16.mxu0 %v2780_v62  ;;  %2987 = vmatprep.subr.bf16.mxu1 %v2782_v22  ;;  %v3044_v62 = vld [vmem:[#allocation3 + $0x950] sm:$0xff]  ;;  %v3047_v22 = vld [vmem:[#allocation3 + $0x968] sm:$0xff] }
 0xa74   :  { %2902 = vmatpush1.bf16.msra.mxu0 %v2779_v19  ;;  %2988 = vmatpush1.bf16.msra.mxu1 %v2781_v23  ;;  %v3049_v19 = vld [vmem:[#allocation3 + $0x978] sm:$0xff]  ;;  %v3048_v23 = vld [vmem:[#allocation3 + $0x970] sm:$0xff] }
 0xa75   :  { %2903 = vmatprep.subr.bf16.mxu0 %v2784_v51  ;;  %2989 = vmatprep.subr.bf16.mxu1 %v2786_v24  ;;  %v3051_v51 = vld [vmem:[#allocation3 + $0x988] sm:$0xff]  ;;  %v3053_v24 = vld [vmem:[#allocation3 + $0x998] sm:$0xff] }
 0xa78   :  { %2904 = vmatpush1.bf16.msra.mxu0 %v2783_v25  ;;  %2990 = vmatpush1.bf16.msra.mxu1 %v2785_v28  ;;  %v3050_v25 = vld [vmem:[#allocation3 + $0x980] sm:$0xff]  ;;  %v3052_v28 = vld [vmem:[#allocation3 + $0x990] sm:$0xff] }
 0xa79   :  { %2905 = vmatprep.subr.bf16.mxu0 %v2788_v26  ;;  %2991 = vmatprep.subr.bf16.mxu1 %v2790_v13  ;;  %v3055_v26 = vld [vmem:[#allocation3 + $0x9a8] sm:$0xff]  ;;  %v3057_v13 = vld [vmem:[#allocation3 + $0x9b8] sm:$0xff] }
 0xa7c   :  { %2906 = vmatpush1.bf16.msra.mxu0 %v2787_v16  ;;  %2992 = vmatpush1.bf16.msra.mxu1 %v2789_v34  ;;  %v3054_v16 = vld [vmem:[#allocation3 + $0x9a0] sm:$0xff]  ;;  %v3056_v34 = vld [vmem:[#allocation3 + $0x9b0] sm:$0xff] }
 0xa7d   :  { %2907 = vmatprep.subr.bf16.mxu0 %v2792_v43  ;;  %2993 = vmatprep.subr.bf16.mxu1 %v2794_v63  ;;  %v3059_v43 = vld [vmem:[#allocation3 + $0x9c8] sm:$0xff]  ;;  %v3061_v63 = vld [vmem:[#allocation3 + $0x9d8] sm:$0xff] }
 0xa80   :  { %2908 = vmatpush1.bf16.msra.mxu0 %v2791_v44  ;;  %2994 = vmatpush1.bf16.msra.mxu1 %v2793_v18  ;;  %v3058_v44 = vld [vmem:[#allocation3 + $0x9c0] sm:$0xff]  ;;  %v3060_v18 = vld [vmem:[#allocation3 + $0x9d0] sm:$0xff] }
 0xa81   :  { %2909 = vmatprep.subr.bf16.mxu0 %v2796_v20  ;;  %2995 = vmatprep.subr.bf16.mxu1 %v2798_v46  ;;  %v3063_v20 = vld [vmem:[#allocation3 + $0x9e8] sm:$0xff]  ;;  %v3065_v46 = vld [vmem:[#allocation3 + $0x9f8] sm:$0xff] }
 0xa84   :  { %2910 = vmatpush1.bf16.msra.mxu0 %v2795_v15  ;;  %2996 = vmatpush1.bf16.msra.mxu1 %v2797_v42  ;;  %v3062_v15 = vld [vmem:[#allocation3 + $0x9e0] sm:$0xff]  ;;  %v3064_v42 = vld [vmem:[#allocation3 + $0x9f0] sm:$0xff] }
 0xa85   :  { %2911 = vmatprep.subr.bf16.mxu0 %v2800_v29  ;;  %2997 = vmatprep.subr.bf16.mxu1 %v2802_v31  ;;  %v3067_v29 = vld [vmem:[#allocation3 + $0xa08] sm:$0xff]  ;;  %v3069_v31 = vld [vmem:[#allocation3 + $0xa18] sm:$0xff] }
 0xa88   :  { %2912 = vmatpush1.bf16.msra.mxu0 %v2799_v14  ;;  %2998 = vmatpush1.bf16.msra.mxu1 %v2801_v21  ;;  %v3066_v14 = vld [vmem:[#allocation3 + $0xa00] sm:$0xff]  ;;  %v3068_v21 = vld [vmem:[#allocation3 + $0xa10] sm:$0xff] }
 0xa89   :  { %2913 = vmatprep.subr.bf16.mxu0 %v2804_v0  ;;  %2999 = vmatprep.subr.bf16.mxu1 %v2806_v45  ;;  %v3071_v0 = vld [vmem:[#allocation3 + $0xa28] sm:$0xff]  ;;  %v3073_v45 = vld [vmem:[#allocation3 + $0xa38] sm:$0xff] }
 0xa8c   :  { %2914 = vmatpush1.bf16.msra.mxu0 %v2803_v30  ;;  %3000 = vmatpush1.bf16.msra.mxu1 %v2805_v1  ;;  %v3070_v30 = vld [vmem:[#allocation3 + $0xa20] sm:$0xff]  ;;  %v3072_v1 = vld [vmem:[#allocation3 + $0xa30] sm:$0xff] }
 0xa8d   :  { %2915 = vmatprep.subr.bf16.mxu0 %v2808_v2  ;;  %3001 = vmatprep.subr.bf16.mxu1 %v2810_v3  ;;  %v3075_v2 = vld [vmem:[#allocation3 + $0xa48] sm:$0xff]  ;;  %v3077_v3 = vld [vmem:[#allocation3 + $0xa58] sm:$0xff] }
 0xa90   :  { %2916 = vmatpush1.bf16.msra.mxu0 %v2807_v47  ;;  %3002 = vmatpush1.bf16.msra.mxu1 %v2809_v50  ;;  %v3074_v47 = vld [vmem:[#allocation3 + $0xa40] sm:$0xff]  ;;  %v3076_v50 = vld [vmem:[#allocation3 + $0xa50] sm:$0xff] }
 0xa91   :  { %2917 = vmatprep.subr.bf16.mxu0 %v2812_v4  ;;  %3003 = vmatprep.subr.bf16.mxu1 %v2814_v5  ;;  %v3079_v4 = vld [vmem:[#allocation3 + $0xa68] sm:$0xff]  ;;  %v3081_v5 = vld [vmem:[#allocation3 + $0xa78] sm:$0xff] }
 0xa94   :  { %2918 = vmatpush1.bf16.msra.mxu0 %v2811_v8  ;;  %3004 = vmatpush1.bf16.msra.mxu1 %v2813_v9  ;;  %v3078_v8 = vld [vmem:[#allocation3 + $0xa60] sm:$0xff]  ;;  %v3080_v9 = vld [vmem:[#allocation3 + $0xa70] sm:$0xff] }
 0xa95   :  { %2919 = vmatprep.subr.bf16.mxu0 %v2816_v10  ;;  %3005 = vmatprep.subr.bf16.mxu1 %v2818_v11  ;;  %v3083_v10 = vld [vmem:[#allocation3 + $0xa88] sm:$0xff]  ;;  %v3085_v11 = vld [vmem:[#allocation3 + $0xa98] sm:$0xff] }
 0xa98   :  { %2920 = vmatpush1.bf16.msra.mxu0 %v2815_v12  ;;  %3006 = vmatpush1.bf16.msra.mxu1 %v2817_v6  ;;  %v3082_v12 = vld [vmem:[#allocation3 + $0xa80] sm:$0xff]  ;;  %v3084_v6 = vld [vmem:[#allocation3 + $0xa90] sm:$0xff] }
 0xa99   :  { %2921 = vmatprep.subr.bf16.mxu0 %v2820_v48  ;;  %3007 = vmatprep.subr.bf16.mxu1 %v2822_v60  ;;  %v3087_v48 = vld [vmem:[#allocation3 + $0xaa8] sm:$0xff]  ;;  %v3089_v60 = vld [vmem:[#allocation3 + $0xab8] sm:$0xff] }
 0xa9c   :  { %2922 = vmatpush1.bf16.msra.mxu0 %v2819_v61  ;;  %3008 = vmatpush1.bf16.msra.mxu1 %v2821_v38  ;;  %v3086_v61 = vld [vmem:[#allocation3 + $0xaa0] sm:$0xff]  ;;  %v3088_v38 = vld [vmem:[#allocation3 + $0xab0] sm:$0xff] }
 0xa9d   :  { %2923 = vmatprep.subr.bf16.mxu0 %v2824_v49  ;;  %3009 = vmatprep.subr.bf16.mxu1 %v2826_v33  ;;  %v3091_v49 = vld [vmem:[#allocation3 + $0xac8] sm:$0xff]  ;;  %v3093_v33 = vld [vmem:[#allocation3 + $0xad8] sm:$0xff] }
 0xaa0   :  { %2924 = vmatpush1.bf16.msra.mxu0 %v2823_v39  ;;  %3010 = vmatpush1.bf16.msra.mxu1 %v2825_v55  ;;  %v3090_v39 = vld [vmem:[#allocation3 + $0xac0] sm:$0xff]  ;;  %v3092_v55 = vld [vmem:[#allocation3 + $0xad0] sm:$0xff] }
 0xaa1   :  { %3185 = vmatprep.subr.bf16.mxu0 %v3035_v36  ;;  %3271 = vmatprep.subr.bf16.mxu1 %v3037_v52  ;;  %v3095_v36 = vld [vmem:[#allocation3 + $0xae8] sm:$0xff]  ;;  %v3097_v52 = vld [vmem:[#allocation3 + $0xaf8] sm:$0xff] }
 0xaa3   :  { %2926 = vmatmul.mubr.bf16.vlgmr.msra.gmra.mrb[36].mxu0 %v5838_v17  ;;  %3012 = vmatmul.mubr.bf16.vlgmr.msra.gmra.mrb[36].mxu1 %v5838_v17  ;;  %v3046_v17 = vld [vmem:[#allocation3 + $0x960] sm:$0xff] }
 0xaa4   :  { %3186 = vmatpush1.bf16.msra.mxu0 %v3034_v54  ;;  %3272 = vmatpush1.bf16.msra.mxu1 %v3036_v32  ;;  %v3094_v54 = vld [vmem:[#allocation3 + $0xae0] sm:$0xff]  ;;  %v3096_v32 = vld [vmem:[#allocation3 + $0xaf0] sm:$0xff] }
 0xaa5   :  { %3187 = vmatprep.subr.bf16.mxu0 %v3039_v7  ;;  %3273 = vmatprep.subr.bf16.mxu1 %v3041_v56  ;;  %v3099_v7 = vld [vmem:[#allocation3 + $0xb08] sm:$0xff]  ;;  %v3101_v56 = vld [vmem:[#allocation3 + $0xb18] sm:$0xff] }
 0xaa8   :  { %3188 = vmatpush1.bf16.msra.mxu0 %v3038_v57  ;;  %3274 = vmatpush1.bf16.msra.mxu1 %v3040_v58  ;;  %v2828_v57 = vld [vmem:[#allocation9 + $0x2] ss:$8 sm:$0xf] }
 0xaa9   :  { %3189 = vmatprep.subr.bf16.mxu0 %v3043_v59  ;;  %3275 = vmatprep.subr.bf16.mxu1 %v3045_v40  ;;  %v2833_v58 = vrot.slane %v2828_v57, %v5408_v35  ;;  %v2841_v59 = vrot.slane %v2828_v57, %v5418_v41  ;;  %v2837_v40 = vrot.slane %v2828_v57, %v5410_v37 }
 0xaac   :  { %3190 = vmatpush1.bf16.msra.mxu0 %v3042_v27  ;;  %3276 = vmatpush1.bf16.msra.mxu1 %v3044_v62  ;;  %v2845_v27 = vrot.slane %v2828_v57, %v5422_v53  ;;  %v3129_v57 = vld [vmem:[#allocation3 + $0xbf8] sm:$0xff] }
 0xaad   :  { %3191 = vmatprep.subr.bf16.mxu0 %v3047_v22  ;;  %3277 = vmatprep.subr.bf16.mxu1 %v3049_v19 }
 0xab0   :  { %3192 = vmatpush1.bf16.msra.mxu0 %v3046_v17  ;;  %3278 = vmatpush1.bf16.msra.mxu1 %v3048_v23 }
 0xab1   :  { %3193 = vmatprep.subr.bf16.mxu0 %v3051_v51  ;;  %3279 = vmatprep.subr.bf16.mxu1 %v3053_v24 }
 0xab4   :  { %3194 = vmatpush1.bf16.msra.mxu0 %v3050_v25  ;;  %3280 = vmatpush1.bf16.msra.mxu1 %v3052_v28 }
 0xab5   :  { %3195 = vmatprep.subr.bf16.mxu0 %v3055_v26  ;;  %3281 = vmatprep.subr.bf16.mxu1 %v3057_v13 }
 0xab8   :  { %3196 = vmatpush1.bf16.msra.mxu0 %v3054_v16  ;;  %3282 = vmatpush1.bf16.msra.mxu1 %v3056_v34 }
 0xab9   :  { %3197 = vmatprep.subr.bf16.mxu0 %v3059_v43  ;;  %3283 = vmatprep.subr.bf16.mxu1 %v3061_v63 }
 0xabc   :  { %3198 = vmatpush1.bf16.msra.mxu0 %v3058_v44  ;;  %3284 = vmatpush1.bf16.msra.mxu1 %v3060_v18 }
 0xabd   :  { %3199 = vmatprep.subr.bf16.mxu0 %v3063_v20  ;;  %3285 = vmatprep.subr.bf16.mxu1 %v3065_v46 }
 0xac0   :  { %3200 = vmatpush1.bf16.msra.mxu0 %v3062_v15  ;;  %3286 = vmatpush1.bf16.msra.mxu1 %v3064_v42 }
 0xac1   :  { %3201 = vmatprep.subr.bf16.mxu0 %v3067_v29  ;;  %3287 = vmatprep.subr.bf16.mxu1 %v3069_v31 }
 0xac4   :  { %3202 = vmatpush1.bf16.msra.mxu0 %v3066_v14  ;;  %3288 = vmatpush1.bf16.msra.mxu1 %v3068_v21 }
 0xac5   :  { %3203 = vmatprep.subr.bf16.mxu0 %v3071_v0  ;;  %3289 = vmatprep.subr.bf16.mxu1 %v3073_v45 }
 0xac8   :  { %3204 = vmatpush1.bf16.msra.mxu0 %v3070_v30  ;;  %3290 = vmatpush1.bf16.msra.mxu1 %v3072_v1  ;;  %v3098_v1 = vld [vmem:[#allocation3 + $0xb00] sm:$0xff] }
 0xac9   :  { %3205 = vmatprep.subr.bf16.mxu0 %v3075_v2  ;;  %3291 = vmatprep.subr.bf16.mxu1 %v3077_v3  ;;  %v3100_v2 = vld [vmem:[#allocation3 + $0xb10] sm:$0xff]  ;;  %v3103_v3 = vld [vmem:[#allocation3 + $0xb28] sm:$0xff] }
 0xacc   :  { %3206 = vmatpush1.bf16.msra.mxu0 %v3074_v47  ;;  %3292 = vmatpush1.bf16.msra.mxu1 %v3076_v50  ;;  %v3105_v47 = vld [vmem:[#allocation3 + $0xb38] sm:$0xff]  ;;  %v3102_v50 = vld [vmem:[#allocation3 + $0xb20] sm:$0xff] }
 0xacd   :  { %3207 = vmatprep.subr.bf16.mxu0 %v3079_v4  ;;  %3293 = vmatprep.subr.bf16.mxu1 %v3081_v5  ;;  %v3104_v4 = vld [vmem:[#allocation3 + $0xb30] sm:$0xff]  ;;  %v3107_v5 = vld [vmem:[#allocation3 + $0xb48] sm:$0xff] }
 0xad0   :  { %3208 = vmatpush1.bf16.msra.mxu0 %v3078_v8  ;;  %3294 = vmatpush1.bf16.msra.mxu1 %v3080_v9  ;;  %v3109_v8 = vld [vmem:[#allocation3 + $0xb58] sm:$0xff]  ;;  %v3106_v9 = vld [vmem:[#allocation3 + $0xb40] sm:$0xff] }
 0xad1   :  { %3209 = vmatprep.subr.bf16.mxu0 %v3083_v10  ;;  %3295 = vmatprep.subr.bf16.mxu1 %v3085_v11  ;;  %v3108_v10 = vld [vmem:[#allocation3 + $0xb50] sm:$0xff]  ;;  %v3111_v11 = vld [vmem:[#allocation3 + $0xb68] sm:$0xff] }
 0xad4   :  { %3210 = vmatpush1.bf16.msra.mxu0 %v3082_v12  ;;  %3296 = vmatpush1.bf16.msra.mxu1 %v3084_v6  ;;  %v3113_v12 = vld [vmem:[#allocation3 + $0xb78] sm:$0xff]  ;;  %v3110_v6 = vld [vmem:[#allocation3 + $0xb60] sm:$0xff] }
 0xad5   :  { %3211 = vmatprep.subr.bf16.mxu0 %v3087_v48  ;;  %3297 = vmatprep.subr.bf16.mxu1 %v3089_v60  ;;  %v3112_v48 = vld [vmem:[#allocation3 + $0xb70] sm:$0xff]  ;;  %v3115_v60 = vld [vmem:[#allocation3 + $0xb88] sm:$0xff] }
 0xad8   :  { %3212 = vmatpush1.bf16.msra.mxu0 %v3086_v61  ;;  %3298 = vmatpush1.bf16.msra.mxu1 %v3088_v38  ;;  %v3117_v61 = vld [vmem:[#allocation3 + $0xb98] sm:$0xff]  ;;  %v3114_v38 = vld [vmem:[#allocation3 + $0xb80] sm:$0xff] }
 0xad9   :  { %3213 = vmatprep.subr.bf16.mxu0 %v3091_v49  ;;  %3299 = vmatprep.subr.bf16.mxu1 %v3093_v33  ;;  %v3116_v49 = vld [vmem:[#allocation3 + $0xb90] sm:$0xff]  ;;  %v3119_v33 = vld [vmem:[#allocation3 + $0xba8] sm:$0xff] }
 0xadc   :  { %3214 = vmatpush1.bf16.msra.mxu0 %v3090_v39  ;;  %3300 = vmatpush1.bf16.msra.mxu1 %v3092_v55  ;;  %v3121_v39 = vld [vmem:[#allocation3 + $0xbb8] sm:$0xff]  ;;  %v3118_v55 = vld [vmem:[#allocation3 + $0xba0] sm:$0xff] }
 0xadd   :  { %3215 = vmatprep.subr.bf16.mxu0 %v3095_v36  ;;  %3301 = vmatprep.subr.bf16.mxu1 %v3097_v52  ;;  %v3120_v36 = vld [vmem:[#allocation3 + $0xbb0] sm:$0xff]  ;;  %v3123_v52 = vld [vmem:[#allocation3 + $0xbc8] sm:$0xff] }
 0xae0   :  { %3216 = vmatpush1.bf16.msra.mxu0 %v3094_v54  ;;  %3302 = vmatpush1.bf16.msra.mxu1 %v3096_v32  ;;  %v3125_v54 = vld [vmem:[#allocation3 + $0xbd8] sm:$0xff]  ;;  %v3122_v32 = vld [vmem:[#allocation3 + $0xbc0] sm:$0xff] }
 0xae1   :  { %3228 = vmatprep.subr.bf16.mxu0 %v3099_v7  ;;  %3314 = vmatprep.subr.bf16.mxu1 %v3101_v56  ;;  %v3124_v7 = vld [vmem:[#allocation3 + $0xbd0] sm:$0xff]  ;;  %v3127_v56 = vld [vmem:[#allocation3 + $0xbe8] sm:$0xff] }
 0xb76   :  { %v2927_v62 = vpop.f32.mrb[36].mxu0  ;;  %v3013_v22 = vpop.f32.mrb[36].mxu1 }
 0xb77   :  { %v4448_v19 = vadd.f32 %v2927_v62, %v2833_v58  ;;  %v4452_v17 = vadd.f32 %v3013_v22, %v2841_v59  ;;  %v2929_v23 = vpop.f32.mrb[37].mxu0  ;;  %v3015_v51 = vpop.f32.mrb[37].mxu1  ;;  %v3130_v62 = vld [vmem:[#allocation3 + $0xc00] sm:$0xff]  ;;  %v3132_v22 = vld [vmem:[#allocation3 + $0xc10] sm:$0xff] }
 0xb78   :  { %v4449_v24 = vadd.f32 %v2929_v23, %v2837_v40  ;;  %v4453_v25 = vadd.f32 %v3015_v51, %v2845_v27  ;;  %v2931_v28 = vpop.f32.mrb[38].mxu0  ;;  %v3017_v26 = vpop.f32.mrb[38].mxu1  ;;  %v3134_v23 = vld [vmem:[#allocation3 + $0xc20] sm:$0xff]  ;;  %v3136_v51 = vld [vmem:[#allocation3 + $0xc30] sm:$0xff] }
 0xb79   :  { %v4450_v13 = vadd.f32 %v2931_v28, %v2833_v58  ;;  %v4454_v16 = vadd.f32 %v3017_v26, %v2841_v59  ;;  %v2933_v34 = vpop.f32.mrb[39].mxu0  ;;  %v3019_v43 = vpop.f32.mrb[39].mxu1  ;;  %v3022_v18 = vmax.f32 %v4448_v19, 0.0  ;;  %v3024_v20 = vmax.f32 %v4452_v17, 0.0  ;;  %v3126_v58 = vld [vmem:[#allocation3 + $0xbe0] sm:$0xff]  ;;  %v3128_v59 = vld [vmem:[#allocation3 + $0xbf0] sm:$0xff] }
 0xb7a   :  { %v4451_v63 = vadd.f32 %v2933_v34, %v2837_v40  ;;  %v4455_v44 = vadd.f32 %v3019_v43, %v2845_v27  ;;  %v3023_v42 = vmax.f32 %v4449_v24, 0.0  ;;  %v3025_v29 = vmax.f32 %v4453_v25, 0.0  ;;  %v3131_v40 = vld [vmem:[#allocation3 + $0xc08] sm:$0xff]  ;;  %v3133_v27 = vld [vmem:[#allocation3 + $0xc18] sm:$0xff]  ;;  %v3138_v28 = vld [vmem:[#allocation3 + $0xc40] sm:$0xff] }
 0xb7b   :  { %v3026_v46 = vmax.f32 %v4450_v13, 0.0  ;;  %v3028_v15 = vmax.f32 %v4454_v16, 0.0  ;;  %v3135_v19 = vld [vmem:[#allocation3 + $0xc28] sm:$0xff]  ;;  %v3137_v17 = vld [vmem:[#allocation3 + $0xc38] sm:$0xff]  ;;  %v3140_v26 = vld [vmem:[#allocation3 + $0xc50] sm:$0xff] }
 0xb7c   :  { %v3027_v31 = vmax.f32 %v4451_v63, 0.0  ;;  %v3029_v14 = vmax.f32 %v4455_v44, 0.0  ;;  %v3139_v24 = vld [vmem:[#allocation3 + $0xc48] sm:$0xff]  ;;  %v3141_v25 = vld [vmem:[#allocation3 + $0xc58] sm:$0xff]  ;;  %v3142_v34 = vld [vmem:[#allocation3 + $0xc60] sm:$0xff] }
 0xb7d   :  { %v3030_v21 = vpack.c.bf16 %v3026_v46, %v3022_v18  ;;  %v5846_v0 = vpack.c.bf16 %v3028_v15, %v3024_v20  ;;  %v3143_v13 = vld [vmem:[#allocation3 + $0xc68] sm:$0xff]  ;;  %v3145_v16 = vld [vmem:[#allocation3 + $0xc78] sm:$0xff]  ;;  %v3144_v43 = vld [vmem:[#allocation3 + $0xc70] sm:$0xff] }
 0xb7e   :  { %v3031_v45 = vpack.c.bf16 %v3027_v31, %v3023_v42  ;;  %v3033_v30 = vpack.c.bf16 %v3029_v14, %v3025_v29  ;;  %v3147_v63 = vld [vmem:[#allocation3 + $0xc88] sm:$0xff]  ;;  %v3149_v44 = vld [vmem:[#allocation3 + $0xc98] sm:$0xff]  ;;  %v3146_v18 = vld [vmem:[#allocation3 + $0xc80] sm:$0xff] }
 0xb7f   :  { %v3148_v20 = vld [vmem:[#allocation3 + $0xc90] sm:$0xff]  ;;  %v3151_v46 = vld [vmem:[#allocation3 + $0xca8] sm:$0xff]  ;;  %v3153_v15 = vld [vmem:[#allocation3 + $0xcb8] sm:$0xff] }
 0xb80   :  { %3217 = vmatprep.mubr.bf16.mxu0 %v3031_v45  ;;  %3303 = vmatprep.mubr.bf16.mxu1 %v3031_v45  ;;  %v3150_v42 = vld [vmem:[#allocation3 + $0xca0] sm:$0xff]  ;;  %v3152_v29 = vld [vmem:[#allocation3 + $0xcb0] sm:$0xff]  ;;  %v3155_v31 = vld [vmem:[#allocation3 + $0xcc8] sm:$0xff] }
 0xb81   :  { %3218 = vmatmul.mubr.bf16.vlgmr.msra.gmra.mrb[40].mxu0 %v3030_v21  ;;  %3304 = vmatmul.mubr.bf16.vlgmr.msra.gmra.mrb[40].mxu1 %v3030_v21  ;;  %v3157_v14 = vld [vmem:[#allocation3 + $0xcd8] sm:$0xff]  ;;  %v3154_v21 = vld [vmem:[#allocation3 + $0xcc0] sm:$0xff]  ;;  %v3156_v45 = vld [vmem:[#allocation3 + $0xcd0] sm:$0xff] }
 0xb82   :  { %3229 = vmatpush1.bf16.msra.mxu0 %v3098_v1  ;;  %3315 = vmatpush1.bf16.msra.mxu1 %v3100_v2  ;;  %v3161_v1 = vld [vmem:[#allocation3 + $0xcf8] sm:$0xff]  ;;  %v3158_v2 = vld [vmem:[#allocation3 + $0xce0] sm:$0xff] }
 0xb83   :  { %3260 = vmatprep.mubr.bf16.mxu0 %v3033_v30  ;;  %3346 = vmatprep.mubr.bf16.mxu1 %v3033_v30  ;;  %v3159_v30 = vld [vmem:[#allocation3 + $0xce8] sm:$0xff] }
 0xb84   :  { %3230 = vmatprep.subr.bf16.mxu0 %v3103_v3  ;;  %3316 = vmatprep.subr.bf16.mxu1 %v3105_v47  ;;  %v3160_v3 = vld [vmem:[#allocation3 + $0xcf0] sm:$0xff]  ;;  %v3370_v47 = vld [vmem:[#allocation3 + $0xd08] sm:$0xff] }
 0xb86   :  { %3231 = vmatpush1.bf16.msra.mxu0 %v3102_v50  ;;  %3317 = vmatpush1.bf16.msra.mxu1 %v3104_v4  ;;  %v3372_v50 = vld [vmem:[#allocation3 + $0xd18] sm:$0xff]  ;;  %v3369_v4 = vld [vmem:[#allocation3 + $0xd00] sm:$0xff] }
 0xb87   :  { %3232 = vmatprep.subr.bf16.mxu0 %v3107_v5  ;;  %3318 = vmatprep.subr.bf16.mxu1 %v3109_v8  ;;  %v3371_v5 = vld [vmem:[#allocation3 + $0xd10] sm:$0xff]  ;;  %v3374_v8 = vld [vmem:[#allocation3 + $0xd28] sm:$0xff] }
 0xb8a   :  { %3233 = vmatpush1.bf16.msra.mxu0 %v3106_v9  ;;  %3319 = vmatpush1.bf16.msra.mxu1 %v3108_v10  ;;  %v3376_v9 = vld [vmem:[#allocation3 + $0xd38] sm:$0xff]  ;;  %v3373_v10 = vld [vmem:[#allocation3 + $0xd20] sm:$0xff] }
 0xb8b   :  { %3234 = vmatprep.subr.bf16.mxu0 %v3111_v11  ;;  %3320 = vmatprep.subr.bf16.mxu1 %v3113_v12  ;;  %v3375_v11 = vld [vmem:[#allocation3 + $0xd30] sm:$0xff]  ;;  %v3378_v12 = vld [vmem:[#allocation3 + $0xd48] sm:$0xff] }
 0xb8e   :  { %3235 = vmatpush1.bf16.msra.mxu0 %v3110_v6  ;;  %3321 = vmatpush1.bf16.msra.mxu1 %v3112_v48  ;;  %v3380_v6 = vld [vmem:[#allocation3 + $0xd58] sm:$0xff]  ;;  %v3377_v48 = vld [vmem:[#allocation3 + $0xd40] sm:$0xff] }
 0xb8f   :  { %3236 = vmatprep.subr.bf16.mxu0 %v3115_v60  ;;  %3322 = vmatprep.subr.bf16.mxu1 %v3117_v61  ;;  %v3379_v60 = vld [vmem:[#allocation3 + $0xd50] sm:$0xff]  ;;  %v3382_v61 = vld [vmem:[#allocation3 + $0xd68] sm:$0xff] }
 0xb92   :  { %3237 = vmatpush1.bf16.msra.mxu0 %v3114_v38  ;;  %3323 = vmatpush1.bf16.msra.mxu1 %v3116_v49  ;;  %v3384_v38 = vld [vmem:[#allocation3 + $0xd78] sm:$0xff]  ;;  %v3383_v49 = vld [vmem:[#allocation3 + $0xd70] sm:$0xff] }
 0xb93   :  { %3238 = vmatprep.subr.bf16.mxu0 %v3119_v33  ;;  %3324 = vmatprep.subr.bf16.mxu1 %v3121_v39  ;;  %v3386_v33 = vld [vmem:[#allocation3 + $0xd88] sm:$0xff]  ;;  %v3388_v39 = vld [vmem:[#allocation3 + $0xd98] sm:$0xff] }
 0xb96   :  { %3239 = vmatpush1.bf16.msra.mxu0 %v3118_v55  ;;  %3325 = vmatpush1.bf16.msra.mxu1 %v3120_v36  ;;  %v3385_v55 = vld [vmem:[#allocation3 + $0xd80] sm:$0xff]  ;;  %v3387_v36 = vld [vmem:[#allocation3 + $0xd90] sm:$0xff] }
 0xb97   :  { %3240 = vmatprep.subr.bf16.mxu0 %v3123_v52  ;;  %3326 = vmatprep.subr.bf16.mxu1 %v3125_v54  ;;  %v3390_v52 = vld [vmem:[#allocation3 + $0xda8] sm:$0xff]  ;;  %v3392_v54 = vld [vmem:[#allocation3 + $0xdb8] sm:$0xff] }
 0xb9a   :  { %3241 = vmatpush1.bf16.msra.mxu0 %v3122_v32  ;;  %3327 = vmatpush1.bf16.msra.mxu1 %v3124_v7  ;;  %v3389_v32 = vld [vmem:[#allocation3 + $0xda0] sm:$0xff]  ;;  %v3391_v7 = vld [vmem:[#allocation3 + $0xdb0] sm:$0xff] }
 0xb9b   :  { %3242 = vmatprep.subr.bf16.mxu0 %v3127_v56  ;;  %3328 = vmatprep.subr.bf16.mxu1 %v3129_v57  ;;  %v3394_v56 = vld [vmem:[#allocation3 + $0xdc8] sm:$0xff]  ;;  %v3396_v57 = vld [vmem:[#allocation3 + $0xdd8] sm:$0xff] }
 0xb9e   :  { %3243 = vmatpush1.bf16.msra.mxu0 %v3126_v58  ;;  %3329 = vmatpush1.bf16.msra.mxu1 %v3128_v59  ;;  %v3393_v58 = vld [vmem:[#allocation3 + $0xdc0] sm:$0xff]  ;;  %v3395_v59 = vld [vmem:[#allocation3 + $0xdd0] sm:$0xff] }
 0xb9f   :  { %3244 = vmatprep.subr.bf16.mxu0 %v3131_v40  ;;  %3330 = vmatprep.subr.bf16.mxu1 %v3133_v27  ;;  %v3398_v40 = vld [vmem:[#allocation3 + $0xde8] sm:$0xff]  ;;  %v3400_v27 = vld [vmem:[#allocation3 + $0xdf8] sm:$0xff] }
 0xba2   :  { %3245 = vmatpush1.bf16.msra.mxu0 %v3130_v62  ;;  %3331 = vmatpush1.bf16.msra.mxu1 %v3132_v22  ;;  %v3397_v62 = vld [vmem:[#allocation3 + $0xde0] sm:$0xff]  ;;  %v3399_v22 = vld [vmem:[#allocation3 + $0xdf0] sm:$0xff] }
 0xba3   :  { %3246 = vmatprep.subr.bf16.mxu0 %v3135_v19  ;;  %3332 = vmatprep.subr.bf16.mxu1 %v3137_v17  ;;  %v3402_v19 = vld [vmem:[#allocation3 + $0xe08] sm:$0xff]  ;;  %v3404_v17 = vld [vmem:[#allocation3 + $0xe18] sm:$0xff] }
 0xba6   :  { %3247 = vmatpush1.bf16.msra.mxu0 %v3134_v23  ;;  %3333 = vmatpush1.bf16.msra.mxu1 %v3136_v51  ;;  %v3401_v23 = vld [vmem:[#allocation3 + $0xe00] sm:$0xff]  ;;  %v3403_v51 = vld [vmem:[#allocation3 + $0xe10] sm:$0xff] }
 0xba7   :  { %3248 = vmatprep.subr.bf16.mxu0 %v3139_v24  ;;  %3334 = vmatprep.subr.bf16.mxu1 %v3141_v25  ;;  %v3406_v24 = vld [vmem:[#allocation3 + $0xe28] sm:$0xff]  ;;  %v3408_v25 = vld [vmem:[#allocation3 + $0xe38] sm:$0xff] }
 0xbaa   :  { %3249 = vmatpush1.bf16.msra.mxu0 %v3138_v28  ;;  %3335 = vmatpush1.bf16.msra.mxu1 %v3140_v26  ;;  %v3405_v28 = vld [vmem:[#allocation3 + $0xe20] sm:$0xff]  ;;  %v3407_v26 = vld [vmem:[#allocation3 + $0xe30] sm:$0xff] }
 0xbab   :  { %3250 = vmatprep.subr.bf16.mxu0 %v3143_v13  ;;  %3336 = vmatprep.subr.bf16.mxu1 %v3145_v16  ;;  %v3410_v13 = vld [vmem:[#allocation3 + $0xe48] sm:$0xff]  ;;  %v3412_v16 = vld [vmem:[#allocation3 + $0xe58] sm:$0xff] }
 0xbae   :  { %3251 = vmatpush1.bf16.msra.mxu0 %v3142_v34  ;;  %3337 = vmatpush1.bf16.msra.mxu1 %v3144_v43  ;;  %v3409_v34 = vld [vmem:[#allocation3 + $0xe40] sm:$0xff]  ;;  %v3411_v43 = vld [vmem:[#allocation3 + $0xe50] sm:$0xff] }
 0xbaf   :  { %3252 = vmatprep.subr.bf16.mxu0 %v3147_v63  ;;  %3338 = vmatprep.subr.bf16.mxu1 %v3149_v44  ;;  %v3414_v63 = vld [vmem:[#allocation3 + $0xe68] sm:$0xff]  ;;  %v3416_v44 = vld [vmem:[#allocation3 + $0xe78] sm:$0xff] }
 0xbb2   :  { %3253 = vmatpush1.bf16.msra.mxu0 %v3146_v18  ;;  %3339 = vmatpush1.bf16.msra.mxu1 %v3148_v20  ;;  %v3413_v18 = vld [vmem:[#allocation3 + $0xe60] sm:$0xff]  ;;  %v3415_v20 = vld [vmem:[#allocation3 + $0xe70] sm:$0xff] }
 0xbb3   :  { %3254 = vmatprep.subr.bf16.mxu0 %v3151_v46  ;;  %3340 = vmatprep.subr.bf16.mxu1 %v3153_v15  ;;  %v3418_v46 = vld [vmem:[#allocation3 + $0xe88] sm:$0xff]  ;;  %v3420_v15 = vld [vmem:[#allocation3 + $0xe98] sm:$0xff] }
 0xbb6   :  { %3255 = vmatpush1.bf16.msra.mxu0 %v3150_v42  ;;  %3341 = vmatpush1.bf16.msra.mxu1 %v3152_v29  ;;  %v3417_v42 = vld [vmem:[#allocation3 + $0xe80] sm:$0xff]  ;;  %v3419_v29 = vld [vmem:[#allocation3 + $0xe90] sm:$0xff] }
 0xbb7   :  { %3256 = vmatprep.subr.bf16.mxu0 %v3155_v31  ;;  %3342 = vmatprep.subr.bf16.mxu1 %v3157_v14  ;;  %v3422_v31 = vld [vmem:[#allocation3 + $0xea8] sm:$0xff]  ;;  %v3424_v14 = vld [vmem:[#allocation3 + $0xeb8] sm:$0xff] }
 0xbba   :  { %3257 = vmatpush1.bf16.msra.mxu0 %v3154_v21  ;;  %3343 = vmatpush1.bf16.msra.mxu1 %v3156_v45  ;;  %v3421_v21 = vld [vmem:[#allocation3 + $0xea0] sm:$0xff]  ;;  %v3423_v45 = vld [vmem:[#allocation3 + $0xeb0] sm:$0xff] }
 0xbbb   :  { %3258 = vmatprep.subr.bf16.mxu0 %v3159_v30  ;;  %3344 = vmatprep.subr.bf16.mxu1 %v3161_v1  ;;  %v3426_v30 = vld [vmem:[#allocation3 + $0xec8] sm:$0xff]  ;;  %v3428_v1 = vld [vmem:[#allocation3 + $0xed8] sm:$0xff] }
 0xbbe   :  { %3259 = vmatpush1.bf16.msra.mxu0 %v3158_v2  ;;  %3345 = vmatpush1.bf16.msra.mxu1 %v3160_v3  ;;  %v3425_v2 = vld [vmem:[#allocation3 + $0xec0] sm:$0xff]  ;;  %v3427_v3 = vld [vmem:[#allocation3 + $0xed0] sm:$0xff] }
 0xbbf   :  { %3520 = vmatprep.subr.bf16.mxu0 %v3370_v47  ;;  %3606 = vmatprep.subr.bf16.mxu1 %v3372_v50  ;;  %v3430_v47 = vld [vmem:[#allocation3 + $0xee8] sm:$0xff]  ;;  %v3432_v50 = vld [vmem:[#allocation3 + $0xef8] sm:$0xff] }
 0xbc1   :  { %3261 = vmatmul.mubr.bf16.vlgmr.msra.gmra.mrb[40].mxu0 %v5846_v0  ;;  %3347 = vmatmul.mubr.bf16.vlgmr.msra.gmra.mrb[40].mxu1 %v5846_v0  ;;  %v3381_v0 = vld [vmem:[#allocation3 + $0xd60] sm:$0xff] }
 0xbc2   :  { %3521 = vmatpush1.bf16.msra.mxu0 %v3369_v4  ;;  %3607 = vmatpush1.bf16.msra.mxu1 %v3371_v5  ;;  %v3429_v4 = vld [vmem:[#allocation3 + $0xee0] sm:$0xff]  ;;  %v3431_v5 = vld [vmem:[#allocation3 + $0xef0] sm:$0xff] }
 0xbc3   :  { %3522 = vmatprep.subr.bf16.mxu0 %v3374_v8  ;;  %3608 = vmatprep.subr.bf16.mxu1 %v3376_v9  ;;  %v3434_v8 = vld [vmem:[#allocation3 + $0xf08] sm:$0xff]  ;;  %v3436_v9 = vld [vmem:[#allocation3 + $0xf18] sm:$0xff] }
 0xbc6   :  { %3523 = vmatpush1.bf16.msra.mxu0 %v3373_v10  ;;  %3609 = vmatpush1.bf16.msra.mxu1 %v3375_v11  ;;  %v3163_v10 = vld [vmem:[#allocation9 + $0x3] ss:$8 sm:$0xf] }
 0xbc7   :  { %3524 = vmatprep.subr.bf16.mxu0 %v3378_v12  ;;  %3610 = vmatprep.subr.bf16.mxu1 %v3380_v6  ;;  %v3168_v11 = vrot.slane %v3163_v10, %v5408_v35  ;;  %v3176_v12 = vrot.slane %v3163_v10, %v5418_v41  ;;  %v3172_v6 = vrot.slane %v3163_v10, %v5410_v37 }
 0xbca   :  { %3525 = vmatpush1.bf16.msra.mxu0 %v3377_v48  ;;  %3611 = vmatpush1.bf16.msra.mxu1 %v3379_v60  ;;  %v3180_v48 = vrot.slane %v3163_v10, %v5422_v53  ;;  %v3464_v10 = vld [vmem:[#allocation3 + $0xff8] sm:$0xff] }
 0xbcb   :  { %3526 = vmatprep.subr.bf16.mxu0 %v3382_v61  ;;  %3612 = vmatprep.subr.bf16.mxu1 %v3384_v38 }
 0xbce   :  { %3527 = vmatpush1.bf16.msra.mxu0 %v3381_v0  ;;  %3613 = vmatpush1.bf16.msra.mxu1 %v3383_v49 }
 0xbcf   :  { %3528 = vmatprep.subr.bf16.mxu0 %v3386_v33  ;;  %3614 = vmatprep.subr.bf16.mxu1 %v3388_v39 }
 0xbd2   :  { %3529 = vmatpush1.bf16.msra.mxu0 %v3385_v55  ;;  %3615 = vmatpush1.bf16.msra.mxu1 %v3387_v36 }
 0xbd3   :  { %3530 = vmatprep.subr.bf16.mxu0 %v3390_v52  ;;  %3616 = vmatprep.subr.bf16.mxu1 %v3392_v54 }
 0xbd6   :  { %3531 = vmatpush1.bf16.msra.mxu0 %v3389_v32  ;;  %3617 = vmatpush1.bf16.msra.mxu1 %v3391_v7 }
 0xbd7   :  { %3532 = vmatprep.subr.bf16.mxu0 %v3394_v56  ;;  %3618 = vmatprep.subr.bf16.mxu1 %v3396_v57 }
 0xbda   :  { %3533 = vmatpush1.bf16.msra.mxu0 %v3393_v58  ;;  %3619 = vmatpush1.bf16.msra.mxu1 %v3395_v59 }
 0xbdb   :  { %3534 = vmatprep.subr.bf16.mxu0 %v3398_v40  ;;  %3620 = vmatprep.subr.bf16.mxu1 %v3400_v27 }
 0xbde   :  { %3535 = vmatpush1.bf16.msra.mxu0 %v3397_v62  ;;  %3621 = vmatpush1.bf16.msra.mxu1 %v3399_v22 }
 0xbdf   :  { %3536 = vmatprep.subr.bf16.mxu0 %v3402_v19  ;;  %3622 = vmatprep.subr.bf16.mxu1 %v3404_v17 }
 0xbe2   :  { %3537 = vmatpush1.bf16.msra.mxu0 %v3401_v23  ;;  %3623 = vmatpush1.bf16.msra.mxu1 %v3403_v51 }
 0xbe3   :  { %3538 = vmatprep.subr.bf16.mxu0 %v3406_v24  ;;  %3624 = vmatprep.subr.bf16.mxu1 %v3408_v25 }
 0xbe6   :  { %3539 = vmatpush1.bf16.msra.mxu0 %v3405_v28  ;;  %3625 = vmatpush1.bf16.msra.mxu1 %v3407_v26  ;;  %v3433_v26 = vld [vmem:[#allocation3 + $0xf00] sm:$0xff] }
 0xbe7   :  { %3540 = vmatprep.subr.bf16.mxu0 %v3410_v13  ;;  %3626 = vmatprep.subr.bf16.mxu1 %v3412_v16  ;;  %v3435_v13 = vld [vmem:[#allocation3 + $0xf10] sm:$0xff]  ;;  %v3438_v16 = vld [vmem:[#allocation3 + $0xf28] sm:$0xff] }
 0xbea   :  { %3541 = vmatpush1.bf16.msra.mxu0 %v3409_v34  ;;  %3627 = vmatpush1.bf16.msra.mxu1 %v3411_v43  ;;  %v3440_v34 = vld [vmem:[#allocation3 + $0xf38] sm:$0xff]  ;;  %v3437_v43 = vld [vmem:[#allocation3 + $0xf20] sm:$0xff] }
 0xbeb   :  { %3542 = vmatprep.subr.bf16.mxu0 %v3414_v63  ;;  %3628 = vmatprep.subr.bf16.mxu1 %v3416_v44  ;;  %v3439_v63 = vld [vmem:[#allocation3 + $0xf30] sm:$0xff]  ;;  %v3442_v44 = vld [vmem:[#allocation3 + $0xf48] sm:$0xff] }
 0xbee   :  { %3543 = vmatpush1.bf16.msra.mxu0 %v3413_v18  ;;  %3629 = vmatpush1.bf16.msra.mxu1 %v3415_v20  ;;  %v3444_v18 = vld [vmem:[#allocation3 + $0xf58] sm:$0xff]  ;;  %v3441_v20 = vld [vmem:[#allocation3 + $0xf40] sm:$0xff] }
 0xbef   :  { %3544 = vmatprep.subr.bf16.mxu0 %v3418_v46  ;;  %3630 = vmatprep.subr.bf16.mxu1 %v3420_v15  ;;  %v3443_v46 = vld [vmem:[#allocation3 + $0xf50] sm:$0xff]  ;;  %v3446_v15 = vld [vmem:[#allocation3 + $0xf68] sm:$0xff] }
 0xbf2   :  { %3545 = vmatpush1.bf16.msra.mxu0 %v3417_v42  ;;  %3631 = vmatpush1.bf16.msra.mxu1 %v3419_v29  ;;  %v3448_v42 = vld [vmem:[#allocation3 + $0xf78] sm:$0xff]  ;;  %v3445_v29 = vld [vmem:[#allocation3 + $0xf60] sm:$0xff] }
 0xbf3   :  { %3546 = vmatprep.subr.bf16.mxu0 %v3422_v31  ;;  %3632 = vmatprep.subr.bf16.mxu1 %v3424_v14  ;;  %v3447_v31 = vld [vmem:[#allocation3 + $0xf70] sm:$0xff]  ;;  %v3450_v14 = vld [vmem:[#allocation3 + $0xf88] sm:$0xff] }
 0xbf6   :  { %3547 = vmatpush1.bf16.msra.mxu0 %v3421_v21  ;;  %3633 = vmatpush1.bf16.msra.mxu1 %v3423_v45  ;;  %v3452_v21 = vld [vmem:[#allocation3 + $0xf98] sm:$0xff]  ;;  %v3449_v45 = vld [vmem:[#allocation3 + $0xf80] sm:$0xff] }
 0xbf7   :  { %3548 = vmatprep.subr.bf16.mxu0 %v3426_v30  ;;  %3634 = vmatprep.subr.bf16.mxu1 %v3428_v1  ;;  %v3451_v30 = vld [vmem:[#allocation3 + $0xf90] sm:$0xff]  ;;  %v3454_v1 = vld [vmem:[#allocation3 + $0xfa8] sm:$0xff] }
 0xbfa   :  { %3549 = vmatpush1.bf16.msra.mxu0 %v3425_v2  ;;  %3635 = vmatpush1.bf16.msra.mxu1 %v3427_v3  ;;  %v3456_v2 = vld [vmem:[#allocation3 + $0xfb8] sm:$0xff]  ;;  %v3453_v3 = vld [vmem:[#allocation3 + $0xfa0] sm:$0xff] }
 0xbfb   :  { %3550 = vmatprep.subr.bf16.mxu0 %v3430_v47  ;;  %3636 = vmatprep.subr.bf16.mxu1 %v3432_v50  ;;  %v3455_v47 = vld [vmem:[#allocation3 + $0xfb0] sm:$0xff]  ;;  %v3458_v50 = vld [vmem:[#allocation3 + $0xfc8] sm:$0xff] }
 0xbfe   :  { %3551 = vmatpush1.bf16.msra.mxu0 %v3429_v4  ;;  %3637 = vmatpush1.bf16.msra.mxu1 %v3431_v5  ;;  %v3460_v4 = vld [vmem:[#allocation3 + $0xfd8] sm:$0xff]  ;;  %v3457_v5 = vld [vmem:[#allocation3 + $0xfc0] sm:$0xff] }
 0xbff   :  { %3563 = vmatprep.subr.bf16.mxu0 %v3434_v8  ;;  %3649 = vmatprep.subr.bf16.mxu1 %v3436_v9  ;;  %v3459_v8 = vld [vmem:[#allocation3 + $0xfd0] sm:$0xff]  ;;  %v3462_v9 = vld [vmem:[#allocation3 + $0xfe8] sm:$0xff] }
 0xc94   :  { %v3262_v60 = vpop.f32.mrb[40].mxu0  ;;  %v3348_v61 = vpop.f32.mrb[40].mxu1 }
 0xc95   :  { %v4456_v38 = vadd.f32 %v3262_v60, %v3168_v11  ;;  %v4460_v0 = vadd.f32 %v3348_v61, %v3176_v12  ;;  %v3264_v49 = vpop.f32.mrb[41].mxu0  ;;  %v3350_v33 = vpop.f32.mrb[41].mxu1  ;;  %v3465_v60 = vld [vmem:[#allocation3 + $0x1000] sm:$0xff]  ;;  %v3467_v61 = vld [vmem:[#allocation3 + $0x1010] sm:$0xff] }
 0xc96   :  { %v4457_v39 = vadd.f32 %v3264_v49, %v3172_v6  ;;  %v4461_v55 = vadd.f32 %v3350_v33, %v3180_v48  ;;  %v3266_v36 = vpop.f32.mrb[42].mxu0  ;;  %v3352_v52 = vpop.f32.mrb[42].mxu1  ;;  %v3469_v49 = vld [vmem:[#allocation3 + $0x1020] sm:$0xff]  ;;  %v3471_v33 = vld [vmem:[#allocation3 + $0x1030] sm:$0xff] }
 0xc97   :  { %v4458_v54 = vadd.f32 %v3266_v36, %v3168_v11  ;;  %v4462_v32 = vadd.f32 %v3352_v52, %v3176_v12  ;;  %v3268_v7 = vpop.f32.mrb[43].mxu0  ;;  %v3354_v56 = vpop.f32.mrb[43].mxu1  ;;  %v3357_v59 = vmax.f32 %v4456_v38, 0.0  ;;  %v3359_v40 = vmax.f32 %v4460_v0, 0.0  ;;  %v3461_v11 = vld [vmem:[#allocation3 + $0xfe0] sm:$0xff]  ;;  %v3463_v12 = vld [vmem:[#allocation3 + $0xff0] sm:$0xff] }
 0xc98   :  { %v4459_v57 = vadd.f32 %v3268_v7, %v3172_v6  ;;  %v4463_v58 = vadd.f32 %v3354_v56, %v3180_v48  ;;  %v3358_v22 = vmax.f32 %v4457_v39, 0.0  ;;  %v3360_v19 = vmax.f32 %v4461_v55, 0.0  ;;  %v3466_v6 = vld [vmem:[#allocation3 + $0x1008] sm:$0xff]  ;;  %v3468_v48 = vld [vmem:[#allocation3 + $0x1018] sm:$0xff]  ;;  %v3473_v36 = vld [vmem:[#allocation3 + $0x1040] sm:$0xff] }
 0xc99   :  { %v3361_v27 = vmax.f32 %v4458_v54, 0.0  ;;  %v3363_v62 = vmax.f32 %v4462_v32, 0.0  ;;  %v3470_v38 = vld [vmem:[#allocation3 + $0x1028] sm:$0xff]  ;;  %v3472_v0 = vld [vmem:[#allocation3 + $0x1038] sm:$0xff]  ;;  %v3475_v52 = vld [vmem:[#allocation3 + $0x1050] sm:$0xff] }
 0xc9a   :  { %v3362_v17 = vmax.f32 %v4459_v57, 0.0  ;;  %v3364_v23 = vmax.f32 %v4463_v58, 0.0  ;;  %v3474_v39 = vld [vmem:[#allocation3 + $0x1048] sm:$0xff]  ;;  %v3476_v55 = vld [vmem:[#allocation3 + $0x1058] sm:$0xff]  ;;  %v3477_v7 = vld [vmem:[#allocation3 + $0x1060] sm:$0xff] }
 0xc9b   :  { %v3365_v51 = vpack.c.bf16 %v3361_v27, %v3357_v59  ;;  %v5854_v24 = vpack.c.bf16 %v3363_v62, %v3359_v40  ;;  %v3478_v54 = vld [vmem:[#allocation3 + $0x1068] sm:$0xff]  ;;  %v3480_v32 = vld [vmem:[#allocation3 + $0x1078] sm:$0xff]  ;;  %v3479_v56 = vld [vmem:[#allocation3 + $0x1070] sm:$0xff] }
 0xc9c   :  { %v3366_v25 = vpack.c.bf16 %v3362_v17, %v3358_v22  ;;  %v3368_v28 = vpack.c.bf16 %v3364_v23, %v3360_v19  ;;  %v3482_v57 = vld [vmem:[#allocation3 + $0x1088] sm:$0xff]  ;;  %v3484_v58 = vld [vmem:[#allocation3 + $0x1098] sm:$0xff]  ;;  %v3481_v59 = vld [vmem:[#allocation3 + $0x1080] sm:$0xff] }
 0xc9d   :  { %v3483_v40 = vld [vmem:[#allocation3 + $0x1090] sm:$0xff]  ;;  %v3486_v27 = vld [vmem:[#allocation3 + $0x10a8] sm:$0xff]  ;;  %v3488_v62 = vld [vmem:[#allocation3 + $0x10b8] sm:$0xff] }
 0xc9e   :  { %3552 = vmatprep.mubr.bf16.mxu0 %v3366_v25  ;;  %3638 = vmatprep.mubr.bf16.mxu1 %v3366_v25  ;;  %v3485_v22 = vld [vmem:[#allocation3 + $0x10a0] sm:$0xff]  ;;  %v3487_v19 = vld [vmem:[#allocation3 + $0x10b0] sm:$0xff]  ;;  %v3490_v17 = vld [vmem:[#allocation3 + $0x10c8] sm:$0xff] }
 0xc9f   :  { %3553 = vmatmul.mubr.bf16.vlgmr.msra.gmra.mrb[44].mxu0 %v3365_v51  ;;  %3639 = vmatmul.mubr.bf16.vlgmr.msra.gmra.mrb[44].mxu1 %v3365_v51  ;;  %v3492_v23 = vld [vmem:[#allocation3 + $0x10d8] sm:$0xff]  ;;  %v3489_v51 = vld [vmem:[#allocation3 + $0x10c0] sm:$0xff]  ;;  %v3491_v25 = vld [vmem:[#allocation3 + $0x10d0] sm:$0xff] }
 0xca0   :  { %3564 = vmatpush1.bf16.msra.mxu0 %v3433_v26  ;;  %3650 = vmatpush1.bf16.msra.mxu1 %v3435_v13  ;;  %v3496_v26 = vld [vmem:[#allocation3 + $0x10f8] sm:$0xff]  ;;  %v3493_v13 = vld [vmem:[#allocation3 + $0x10e0] sm:$0xff] }
 0xca1   :  { %3595 = vmatprep.mubr.bf16.mxu0 %v3368_v28  ;;  %3681 = vmatprep.mubr.bf16.mxu1 %v3368_v28  ;;  %v3494_v28 = vld [vmem:[#allocation3 + $0x10e8] sm:$0xff] }
 0xca2   :  { %3565 = vmatprep.subr.bf16.mxu0 %v3438_v16  ;;  %3651 = vmatprep.subr.bf16.mxu1 %v3440_v34  ;;  %v3495_v16 = vld [vmem:[#allocation3 + $0x10f0] sm:$0xff]  ;;  %v3705_v34 = vld [vmem:[#allocation3 + $0x1108] sm:$0xff] }
 0xca4   :  { %3566 = vmatpush1.bf16.msra.mxu0 %v3437_v43  ;;  %3652 = vmatpush1.bf16.msra.mxu1 %v3439_v63  ;;  %v3707_v43 = vld [vmem:[#allocation3 + $0x1118] sm:$0xff]  ;;  %v3704_v63 = vld [vmem:[#allocation3 + $0x1100] sm:$0xff] }
 0xca5   :  { %3567 = vmatprep.subr.bf16.mxu0 %v3442_v44  ;;  %3653 = vmatprep.subr.bf16.mxu1 %v3444_v18  ;;  %v3706_v44 = vld [vmem:[#allocation3 + $0x1110] sm:$0xff]  ;;  %v3709_v18 = vld [vmem:[#allocation3 + $0x1128] sm:$0xff] }
 0xca8   :  { %3568 = vmatpush1.bf16.msra.mxu0 %v3441_v20  ;;  %3654 = vmatpush1.bf16.msra.mxu1 %v3443_v46  ;;  %v3711_v20 = vld [vmem:[#allocation3 + $0x1138] sm:$0xff]  ;;  %v3708_v46 = vld [vmem:[#allocation3 + $0x1120] sm:$0xff] }
 0xca9   :  { %3569 = vmatprep.subr.bf16.mxu0 %v3446_v15  ;;  %3655 = vmatprep.subr.bf16.mxu1 %v3448_v42  ;;  %v3710_v15 = vld [vmem:[#allocation3 + $0x1130] sm:$0xff]  ;;  %v3713_v42 = vld [vmem:[#allocation3 + $0x1148] sm:$0xff] }
 0xcac   :  { %3570 = vmatpush1.bf16.msra.mxu0 %v3445_v29  ;;  %3656 = vmatpush1.bf16.msra.mxu1 %v3447_v31  ;;  %v3715_v29 = vld [vmem:[#allocation3 + $0x1158] sm:$0xff]  ;;  %v3712_v31 = vld [vmem:[#allocation3 + $0x1140] sm:$0xff] }
 0xcad   :  { %3571 = vmatprep.subr.bf16.mxu0 %v3450_v14  ;;  %3657 = vmatprep.subr.bf16.mxu1 %v3452_v21  ;;  %v3714_v14 = vld [vmem:[#allocation3 + $0x1150] sm:$0xff]  ;;  %v3717_v21 = vld [vmem:[#allocation3 + $0x1168] sm:$0xff] }
 0xcb0   :  { %3572 = vmatpush1.bf16.msra.mxu0 %v3449_v45  ;;  %3658 = vmatpush1.bf16.msra.mxu1 %v3451_v30  ;;  %v3719_v45 = vld [vmem:[#allocation3 + $0x1178] sm:$0xff]  ;;  %v3718_v30 = vld [vmem:[#allocation3 + $0x1170] sm:$0xff] }
 0xcb1   :  { %3573 = vmatprep.subr.bf16.mxu0 %v3454_v1  ;;  %3659 = vmatprep.subr.bf16.mxu1 %v3456_v2  ;;  %v3721_v1 = vld [vmem:[#allocation3 + $0x1188] sm:$0xff]  ;;  %v3723_v2 = vld [vmem:[#allocation3 + $0x1198] sm:$0xff] }
 0xcb4   :  { %3574 = vmatpush1.bf16.msra.mxu0 %v3453_v3  ;;  %3660 = vmatpush1.bf16.msra.mxu1 %v3455_v47  ;;  %v3720_v3 = vld [vmem:[#allocation3 + $0x1180] sm:$0xff]  ;;  %v3722_v47 = vld [vmem:[#allocation3 + $0x1190] sm:$0xff] }
 0xcb5   :  { %3575 = vmatprep.subr.bf16.mxu0 %v3458_v50  ;;  %3661 = vmatprep.subr.bf16.mxu1 %v3460_v4  ;;  %v3725_v50 = vld [vmem:[#allocation3 + $0x11a8] sm:$0xff]  ;;  %v3727_v4 = vld [vmem:[#allocation3 + $0x11b8] sm:$0xff] }
 0xcb8   :  { %3576 = vmatpush1.bf16.msra.mxu0 %v3457_v5  ;;  %3662 = vmatpush1.bf16.msra.mxu1 %v3459_v8  ;;  %v3724_v5 = vld [vmem:[#allocation3 + $0x11a0] sm:$0xff]  ;;  %v3726_v8 = vld [vmem:[#allocation3 + $0x11b0] sm:$0xff] }
 0xcb9   :  { %3577 = vmatprep.subr.bf16.mxu0 %v3462_v9  ;;  %3663 = vmatprep.subr.bf16.mxu1 %v3464_v10  ;;  %v3729_v9 = vld [vmem:[#allocation3 + $0x11c8] sm:$0xff]  ;;  %v3731_v10 = vld [vmem:[#allocation3 + $0x11d8] sm:$0xff] }
 0xcbc   :  { %3578 = vmatpush1.bf16.msra.mxu0 %v3461_v11  ;;  %3664 = vmatpush1.bf16.msra.mxu1 %v3463_v12  ;;  %v3728_v11 = vld [vmem:[#allocation3 + $0x11c0] sm:$0xff]  ;;  %v3730_v12 = vld [vmem:[#allocation3 + $0x11d0] sm:$0xff] }
 0xcbd   :  { %3579 = vmatprep.subr.bf16.mxu0 %v3466_v6  ;;  %3665 = vmatprep.subr.bf16.mxu1 %v3468_v48  ;;  %v3733_v6 = vld [vmem:[#allocation3 + $0x11e8] sm:$0xff]  ;;  %v3735_v48 = vld [vmem:[#allocation3 + $0x11f8] sm:$0xff] }
 0xcc0   :  { %3580 = vmatpush1.bf16.msra.mxu0 %v3465_v60  ;;  %3666 = vmatpush1.bf16.msra.mxu1 %v3467_v61  ;;  %v3732_v60 = vld [vmem:[#allocation3 + $0x11e0] sm:$0xff]  ;;  %v3734_v61 = vld [vmem:[#allocation3 + $0x11f0] sm:$0xff] }
 0xcc1   :  { %3581 = vmatprep.subr.bf16.mxu0 %v3470_v38  ;;  %3667 = vmatprep.subr.bf16.mxu1 %v3472_v0  ;;  %v3737_v38 = vld [vmem:[#allocation3 + $0x1208] sm:$0xff]  ;;  %v3739_v0 = vld [vmem:[#allocation3 + $0x1218] sm:$0xff] }
 0xcc4   :  { %3582 = vmatpush1.bf16.msra.mxu0 %v3469_v49  ;;  %3668 = vmatpush1.bf16.msra.mxu1 %v3471_v33  ;;  %v3736_v49 = vld [vmem:[#allocation3 + $0x1200] sm:$0xff]  ;;  %v3738_v33 = vld [vmem:[#allocation3 + $0x1210] sm:$0xff] }
 0xcc5   :  { %3583 = vmatprep.subr.bf16.mxu0 %v3474_v39  ;;  %3669 = vmatprep.subr.bf16.mxu1 %v3476_v55  ;;  %v3741_v39 = vld [vmem:[#allocation3 + $0x1228] sm:$0xff]  ;;  %v3743_v55 = vld [vmem:[#allocation3 + $0x1238] sm:$0xff] }
 0xcc8   :  { %3584 = vmatpush1.bf16.msra.mxu0 %v3473_v36  ;;  %3670 = vmatpush1.bf16.msra.mxu1 %v3475_v52  ;;  %v3740_v36 = vld [vmem:[#allocation3 + $0x1220] sm:$0xff]  ;;  %v3742_v52 = vld [vmem:[#allocation3 + $0x1230] sm:$0xff] }
 0xcc9   :  { %3585 = vmatprep.subr.bf16.mxu0 %v3478_v54  ;;  %3671 = vmatprep.subr.bf16.mxu1 %v3480_v32  ;;  %v3745_v54 = vld [vmem:[#allocation3 + $0x1248] sm:$0xff]  ;;  %v3747_v32 = vld [vmem:[#allocation3 + $0x1258] sm:$0xff] }
 0xccc   :  { %3586 = vmatpush1.bf16.msra.mxu0 %v3477_v7  ;;  %3672 = vmatpush1.bf16.msra.mxu1 %v3479_v56  ;;  %v3744_v7 = vld [vmem:[#allocation3 + $0x1240] sm:$0xff]  ;;  %v3746_v56 = vld [vmem:[#allocation3 + $0x1250] sm:$0xff] }
 0xccd   :  { %3587 = vmatprep.subr.bf16.mxu0 %v3482_v57  ;;  %3673 = vmatprep.subr.bf16.mxu1 %v3484_v58  ;;  %v3749_v57 = vld [vmem:[#allocation3 + $0x1268] sm:$0xff]  ;;  %v3751_v58 = vld [vmem:[#allocation3 + $0x1278] sm:$0xff] }
 0xcd0   :  { %3588 = vmatpush1.bf16.msra.mxu0 %v3481_v59  ;;  %3674 = vmatpush1.bf16.msra.mxu1 %v3483_v40  ;;  %v3748_v59 = vld [vmem:[#allocation3 + $0x1260] sm:$0xff]  ;;  %v3750_v40 = vld [vmem:[#allocation3 + $0x1270] sm:$0xff] }
 0xcd1   :  { %3589 = vmatprep.subr.bf16.mxu0 %v3486_v27  ;;  %3675 = vmatprep.subr.bf16.mxu1 %v3488_v62  ;;  %v3753_v27 = vld [vmem:[#allocation3 + $0x1288] sm:$0xff]  ;;  %v3755_v62 = vld [vmem:[#allocation3 + $0x1298] sm:$0xff] }
 0xcd4   :  { %3590 = vmatpush1.bf16.msra.mxu0 %v3485_v22  ;;  %3676 = vmatpush1.bf16.msra.mxu1 %v3487_v19  ;;  %v3752_v22 = vld [vmem:[#allocation3 + $0x1280] sm:$0xff]  ;;  %v3754_v19 = vld [vmem:[#allocation3 + $0x1290] sm:$0xff] }
 0xcd5   :  { %3591 = vmatprep.subr.bf16.mxu0 %v3490_v17  ;;  %3677 = vmatprep.subr.bf16.mxu1 %v3492_v23  ;;  %v3757_v17 = vld [vmem:[#allocation3 + $0x12a8] sm:$0xff]  ;;  %v3759_v23 = vld [vmem:[#allocation3 + $0x12b8] sm:$0xff] }
 0xcd8   :  { %3592 = vmatpush1.bf16.msra.mxu0 %v3489_v51  ;;  %3678 = vmatpush1.bf16.msra.mxu1 %v3491_v25  ;;  %v3756_v51 = vld [vmem:[#allocation3 + $0x12a0] sm:$0xff]  ;;  %v3758_v25 = vld [vmem:[#allocation3 + $0x12b0] sm:$0xff] }
 0xcd9   :  { %3593 = vmatprep.subr.bf16.mxu0 %v3494_v28  ;;  %3679 = vmatprep.subr.bf16.mxu1 %v3496_v26  ;;  %v3761_v28 = vld [vmem:[#allocation3 + $0x12c8] sm:$0xff]  ;;  %v3763_v26 = vld [vmem:[#allocation3 + $0x12d8] sm:$0xff] }
 0xcdc   :  { %3594 = vmatpush1.bf16.msra.mxu0 %v3493_v13  ;;  %3680 = vmatpush1.bf16.msra.mxu1 %v3495_v16  ;;  %v3760_v13 = vld [vmem:[#allocation3 + $0x12c0] sm:$0xff]  ;;  %v3762_v16 = vld [vmem:[#allocation3 + $0x12d0] sm:$0xff] }
 0xcdd   :  { %3855 = vmatprep.subr.bf16.mxu0 %v3705_v34  ;;  %3941 = vmatprep.subr.bf16.mxu1 %v3707_v43  ;;  %v3765_v34 = vld [vmem:[#allocation3 + $0x12e8] sm:$0xff]  ;;  %v3767_v43 = vld [vmem:[#allocation3 + $0x12f8] sm:$0xff] }
 0xcdf   :  { %3596 = vmatmul.mubr.bf16.vlgmr.msra.gmra.mrb[44].mxu0 %v5854_v24  ;;  %3682 = vmatmul.mubr.bf16.vlgmr.msra.gmra.mrb[44].mxu1 %v5854_v24  ;;  %v3716_v24 = vld [vmem:[#allocation3 + $0x1160] sm:$0xff] }
 0xce0   :  { %3856 = vmatpush1.bf16.msra.mxu0 %v3704_v63  ;;  %3942 = vmatpush1.bf16.msra.mxu1 %v3706_v44  ;;  %v3764_v63 = vld [vmem:[#allocation3 + $0x12e0] sm:$0xff]  ;;  %v3766_v44 = vld [vmem:[#allocation3 + $0x12f0] sm:$0xff] }
 0xce1   :  { %3857 = vmatprep.subr.bf16.mxu0 %v3709_v18  ;;  %3943 = vmatprep.subr.bf16.mxu1 %v3711_v20  ;;  %v3769_v18 = vld [vmem:[#allocation3 + $0x1308] sm:$0xff]  ;;  %v3771_v20 = vld [vmem:[#allocation3 + $0x1318] sm:$0xff] }
 0xce4   :  { %3858 = vmatpush1.bf16.msra.mxu0 %v3708_v46  ;;  %3944 = vmatpush1.bf16.msra.mxu1 %v3710_v15  ;;  %v3498_v46 = vld [vmem:[#allocation9 + $0x4] ss:$8 sm:$0xf] }
 0xce5   :  { %3859 = vmatprep.subr.bf16.mxu0 %v3713_v42  ;;  %3945 = vmatprep.subr.bf16.mxu1 %v3715_v29  ;;  %v3503_v15 = vrot.slane %v3498_v46, %v5408_v35  ;;  %v3511_v42 = vrot.slane %v3498_v46, %v5418_v41  ;;  %v3507_v29 = vrot.slane %v3498_v46, %v5410_v37 }
 0xce8   :  { %3860 = vmatpush1.bf16.msra.mxu0 %v3712_v31  ;;  %3946 = vmatpush1.bf16.msra.mxu1 %v3714_v14  ;;  %v3515_v31 = vrot.slane %v3498_v46, %v5422_v53  ;;  %v3799_v46 = vld [vmem:[#allocation3 + $0x13f8] sm:$0xff] }
 0xce9   :  { %3861 = vmatprep.subr.bf16.mxu0 %v3717_v21  ;;  %3947 = vmatprep.subr.bf16.mxu1 %v3719_v45 }
 0xcec   :  { %3862 = vmatpush1.bf16.msra.mxu0 %v3716_v24  ;;  %3948 = vmatpush1.bf16.msra.mxu1 %v3718_v30 }
 0xced   :  { %3863 = vmatprep.subr.bf16.mxu0 %v3721_v1  ;;  %3949 = vmatprep.subr.bf16.mxu1 %v3723_v2 }
 0xcf0   :  { %3864 = vmatpush1.bf16.msra.mxu0 %v3720_v3  ;;  %3950 = vmatpush1.bf16.msra.mxu1 %v3722_v47 }
 0xcf1   :  { %3865 = vmatprep.subr.bf16.mxu0 %v3725_v50  ;;  %3951 = vmatprep.subr.bf16.mxu1 %v3727_v4 }
 0xcf4   :  { %3866 = vmatpush1.bf16.msra.mxu0 %v3724_v5  ;;  %3952 = vmatpush1.bf16.msra.mxu1 %v3726_v8 }
 0xcf5   :  { %3867 = vmatprep.subr.bf16.mxu0 %v3729_v9  ;;  %3953 = vmatprep.subr.bf16.mxu1 %v3731_v10 }
 0xcf8   :  { %3868 = vmatpush1.bf16.msra.mxu0 %v3728_v11  ;;  %3954 = vmatpush1.bf16.msra.mxu1 %v3730_v12 }
 0xcf9   :  { %3869 = vmatprep.subr.bf16.mxu0 %v3733_v6  ;;  %3955 = vmatprep.subr.bf16.mxu1 %v3735_v48 }
 0xcfc   :  { %3870 = vmatpush1.bf16.msra.mxu0 %v3732_v60  ;;  %3956 = vmatpush1.bf16.msra.mxu1 %v3734_v61 }
 0xcfd   :  { %3871 = vmatprep.subr.bf16.mxu0 %v3737_v38  ;;  %3957 = vmatprep.subr.bf16.mxu1 %v3739_v0 }
 0xd00   :  { %3872 = vmatpush1.bf16.msra.mxu0 %v3736_v49  ;;  %3958 = vmatpush1.bf16.msra.mxu1 %v3738_v33 }
 0xd01   :  { %3873 = vmatprep.subr.bf16.mxu0 %v3741_v39  ;;  %3959 = vmatprep.subr.bf16.mxu1 %v3743_v55 }
 0xd04   :  { %3874 = vmatpush1.bf16.msra.mxu0 %v3740_v36  ;;  %3960 = vmatpush1.bf16.msra.mxu1 %v3742_v52  ;;  %v3768_v52 = vld [vmem:[#allocation3 + $0x1300] sm:$0xff] }
 0xd05   :  { %3875 = vmatprep.subr.bf16.mxu0 %v3745_v54  ;;  %3961 = vmatprep.subr.bf16.mxu1 %v3747_v32  ;;  %v3770_v54 = vld [vmem:[#allocation3 + $0x1310] sm:$0xff]  ;;  %v3773_v32 = vld [vmem:[#allocation3 + $0x1328] sm:$0xff] }
 0xd08   :  { %3876 = vmatpush1.bf16.msra.mxu0 %v3744_v7  ;;  %3962 = vmatpush1.bf16.msra.mxu1 %v3746_v56  ;;  %v3775_v7 = vld [vmem:[#allocation3 + $0x1338] sm:$0xff]  ;;  %v3772_v56 = vld [vmem:[#allocation3 + $0x1320] sm:$0xff] }
 0xd09   :  { %3877 = vmatprep.subr.bf16.mxu0 %v3749_v57  ;;  %3963 = vmatprep.subr.bf16.mxu1 %v3751_v58  ;;  %v3774_v57 = vld [vmem:[#allocation3 + $0x1330] sm:$0xff]  ;;  %v3777_v58 = vld [vmem:[#allocation3 + $0x1348] sm:$0xff] }
 0xd0c   :  { %3878 = vmatpush1.bf16.msra.mxu0 %v3748_v59  ;;  %3964 = vmatpush1.bf16.msra.mxu1 %v3750_v40  ;;  %v3779_v59 = vld [vmem:[#allocation3 + $0x1358] sm:$0xff]  ;;  %v3776_v40 = vld [vmem:[#allocation3 + $0x1340] sm:$0xff] }
 0xd0d   :  { %3879 = vmatprep.subr.bf16.mxu0 %v3753_v27  ;;  %3965 = vmatprep.subr.bf16.mxu1 %v3755_v62  ;;  %v3778_v27 = vld [vmem:[#allocation3 + $0x1350] sm:$0xff]  ;;  %v3781_v62 = vld [vmem:[#allocation3 + $0x1368] sm:$0xff] }
 0xd10   :  { %3880 = vmatpush1.bf16.msra.mxu0 %v3752_v22  ;;  %3966 = vmatpush1.bf16.msra.mxu1 %v3754_v19  ;;  %v3783_v22 = vld [vmem:[#allocation3 + $0x1378] sm:$0xff]  ;;  %v3780_v19 = vld [vmem:[#allocation3 + $0x1360] sm:$0xff] }
 0xd11   :  { %3881 = vmatprep.subr.bf16.mxu0 %v3757_v17  ;;  %3967 = vmatprep.subr.bf16.mxu1 %v3759_v23  ;;  %v3782_v17 = vld [vmem:[#allocation3 + $0x1370] sm:$0xff]  ;;  %v3785_v23 = vld [vmem:[#allocation3 + $0x1388] sm:$0xff] }
 0xd14   :  { %3882 = vmatpush1.bf16.msra.mxu0 %v3756_v51  ;;  %3968 = vmatpush1.bf16.msra.mxu1 %v3758_v25  ;;  %v3787_v51 = vld [vmem:[#allocation3 + $0x1398] sm:$0xff]  ;;  %v3784_v25 = vld [vmem:[#allocation3 + $0x1380] sm:$0xff] }
 0xd15   :  { %3883 = vmatprep.subr.bf16.mxu0 %v3761_v28  ;;  %3969 = vmatprep.subr.bf16.mxu1 %v3763_v26  ;;  %v3786_v28 = vld [vmem:[#allocation3 + $0x1390] sm:$0xff]  ;;  %v3789_v26 = vld [vmem:[#allocation3 + $0x13a8] sm:$0xff] }
 0xd18   :  { %3884 = vmatpush1.bf16.msra.mxu0 %v3760_v13  ;;  %3970 = vmatpush1.bf16.msra.mxu1 %v3762_v16  ;;  %v3791_v13 = vld [vmem:[#allocation3 + $0x13b8] sm:$0xff]  ;;  %v3788_v16 = vld [vmem:[#allocation3 + $0x13a0] sm:$0xff] }
 0xd19   :  { %3885 = vmatprep.subr.bf16.mxu0 %v3765_v34  ;;  %3971 = vmatprep.subr.bf16.mxu1 %v3767_v43  ;;  %v3790_v34 = vld [vmem:[#allocation3 + $0x13b0] sm:$0xff]  ;;  %v3793_v43 = vld [vmem:[#allocation3 + $0x13c8] sm:$0xff] }
 0xd1c   :  { %3886 = vmatpush1.bf16.msra.mxu0 %v3764_v63  ;;  %3972 = vmatpush1.bf16.msra.mxu1 %v3766_v44  ;;  %v3795_v63 = vld [vmem:[#allocation3 + $0x13d8] sm:$0xff]  ;;  %v3792_v44 = vld [vmem:[#allocation3 + $0x13c0] sm:$0xff] }
 0xd1d   :  { %3898 = vmatprep.subr.bf16.mxu0 %v3769_v18  ;;  %3984 = vmatprep.subr.bf16.mxu1 %v3771_v20  ;;  %v3794_v18 = vld [vmem:[#allocation3 + $0x13d0] sm:$0xff]  ;;  %v3797_v20 = vld [vmem:[#allocation3 + $0x13e8] sm:$0xff] }
 0xdb2   :  { %v3597_v14 = vpop.f32.mrb[44].mxu0  ;;  %v3683_v21 = vpop.f32.mrb[44].mxu1 }
 0xdb3   :  { %v4464_v45 = vadd.f32 %v3597_v14, %v3503_v15  ;;  %v4468_v24 = vadd.f32 %v3683_v21, %v3511_v42  ;;  %v3599_v30 = vpop.f32.mrb[45].mxu0  ;;  %v3685_v1 = vpop.f32.mrb[45].mxu1  ;;  %v3800_v14 = vld [vmem:[#allocation3 + $0x1400] sm:$0xff]  ;;  %v3802_v21 = vld [vmem:[#allocation3 + $0x1410] sm:$0xff] }
 0xdb4   :  { %v4465_v2 = vadd.f32 %v3599_v30, %v3507_v29  ;;  %v4469_v3 = vadd.f32 %v3685_v1, %v3515_v31  ;;  %v3601_v47 = vpop.f32.mrb[46].mxu0  ;;  %v3687_v50 = vpop.f32.mrb[46].mxu1  ;;  %v3804_v30 = vld [vmem:[#allocation3 + $0x1420] sm:$0xff]  ;;  %v3806_v1 = vld [vmem:[#allocation3 + $0x1430] sm:$0xff] }
 0xdb5   :  { %v4466_v4 = vadd.f32 %v3601_v47, %v3503_v15  ;;  %v4470_v5 = vadd.f32 %v3687_v50, %v3511_v42  ;;  %v3603_v8 = vpop.f32.mrb[47].mxu0  ;;  %v3689_v9 = vpop.f32.mrb[47].mxu1  ;;  %v3692_v12 = vmax.f32 %v4464_v45, 0.0  ;;  %v3694_v6 = vmax.f32 %v4468_v24, 0.0  ;;  %v3796_v15 = vld [vmem:[#allocation3 + $0x13e0] sm:$0xff]  ;;  %v3798_v42 = vld [vmem:[#allocation3 + $0x13f0] sm:$0xff] }
 0xdb6   :  { %v4467_v10 = vadd.f32 %v3603_v8, %v3507_v29  ;;  %v4471_v11 = vadd.f32 %v3689_v9, %v3515_v31  ;;  %v3693_v61 = vmax.f32 %v4465_v2, 0.0  ;;  %v3695_v38 = vmax.f32 %v4469_v3, 0.0  ;;  %v3801_v29 = vld [vmem:[#allocation3 + $0x1408] sm:$0xff]  ;;  %v3803_v31 = vld [vmem:[#allocation3 + $0x1418] sm:$0xff]  ;;  %v3808_v47 = vld [vmem:[#allocation3 + $0x1440] sm:$0xff] }
 0xdb7   :  { %v3696_v48 = vmax.f32 %v4466_v4, 0.0  ;;  %v3698_v60 = vmax.f32 %v4470_v5, 0.0  ;;  %v3805_v45 = vld [vmem:[#allocation3 + $0x1428] sm:$0xff]  ;;  %v3807_v24 = vld [vmem:[#allocation3 + $0x1438] sm:$0xff]  ;;  %v3810_v50 = vld [vmem:[#allocation3 + $0x1450] sm:$0xff] }
 0xdb8   :  { %v3697_v0 = vmax.f32 %v4467_v10, 0.0  ;;  %v3699_v49 = vmax.f32 %v4471_v11, 0.0  ;;  %v3809_v2 = vld [vmem:[#allocation3 + $0x1448] sm:$0xff]  ;;  %v3811_v3 = vld [vmem:[#allocation3 + $0x1458] sm:$0xff]  ;;  %v3812_v8 = vld [vmem:[#allocation3 + $0x1460] sm:$0xff] }
 0xdb9   :  { %v3700_v33 = vpack.c.bf16 %v3696_v48, %v3692_v12  ;;  %v5862_v39 = vpack.c.bf16 %v3698_v60, %v3694_v6  ;;  %v3813_v4 = vld [vmem:[#allocation3 + $0x1468] sm:$0xff]  ;;  %v3815_v5 = vld [vmem:[#allocation3 + $0x1478] sm:$0xff]  ;;  %v3814_v9 = vld [vmem:[#allocation3 + $0x1470] sm:$0xff] }
 0xdba   :  { %v3701_v55 = vpack.c.bf16 %v3697_v0, %v3693_v61  ;;  %v3703_v36 = vpack.c.bf16 %v3699_v49, %v3695_v38  ;;  %v3817_v10 = vld [vmem:[#allocation3 + $0x1488] sm:$0xff]  ;;  %v3819_v11 = vld [vmem:[#allocation3 + $0x1498] sm:$0xff]  ;;  %v3816_v12 = vld [vmem:[#allocation3 + $0x1480] sm:$0xff] }
 0xdbb   :  { %v3818_v6 = vld [vmem:[#allocation3 + $0x1490] sm:$0xff]  ;;  %v3821_v48 = vld [vmem:[#allocation3 + $0x14a8] sm:$0xff]  ;;  %v3823_v60 = vld [vmem:[#allocation3 + $0x14b8] sm:$0xff] }
 0xdbc   :  { %3887 = vmatprep.mubr.bf16.mxu0 %v3701_v55  ;;  %3973 = vmatprep.mubr.bf16.mxu1 %v3701_v55  ;;  %v3820_v61 = vld [vmem:[#allocation3 + $0x14a0] sm:$0xff]  ;;  %v3822_v38 = vld [vmem:[#allocation3 + $0x14b0] sm:$0xff]  ;;  %v3825_v0 = vld [vmem:[#allocation3 + $0x14c8] sm:$0xff] }
 0xdbd   :  { %3888 = vmatmul.mubr.bf16.vlgmr.msra.gmra.mrb[48].mxu0 %v3700_v33  ;;  %3974 = vmatmul.mubr.bf16.vlgmr.msra.gmra.mrb[48].mxu1 %v3700_v33  ;;  %v3827_v49 = vld [vmem:[#allocation3 + $0x14d8] sm:$0xff]  ;;  %v3824_v33 = vld [vmem:[#allocation3 + $0x14c0] sm:$0xff]  ;;  %v3826_v55 = vld [vmem:[#allocation3 + $0x14d0] sm:$0xff] }
 0xdbe   :  { %3899 = vmatpush1.bf16.msra.mxu0 %v3768_v52  ;;  %3985 = vmatpush1.bf16.msra.mxu1 %v3770_v54  ;;  %v3831_v52 = vld [vmem:[#allocation3 + $0x14f8] sm:$0xff]  ;;  %v3828_v54 = vld [vmem:[#allocation3 + $0x14e0] sm:$0xff] }
 0xdbf   :  { %3930 = vmatprep.mubr.bf16.mxu0 %v3703_v36  ;;  %4016 = vmatprep.mubr.bf16.mxu1 %v3703_v36  ;;  %v3829_v36 = vld [vmem:[#allocation3 + $0x14e8] sm:$0xff] }
 0xdc0   :  { %3900 = vmatprep.subr.bf16.mxu0 %v3773_v32  ;;  %3986 = vmatprep.subr.bf16.mxu1 %v3775_v7  ;;  %v3830_v32 = vld [vmem:[#allocation3 + $0x14f0] sm:$0xff]  ;;  %v4047_v7 = vld [vmem:[#allocation3 + $0x1600] sm:$0xff] }
 0xdc2   :  { %3901 = vmatpush1.bf16.msra.mxu0 %v3772_v56  ;;  %3987 = vmatpush1.bf16.msra.mxu1 %v3774_v57  ;;  %v4063_v56 = vld [vmem:[#allocation3 + $0x1800] sm:$0xff] }
 0xdc3   :  { %3902 = vmatprep.subr.bf16.mxu0 %v3777_v58  ;;  %3988 = vmatprep.subr.bf16.mxu1 %v3779_v59  ;;  %v4039_v57 = vld [vmem:[#allocation3 + $0x1500] sm:$0xff] }
 0xdc4   :  { %v4055_v58 = vld [vmem:[#allocation3 + $0x1700] sm:$0xff] }
 0xdc5   :  { %v4048_v59 = vld [vmem:[#allocation3 + $0x1620] sm:$0xff] }
 0xdc6   :  { %3903 = vmatpush1.bf16.msra.mxu0 %v3776_v40  ;;  %3989 = vmatpush1.bf16.msra.mxu1 %v3778_v27  ;;  %v4064_v40 = vld [vmem:[#allocation3 + $0x1820] sm:$0xff] }
 0xdc7   :  { %3904 = vmatprep.subr.bf16.mxu0 %v3781_v62  ;;  %3990 = vmatprep.subr.bf16.mxu1 %v3783_v22  ;;  %v4040_v27 = vld [vmem:[#allocation3 + $0x1520] sm:$0xff] }
 0xdc8   :  { %v4056_v62 = vld [vmem:[#allocation3 + $0x1720] sm:$0xff] }
 0xdc9   :  { %v4049_v22 = vld [vmem:[#allocation3 + $0x1640] sm:$0xff] }
 0xdca   :  { %3905 = vmatpush1.bf16.msra.mxu0 %v3780_v19  ;;  %3991 = vmatpush1.bf16.msra.mxu1 %v3782_v17  ;;  %v4065_v19 = vld [vmem:[#allocation3 + $0x1840] sm:$0xff] }
 0xdcb   :  { %3906 = vmatprep.subr.bf16.mxu0 %v3785_v23  ;;  %3992 = vmatprep.subr.bf16.mxu1 %v3787_v51  ;;  %v4041_v17 = vld [vmem:[#allocation3 + $0x1540] sm:$0xff] }
 0xdcc   :  { %v4057_v23 = vld [vmem:[#allocation3 + $0x1740] sm:$0xff] }
 0xdcd   :  { %v4050_v51 = vld [vmem:[#allocation3 + $0x1660] sm:$0xff] }
 0xdce   :  { %3907 = vmatpush1.bf16.msra.mxu0 %v3784_v25  ;;  %3993 = vmatpush1.bf16.msra.mxu1 %v3786_v28  ;;  %v4066_v25 = vld [vmem:[#allocation3 + $0x1860] sm:$0xff] }
 0xdcf   :  { %3908 = vmatprep.subr.bf16.mxu0 %v3789_v26  ;;  %3994 = vmatprep.subr.bf16.mxu1 %v3791_v13  ;;  %v4058_v28 = vld [vmem:[#allocation3 + $0x1760] sm:$0xff] }
 0xdd0   :  { %v4051_v26 = vld [vmem:[#allocation3 + $0x1680] sm:$0xff] }
 0xdd1   :  { %v4067_v13 = vld [vmem:[#allocation3 + $0x1880] sm:$0xff] }
 0xdd2   :  { %3909 = vmatpush1.bf16.msra.mxu0 %v3788_v16  ;;  %3995 = vmatpush1.bf16.msra.mxu1 %v3790_v34  ;;  %v4043_v16 = vld [vmem:[#allocation3 + $0x1580] sm:$0xff] }
 0xdd3   :  { %3910 = vmatprep.subr.bf16.mxu0 %v3793_v43  ;;  %3996 = vmatprep.subr.bf16.mxu1 %v3795_v63  ;;  %v4059_v34 = vld [vmem:[#allocation3 + $0x1780] sm:$0xff] }
 0xdd4   :  { %v4052_v43 = vld [vmem:[#allocation3 + $0x16a0] sm:$0xff] }
 0xdd5   :  { %v4068_v63 = vld [vmem:[#allocation3 + $0x18a0] sm:$0xff] }
 0xdd6   :  { %3911 = vmatpush1.bf16.msra.mxu0 %v3792_v44  ;;  %3997 = vmatpush1.bf16.msra.mxu1 %v3794_v18  ;;  %v4044_v44 = vld [vmem:[#allocation3 + $0x15a0] sm:$0xff] }
 0xdd7   :  { %3912 = vmatprep.subr.bf16.mxu0 %v3797_v20  ;;  %3998 = vmatprep.subr.bf16.mxu1 %v3799_v46  ;;  %v4060_v18 = vld [vmem:[#allocation3 + $0x17a0] sm:$0xff] }
 0xdd8   :  { %v4053_v20 = vld [vmem:[#allocation3 + $0x16c0] sm:$0xff] }
 0xdd9   :  { %v4069_v46 = vld [vmem:[#allocation3 + $0x18c0] sm:$0xff] }
 0xdda   :  { %3913 = vmatpush1.bf16.msra.mxu0 %v3796_v15  ;;  %3999 = vmatpush1.bf16.msra.mxu1 %v3798_v42  ;;  %v4045_v15 = vld [vmem:[#allocation3 + $0x15c0] sm:$0xff] }
 0xddb   :  { %3914 = vmatprep.subr.bf16.mxu0 %v3801_v29  ;;  %4000 = vmatprep.subr.bf16.mxu1 %v3803_v31  ;;  %v4061_v42 = vld [vmem:[#allocation3 + $0x17c0] sm:$0xff] }
 0xddc   :  { %v4054_v29 = vld [vmem:[#allocation3 + $0x16e0] sm:$0xff] }
 0xddd   :  { %v4070_v31 = vld [vmem:[#allocation3 + $0x18e0] sm:$0xff] }
 0xdde   :  { %3915 = vmatpush1.bf16.msra.mxu0 %v3800_v14  ;;  %4001 = vmatpush1.bf16.msra.mxu1 %v3802_v21  ;;  %v4046_v14 = vld [vmem:[#allocation3 + $0x15e0] sm:$0xff] }
 0xddf   :  { %3916 = vmatprep.subr.bf16.mxu0 %v3805_v45  ;;  %4002 = vmatprep.subr.bf16.mxu1 %v3807_v24  ;;  %v4062_v21 = vld [vmem:[#allocation3 + $0x17e0] sm:$0xff] }
 0xde0   :  { %v3833_v45 = vld [vmem:[#allocation9 + $0x5] ss:$8 sm:$0xf] }
 0xde1   :  { %v3838_v24 = vrot.slane %v3833_v45, %v5408_v35 }
 0xde2   :  { %3917 = vmatpush1.bf16.msra.mxu0 %v3804_v30  ;;  %4003 = vmatpush1.bf16.msra.mxu1 %v3806_v1  ;;  %v3846_v30 = vrot.slane %v3833_v45, %v5418_v41  ;;  %v3842_v1 = vrot.slane %v3833_v45, %v5410_v37 }
 0xde3   :  { %3918 = vmatprep.subr.bf16.mxu0 %v3809_v2  ;;  %4004 = vmatprep.subr.bf16.mxu1 %v3811_v3  ;;  %v3850_v2 = vrot.slane %v3833_v45, %v5422_v53 }
 0xde6   :  { %3919 = vmatpush1.bf16.msra.mxu0 %v3808_v47  ;;  %4005 = vmatpush1.bf16.msra.mxu1 %v3810_v50 }
 0xde7   :  { %3920 = vmatprep.subr.bf16.mxu0 %v3813_v4  ;;  %4006 = vmatprep.subr.bf16.mxu1 %v3815_v5 }
 0xdea   :  { %3921 = vmatpush1.bf16.msra.mxu0 %v3812_v8  ;;  %4007 = vmatpush1.bf16.msra.mxu1 %v3814_v9 }
 0xdeb   :  { %3922 = vmatprep.subr.bf16.mxu0 %v3817_v10  ;;  %4008 = vmatprep.subr.bf16.mxu1 %v3819_v11 }
 0xdee   :  { %3923 = vmatpush1.bf16.msra.mxu0 %v3816_v12  ;;  %4009 = vmatpush1.bf16.msra.mxu1 %v3818_v6 }
 0xdef   :  { %3924 = vmatprep.subr.bf16.mxu0 %v3821_v48  ;;  %4010 = vmatprep.subr.bf16.mxu1 %v3823_v60 }
 0xdf2   :  { %3925 = vmatpush1.bf16.msra.mxu0 %v3820_v61  ;;  %4011 = vmatpush1.bf16.msra.mxu1 %v3822_v38 }
 0xdf3   :  { %3926 = vmatprep.subr.bf16.mxu0 %v3825_v0  ;;  %4012 = vmatprep.subr.bf16.mxu1 %v3827_v49 }
 0xdf6   :  { %3927 = vmatpush1.bf16.msra.mxu0 %v3824_v33  ;;  %4013 = vmatpush1.bf16.msra.mxu1 %v3826_v55 }
 0xdf7   :  { %3928 = vmatprep.subr.bf16.mxu0 %v3829_v36  ;;  %4014 = vmatprep.subr.bf16.mxu1 %v3831_v52 }
 0xdfa   :  { %3929 = vmatpush1.bf16.msra.mxu0 %v3828_v54  ;;  %4015 = vmatpush1.bf16.msra.mxu1 %v3830_v32 }
 0xdfb   :  { %4340 = vmatprep.subr.bf16.mxu0 %v4047_v7  ;;  %4362 = vmatprep.subr.bf16.mxu1 %v4063_v56 }
 0xdfd   :  { %3931 = vmatmul.mubr.bf16.vlgmr.msra.gmra.mrb[48].mxu0 %v5862_v39  ;;  %4017 = vmatmul.mubr.bf16.vlgmr.msra.gmra.mrb[48].mxu1 %v5862_v39  ;;  %v4042_v39 = vld [vmem:[#allocation3 + $0x1560] sm:$0xff] }
 0xdfe   :  { %4341 = vmatpush3.bf16.msra.mxu0 %v4039_v57  ;;  %4363 = vmatpush3.bf16.msra.mxu1 %v4055_v58  ;;  %v4071_v58 = vld [vmem:[#allocation9 + $0x6] ss:$0 sm:$0xff] }
 0xdff   :  { %4342 = vmatprep.subr.bf16.mxu0 %v4048_v59  ;;  %4364 = vmatprep.subr.bf16.mxu1 %v4064_v40 }
 0xe02   :  { %4343 = vmatpush3.bf16.msra.mxu0 %v4040_v27  ;;  %4365 = vmatpush3.bf16.msra.mxu1 %v4056_v62 }
 0xe03   :  { %4344 = vmatprep.subr.bf16.mxu0 %v4049_v22  ;;  %4366 = vmatprep.subr.bf16.mxu1 %v4065_v19 }
 0xe06   :  { %4345 = vmatpush3.bf16.msra.mxu0 %v4041_v17  ;;  %4367 = vmatpush3.bf16.msra.mxu1 %v4057_v23 }
 0xe07   :  { %4346 = vmatprep.subr.bf16.mxu0 %v4050_v51  ;;  %4368 = vmatprep.subr.bf16.mxu1 %v4066_v25 }
 0xe0a   :  { %4347 = vmatpush3.bf16.msra.mxu0 %v4042_v39  ;;  %4369 = vmatpush3.bf16.msra.mxu1 %v4058_v28 }
 0xe0b   :  { %4348 = vmatprep.subr.bf16.mxu0 %v4051_v26  ;;  %4370 = vmatprep.subr.bf16.mxu1 %v4067_v13 }
 0xe0e   :  { %4349 = vmatpush3.bf16.msra.mxu0 %v4043_v16  ;;  %4371 = vmatpush3.bf16.msra.mxu1 %v4059_v34 }
 0xe0f   :  { %4350 = vmatprep.subr.bf16.mxu0 %v4052_v43  ;;  %4372 = vmatprep.subr.bf16.mxu1 %v4068_v63 }
 0xe12   :  { %4351 = vmatpush3.bf16.msra.mxu0 %v4044_v44  ;;  %4373 = vmatpush3.bf16.msra.mxu1 %v4060_v18 }
 0xe13   :  { %4352 = vmatprep.subr.bf16.mxu0 %v4053_v20  ;;  %4374 = vmatprep.subr.bf16.mxu1 %v4069_v46 }
 0xe16   :  { %4353 = vmatpush3.bf16.msra.mxu0 %v4045_v15  ;;  %4375 = vmatpush3.bf16.msra.mxu1 %v4061_v42 }
 0xe17   :  { %4354 = vmatprep.subr.bf16.mxu0 %v4054_v29  ;;  %4376 = vmatprep.subr.bf16.mxu1 %v4070_v31 }
 0xe1a   :  { %4355 = vmatpush3.bf16.msra.mxu0 %v4046_v14  ;;  %4377 = vmatpush3.bf16.msra.mxu1 %v4062_v21 }
 0xed0   :  { %v3932_v3 = vpop.f32.mrb[48].mxu0  ;;  %v4018_v47 = vpop.f32.mrb[48].mxu1 }
 0xed1   :  { %v4472_v50 = vadd.f32 %v3932_v3, %v3838_v24  ;;  %v4476_v4 = vadd.f32 %v4018_v47, %v3846_v30  ;;  %v3934_v5 = vpop.f32.mrb[49].mxu0  ;;  %v4020_v8 = vpop.f32.mrb[49].mxu1 }
 0xed2   :  { %v4473_v9 = vadd.f32 %v3934_v5, %v3842_v1  ;;  %v4477_v10 = vadd.f32 %v4020_v8, %v3850_v2  ;;  %v3936_v11 = vpop.f32.mrb[50].mxu0  ;;  %v4022_v12 = vpop.f32.mrb[50].mxu1 }
 0xed3   :  { %v4474_v6 = vadd.f32 %v3936_v11, %v3838_v24  ;;  %v4478_v48 = vadd.f32 %v4022_v12, %v3846_v30  ;;  %v3938_v60 = vpop.f32.mrb[51].mxu0  ;;  %v4024_v35 = vpop.f32.mrb[51].mxu1  ;;  %v4027_v38 = vmax.f32 %v4472_v50, 0.0  ;;  %v4029_v37 = vmax.f32 %v4476_v4, 0.0 }
 0xed4   :  { %v4475_v61 = vadd.f32 %v3938_v60, %v3842_v1  ;;  %v4479_v41 = vadd.f32 %v4024_v35, %v3850_v2  ;;  %v4028_v49 = vmax.f32 %v4473_v9, 0.0  ;;  %v4030_v33 = vmax.f32 %v4477_v10, 0.0 }
 0xed5   :  { %v4031_v0 = vmax.f32 %v4474_v6, 0.0  ;;  %v4033_v53 = vmax.f32 %v4478_v48, 0.0 }
 0xed6   :  { %v4032_v55 = vmax.f32 %v4475_v61, 0.0  ;;  %v4034_v36 = vmax.f32 %v4479_v41, 0.0 }
 0xed7   :  { %v4035_v52 = vpack.c.bf16 %v4031_v0, %v4027_v38  ;;  %v4037_v54 = vpack.c.bf16 %v4033_v53, %v4029_v37 }
 0xed8   :  { %v4036_v32 = vpack.c.bf16 %v4032_v55, %v4028_v49  ;;  %v4038_v7 = vpack.c.bf16 %v4034_v36, %v4030_v33 }
 0xeda   :  { %4104 = vmatprep.mubr.bf16.mxu0 %v4036_v32  ;;  %4145 = vmatprep.mubr.bf16.mxu1 %v4038_v7 }
 0xedb   :  { %4105 = vmatmul.mubr.bf16.vlgmr.msra.gmra.mrb[52].mxu0 %v4035_v52  ;;  %4146 = vmatmul.mubr.bf16.vlgmr.msra.gmra.mrb[52].mxu1 %v4037_v54 }
 0xfae   :  { %v4356_v56 = vpop.f32.mrb[52].mxu0  ;;  %v4378_v57 = vpop.f32.mrb[52].mxu1 }
 0xfaf   :  { %v4357_v59 = vpop.f32.mrb[53].mxu0  ;;  %v4379_v40 = vpop.f32.mrb[53].mxu1 }
 0xfb0   :  { %v4358_v27 = vadd.f32 %v4357_v59, %v4356_v56  ;;  %v4380_v62 = vadd.f32 %v4379_v40, %v4378_v57  ;;  %v4359_v22 = vpop.f32.mrb[54].mxu0  ;;  %v4381_v19 = vpop.f32.mrb[54].mxu1 }
 0xfb1   :  { %v4360_v17 = vpop.f32.mrb[55].mxu0  ;;  %v4382_v23 = vpop.f32.mrb[55].mxu1 }
 0xfb2   :  { %v4107_v51 = vadd.f32 %v4358_v27, %v4071_v58  ;;  %v4361_v25 = vadd.f32 %v4360_v17, %v4359_v22  ;;  %v4383_v39 = vadd.f32 %v4382_v23, %v4381_v19 }
 0xfb4   :  { %v4148_v28 = vadd.f32 %v4380_v62, %v4107_v51  ;;  %v4110_v26 = vadd.f32 %v4361_v25, %v4071_v58 }
 0xfb6   :  { %4154 = vst [vmem:[%s5882_s6] sm:$0xff] %v4148_v28  ;;  %v4151_v13 = vadd.f32 %v4383_v39, %v4110_v26 }
 0xfb8   :  { %4155 = vst [vmem:[%s5882_s6 + $0x8] sm:$0xff] %v4151_v13 }
 0xfb9   :  { %4160 = vsyncpa [#allocation6], 1 }
 0xfba   :  { %4161 = vsyncpa [#allocation8], 1 }
 0xfbb   :  { %4162 = vsyncmov [#allocation4] }
 0xfbe   :  { %s4163_s10 = vpop.sfrf %4162 }
 0xfbf   :  { %p4339_p10 = scmp.ne.s32.totalorder %s4163_s10, 0 }
 0xfc1   :  { %4167 = shalt.err (%p4339_p10)  }

</bundles_post_ra>
